<compile_context>
chip_gen: v7x
topology: tpu7x:2x2x1
jax: 0.10.0
libtpu: 0.0.40
codegen_flags: <defaults>
</compile_context>

<pallas_src>
import numpy as np
import jax
import jax.numpy as jnp
from jax.experimental import pallas as pl
from jax.experimental.pallas import tpu as pltpu

SEQ_LEN = 48          # implied by fc1 = Linear(384, 128): 384 = 32 * (48 / 4)
C1 = 64               # conv1 out channels
C2 = 32               # conv2 out channels
HID = 128             # fc1 hidden


def fused_cnn_kernel(x_ref, w1_ref, b1_ref, w2_ref, b2_ref,
                     wf1_ref, bf1_ref, wf2_ref, bf2_ref,
                     out_ref, x1s_ref, x2s_ref):
    BT, C_in, L = x_ref.shape
    c1 = w1_ref.shape[0]
    c2 = w2_ref.shape[0]
    Lp = L // 2
    Lq = Lp // 2
    F = c2 * Lq
    NL1, NL2, NL3 = BT * L, BT * Lp, BT * Lq
    f32, bf16 = jnp.float32, jnp.bfloat16

    # ---- conv1: im2col (taps on sublanes, batch gathered into lanes) + one matmul ----
    x1s_ref[...] = jnp.zeros(x1s_ref.shape, x1s_ref.dtype)
    for b in range(BT):
        xb = x_ref[b]                                               # (C_in, L)
        x1s_ref[0 * C_in:1 * C_in, b * L + 1:(b + 1) * L] = xb[:, 0:L - 1]   # tap k=0: x[l-1]
        x1s_ref[1 * C_in:2 * C_in, b * L:(b + 1) * L] = xb                   # tap k=1: x[l]
        x1s_ref[2 * C_in:3 * C_in, b * L:(b + 1) * L - 1] = xb[:, 1:L]       # tap k=2: x[l+1]
    h1 = jnp.dot(w1_ref[...], x1s_ref[...].astype(bf16),
                 preferred_element_type=f32) + b1_ref[...]
    h1 = jnp.maximum(h1, 0.0)                                       # (c1, BT*L)

    # ---- maxpool1 (kernel 2): even/odd lane selectors built from iota ----
    r1 = jax.lax.broadcasted_iota(jnp.int32, (NL1, NL2), 0)
    q1 = jax.lax.broadcasted_iota(jnp.int32, (NL1, NL2), 1)
    pe1 = (r1 == 2 * q1).astype(f32)
    po1 = (r1 == 2 * q1 + 1).astype(f32)
    p1 = jnp.maximum(jnp.dot(h1, pe1, preferred_element_type=f32),
                     jnp.dot(h1, po1, preferred_element_type=f32))  # (c1, BT*Lp)

    # ---- conv2: im2col + one matmul ----
    x2s_ref[...] = jnp.zeros(x2s_ref.shape, x2s_ref.dtype)
    for b in range(BT):
        lo, hi = b * Lp, (b + 1) * Lp
        x2s_ref[0 * c1:1 * c1, lo + 1:hi] = p1[:, lo:hi - 1]        # tap k=0
        x2s_ref[1 * c1:2 * c1, lo:hi] = p1[:, lo:hi]                # tap k=1
        x2s_ref[2 * c1:3 * c1, lo:hi - 1] = p1[:, lo + 1:hi]        # tap k=2
    h2 = jnp.dot(w2_ref[...], x2s_ref[...].astype(bf16),
                 preferred_element_type=f32) + b2_ref[...]
    h2 = jnp.maximum(h2, 0.0)                                       # (c2, BT*Lp)

    # ---- maxpool2 ----
    r2 = jax.lax.broadcasted_iota(jnp.int32, (NL2, NL3), 0)
    q2 = jax.lax.broadcasted_iota(jnp.int32, (NL2, NL3), 1)
    pe2 = (r2 == 2 * q2).astype(f32)
    po2 = (r2 == 2 * q2 + 1).astype(f32)
    p2 = jnp.maximum(jnp.dot(h2, pe2, preferred_element_type=f32),
                     jnp.dot(h2, po2, preferred_element_type=f32))  # (c2, BT*Lq)

    # ---- flatten (torch .view(B,-1) order) without leaving VMEM ----
    # flatT[c*Lq + l, b] = p2[c, b*Lq + l]
    er = jax.lax.broadcasted_iota(jnp.int32, (F, c2), 0)
    ec = jax.lax.broadcasted_iota(jnp.int32, (F, c2), 1)
    expand = ((er >= Lq * ec) & (er < Lq * ec + Lq)).astype(f32)    # (F, c2): r//Lq == c
    tmp = jnp.dot(expand, p2, preferred_element_type=f32)           # (F, BT*Lq)
    kr = jax.lax.broadcasted_iota(jnp.int32, (F, NL3), 0)
    kc = jax.lax.broadcasted_iota(jnp.int32, (F, NL3), 1)
    keep = ((kr % Lq) == (kc % Lq)).astype(f32)
    orw = jax.lax.broadcasted_iota(jnp.int32, (NL3, BT), 0)
    ocl = jax.lax.broadcasted_iota(jnp.int32, (NL3, BT), 1)
    osum = ((orw >= Lq * ocl) & (orw < Lq * ocl + Lq)).astype(f32)  # (BT*Lq, BT): j//Lq == b
    flatT = jnp.dot(tmp * keep, osum, preferred_element_type=f32)   # (F, BT)

    # ---- fc1 + ReLU, fc2 (batch stays in lanes) ----
    hf = jnp.dot(wf1_ref[...], flatT.astype(bf16),
                 preferred_element_type=f32) + bf1_ref[...]
    hf = jnp.maximum(hf, 0.0)                                       # (HID, BT)
    outT = jnp.dot(wf2_ref[...], hf.astype(bf16),
                   preferred_element_type=f32) + bf2_ref[...]       # (out_size, BT)
    out_ref[0] = outT


def prepare_params(params):
    """One-time parameter re-layout (hoisted out of the per-call path)."""
    W1, b1, W2, b2, Wf1, bf1, Wf2, bf2 = params
    # im2col weight layout: Wr[o, k*C_in + i] = W[o, i, k]
    w1r = jnp.transpose(W1, (0, 2, 1)).reshape(W1.shape[0], -1).astype(jnp.bfloat16)
    w2r = jnp.transpose(W2, (0, 2, 1)).reshape(W2.shape[0], -1).astype(jnp.bfloat16)
    return dict(
        w1r=w1r, b1=b1.reshape(-1, 1).astype(jnp.float32),
        w2r=w2r, b2=b2.reshape(-1, 1).astype(jnp.float32),
        wf1=Wf1.astype(jnp.bfloat16), bf1=bf1.reshape(-1, 1).astype(jnp.float32),
        wf2=Wf2.astype(jnp.bfloat16), bf2=bf2.reshape(-1, 1).astype(jnp.float32),
    )


def cnn_forward(x, prep):
    B, C_in, L = x.shape
    c1 = prep['w1r'].shape[0]
    c2 = prep['w2r'].shape[0]
    out_size = prep['wf2'].shape[0]
    F = prep['wf1'].shape[1]
    assert c2 * (L // 4) == F, "sequence length inconsistent with fc1"

    BT = min(8, B)                       # samples per grid step
    G = -(-B // BT)
    Bp = G * BT
    if Bp != B:
        x = jnp.pad(x, ((0, Bp - B), (0, 0), (0, 0)))

    res = pl.pallas_call(
        fused_cnn_kernel,
        out_shape=jax.ShapeDtypeStruct((G, out_size, BT), jnp.float32),
        grid=(G,),
        in_specs=[
            pl.BlockSpec((BT, C_in, L), lambda g: (g, 0, 0)),
            pl.BlockSpec(prep['w1r'].shape, lambda g: (0, 0)),
            pl.BlockSpec(prep['b1'].shape, lambda g: (0, 0)),
            pl.BlockSpec(prep['w2r'].shape, lambda g: (0, 0)),
            pl.BlockSpec(prep['b2'].shape, lambda g: (0, 0)),
            pl.BlockSpec(prep['wf1'].shape, lambda g: (0, 0)),
            pl.BlockSpec(prep['bf1'].shape, lambda g: (0, 0)),
            pl.BlockSpec(prep['wf2'].shape, lambda g: (0, 0)),
            pl.BlockSpec(prep['bf2'].shape, lambda g: (0, 0)),
        ],
        out_specs=pl.BlockSpec((1, out_size, BT), lambda g: (g, 0, 0)),
        scratch_shapes=[
            pltpu.VMEM((3 * C_in, BT * L), jnp.float32),        # conv1 im2col
            pltpu.VMEM((3 * c1, BT * (L // 2)), jnp.float32),   # conv2 im2col
        ],
        compiler_params=pltpu.CompilerParams(
            dimension_semantics=("parallel",)),
    )(x, prep['w1r'], prep['b1'], prep['w2r'], prep['b2'],
      prep['wf1'], prep['bf1'], prep['wf2'], prep['bf2'])

    # (G, out, BT) -> (B, out); tiny per-call glue.
    out = jnp.transpose(res, (0, 2, 1)).reshape(Bp, out_size)
    return out[:B]


def reference_forward(x, params):
    """Pure-JAX reference with the exact PyTorch semantics (fp32)."""
    W1, b1, W2, b2, Wf1, bf1, Wf2, bf2 = params
    dn = ('NCH', 'OIH', 'NCH')
    y = jax.lax.conv_general_dilated(x, W1, (1,), ((1, 1),), dimension_numbers=dn)
    y = jnp.maximum(y + b1[None, :, None], 0.0)
    y = jax.lax.reduce_window(y, -jnp.inf, jax.lax.max, (1, 1, 2), (1, 1, 2), 'VALID')
    y = jax.lax.conv_general_dilated(y, W2, (1,), ((1, 1),), dimension_numbers=dn)
    y = jnp.maximum(y + b2[None, :, None], 0.0)
    y = jax.lax.reduce_window(y, -jnp.inf, jax.lax.max, (1, 1, 2), (1, 1, 2), 'VALID')
    y = y.reshape(y.shape[0], -1)
    y = jnp.maximum(y @ Wf1.T + bf1, 0.0)
    return y @ Wf2.T + bf2


if __name__ == "__main__":
    B, C_IN, OUT_SIZE = 2, 4, 8
    FLAT = C2 * (SEQ_LEN // 4)   # 384

    key = jax.random.PRNGKey(0)
    ks = jax.random.split(key, 9)
    params = (
        jax.random.normal(ks[0], (C1, C_IN, 3), jnp.float32) * 0.1,     # conv1 weight
        jax.random.normal(ks[1], (C1,), jnp.float32) * 0.1,             # conv1 bias
        jax.random.normal(ks[2], (C2, C1, 3), jnp.float32) * 0.1,       # conv2 weight
        jax.random.normal(ks[3], (C2,), jnp.float32) * 0.1,             # conv2 bias
        jax.random.normal(ks[4], (HID, FLAT), jnp.float32) * 0.05,      # fc1 weight
        jax.random.normal(ks[5], (HID,), jnp.float32) * 0.05,           # fc1 bias
        jax.random.normal(ks[6], (OUT_SIZE, HID), jnp.float32) * 0.05,  # fc2 weight
        jax.random.normal(ks[7], (OUT_SIZE,), jnp.float32) * 0.05,      # fc2 bias
    )
    x = jax.random.normal(ks[8], (B, C_IN, SEQ_LEN), jnp.float32)

    prep = jax.tree_util.tree_map(lambda a: a, prepare_params(params))  # one-time re-layout
    fwd = jax.jit(cnn_forward)

    out = jax.block_until_ready(fwd(x, prep))
    ref = jax.block_until_ready(reference_forward(x, params))

    assert out.shape == (B, OUT_SIZE)
    # bf16 MXU inputs with fp32 accumulation -> loose-ish tolerance
    np.testing.assert_allclose(np.asarray(out), np.asarray(ref), rtol=5e-2, atol=5e-2)

    print("KERNEL_OK")
</pallas_src>

<mosaic_0001>
module attributes {stable_mosaic.version = 11 : i64} {
  func.func @fused_cnn_kernel(%arg0: i32, %arg1: memref<2x4x48xf32, #tpu.memory_space<vmem>>, %arg2: memref<64x12xbf16, #tpu.memory_space<vmem>>, %arg3: memref<64x1xf32, #tpu.memory_space<vmem>>, %arg4: memref<32x192xbf16, #tpu.memory_space<vmem>>, %arg5: memref<32x1xf32, #tpu.memory_space<vmem>>, %arg6: memref<128x384xbf16, #tpu.memory_space<vmem>>, %arg7: memref<128x1xf32, #tpu.memory_space<vmem>>, %arg8: memref<8x128xbf16, #tpu.memory_space<vmem>>, %arg9: memref<8x1xf32, #tpu.memory_space<vmem>>, %arg10: memref<1x8x2xf32, #tpu.memory_space<vmem>>, %arg11: memref<12x96xf32, #tpu.memory_space<vmem>>, %arg12: memref<192x48xf32, #tpu.memory_space<vmem>>) attributes {dimension_semantics = [#tpu.dimension_semantics<parallel>], iteration_bounds = array<i64: 1>, scalar_prefetch = 0 : i64, scratch_operands = 2 : i64, tpu.core_type = #tpu.core_type<tc>, window_params = [{transform_indices = @transform_0, window_bounds = array<i64: 2, 4, 48>}, {pipeline_mode = #tpu.pipeline_mode<synchronous>, transform_indices = @transform_1, window_bounds = array<i64: 64, 12>}, {pipeline_mode = #tpu.pipeline_mode<synchronous>, transform_indices = @transform_2, window_bounds = array<i64: 64, 1>}, {pipeline_mode = #tpu.pipeline_mode<synchronous>, transform_indices = @transform_3, window_bounds = array<i64: 32, 192>}, {pipeline_mode = #tpu.pipeline_mode<synchronous>, transform_indices = @transform_4, window_bounds = array<i64: 32, 1>}, {pipeline_mode = #tpu.pipeline_mode<synchronous>, transform_indices = @transform_5, window_bounds = array<i64: 128, 384>}, {pipeline_mode = #tpu.pipeline_mode<synchronous>, transform_indices = @transform_6, window_bounds = array<i64: 128, 1>}, {pipeline_mode = #tpu.pipeline_mode<synchronous>, transform_indices = @transform_7, window_bounds = array<i64: 8, 128>}, {pipeline_mode = #tpu.pipeline_mode<synchronous>, transform_indices = @transform_8, window_bounds = array<i64: 8, 1>}, {transform_indices = @transform_9, window_bounds = array<i64: 1, 8, 2>}]} {
    %cst = arith.constant 0.000000e+00 : f32
    %0 = vector.broadcast %cst : f32 to vector<12x96xf32>
    %c0 = arith.constant 0 : index
    %c0_0 = arith.constant 0 : index
    %1 = vector.load %arg11[%c0, %c0_0] : memref<12x96xf32, #tpu.memory_space<vmem>>, vector<12x96xf32>
    tpu.vector_store %arg11[%c0, %c0_0], %0 {strides = array<i32>} : memref<12x96xf32, #tpu.memory_space<vmem>>, vector<12x96xf32>,
    %c0_1 = arith.constant 0 : index
    %c0_2 = arith.constant 0 : index
    %c0_3 = arith.constant 0 : index
    %2 = vector.load %arg1[%c0_1, %c0_2, %c0_3] : memref<2x4x48xf32, #tpu.memory_space<vmem>>, vector<1x4x48xf32>
    %3 = vector.shape_cast %2 : vector<1x4x48xf32> to vector<4x48xf32>
    %4 = vector.extract_strided_slice %3 {offsets = [0, 0], sizes = [4, 47], strides = [1, 1]} : vector<4x48xf32> to vector<4x47xf32>
    %c0_4 = arith.constant 0 : index
    %c1 = arith.constant 1 : index
    %5 = vector.load %arg11[%c0_4, %c1] : memref<12x96xf32, #tpu.memory_space<vmem>>, vector<4x47xf32>
    tpu.vector_store %arg11[%c0_4, %c1], %4 {strides = array<i32>} : memref<12x96xf32, #tpu.memory_space<vmem>>, vector<4x47xf32>,
    %c4 = arith.constant 4 : index
    %c0_5 = arith.constant 0 : index
    %6 = vector.load %arg11[%c4, %c0_5] : memref<12x96xf32, #tpu.memory_space<vmem>>, vector<4x48xf32>
    tpu.vector_store %arg11[%c4, %c0_5], %3 {strides = array<i32>} : memref<12x96xf32, #tpu.memory_space<vmem>>, vector<4x48xf32>,
    %7 = vector.extract_strided_slice %3 {offsets = [0, 1], sizes = [4, 47], strides = [1, 1]} : vector<4x48xf32> to vector<4x47xf32>
    %c8 = arith.constant 8 : index
    %c0_6 = arith.constant 0 : index
    %8 = vector.load %arg11[%c8, %c0_6] : memref<12x96xf32, #tpu.memory_space<vmem>>, vector<4x47xf32>
    tpu.vector_store %arg11[%c8, %c0_6], %7 {strides = array<i32>} : memref<12x96xf32, #tpu.memory_space<vmem>>, vector<4x47xf32>,
    %c1_7 = arith.constant 1 : index
    %c0_8 = arith.constant 0 : index
    %c0_9 = arith.constant 0 : index
    %9 = vector.load %arg1[%c1_7, %c0_8, %c0_9] : memref<2x4x48xf32, #tpu.memory_space<vmem>>, vector<1x4x48xf32>
    %10 = vector.shape_cast %9 : vector<1x4x48xf32> to vector<4x48xf32>
    %11 = vector.extract_strided_slice %10 {offsets = [0, 0], sizes = [4, 47], strides = [1, 1]} : vector<4x48xf32> to vector<4x47xf32>
    %c0_10 = arith.constant 0 : index
    %c49 = arith.constant 49 : index
    %12 = vector.load %arg11[%c0_10, %c49] : memref<12x96xf32, #tpu.memory_space<vmem>>, vector<4x47xf32>
    tpu.vector_store %arg11[%c0_10, %c49], %11 {strides = array<i32>} : memref<12x96xf32, #tpu.memory_space<vmem>>, vector<4x47xf32>,
    %c4_11 = arith.constant 4 : index
    %c48 = arith.constant 48 : index
    %13 = vector.load %arg11[%c4_11, %c48] : memref<12x96xf32, #tpu.memory_space<vmem>>, vector<4x48xf32>
    tpu.vector_store %arg11[%c4_11, %c48], %10 {strides = array<i32>} : memref<12x96xf32, #tpu.memory_space<vmem>>, vector<4x48xf32>,
    %14 = vector.extract_strided_slice %10 {offsets = [0, 1], sizes = [4, 47], strides = [1, 1]} : vector<4x48xf32> to vector<4x47xf32>
    %c8_12 = arith.constant 8 : index
    %c48_13 = arith.constant 48 : index
    %15 = vector.load %arg11[%c8_12, %c48_13] : memref<12x96xf32, #tpu.memory_space<vmem>>, vector<4x47xf32>
    tpu.vector_store %arg11[%c8_12, %c48_13], %14 {strides = array<i32>} : memref<12x96xf32, #tpu.memory_space<vmem>>, vector<4x47xf32>,
    %c0_14 = arith.constant 0 : index
    %c0_15 = arith.constant 0 : index
    %16 = vector.load %arg2[%c0_14, %c0_15] : memref<64x12xbf16, #tpu.memory_space<vmem>>, vector<64x12xbf16>
    %c0_16 = arith.constant 0 : index
    %c0_17 = arith.constant 0 : index
    %17 = vector.load %arg11[%c0_16, %c0_17] : memref<12x96xf32, #tpu.memory_space<vmem>>, vector<12x96xf32>
    %18 = arith.truncf %17 : vector<12x96xf32> to vector<12x96xbf16>
    %cst_18 = arith.constant dense<0.000000e+00> : vector<64x96xf32>
    %19 = tpu.matmul %16, %18, %cst_18 {dimension_numbers = #tpu.dot_dimension_numbers<[1], [0], [0], [1], [0, 0, 1, 1], [], []>} : vector<64x12xbf16>, vector<12x96xbf16>, vector<64x96xf32> -> vector<64x96xf32>
    %c0_19 = arith.constant 0 : index
    %c0_20 = arith.constant 0 : index
    %20 = vector.load %arg3[%c0_19, %c0_20] : memref<64x1xf32, #tpu.memory_space<vmem>>, vector<64x1xf32>
    %21 = vector.broadcast %20 : vector<64x1xf32> to vector<64x96xf32>
    %22 = arith.addf %19, %21 : vector<64x96xf32>
    %cst_21 = arith.constant 0.000000e+00 : f32
    %23 = vector.broadcast %cst_21 : f32 to vector<64x96xf32>
    %24 = arith.maximumf %22, %23 : vector<64x96xf32>
    %25 = tpu.iota {dimensions = array<i32: 0>} : vector<96x48xi32>
    %26 = tpu.iota {dimensions = array<i32: 1>} : vector<96x48xi32>
    %c2_i32 = arith.constant 2 : i32
    %27 = vector.broadcast %c2_i32 : i32 to vector<96x48xi32>
    %28 = arith.muli %27, %26 : vector<96x48xi32>
    %29 = arith.cmpi eq, %25, %28 : vector<96x48xi32>
    %30 = arith.extui %29 : vector<96x48xi1> to vector<96x48xi32>
    %31 = arith.sitofp %30 : vector<96x48xi32> to vector<96x48xf32>
    %c2_i32_22 = arith.constant 2 : i32
    %32 = vector.broadcast %c2_i32_22 : i32 to vector<96x48xi32>
    %33 = arith.muli %32, %26 : vector<96x48xi32>
    %c1_i32 = arith.constant 1 : i32
    %34 = vector.broadcast %c1_i32 : i32 to vector<96x48xi32>
    %35 = arith.addi %33, %34 : vector<96x48xi32>
    %36 = arith.cmpi eq, %25, %35 : vector<96x48xi32>
    %37 = arith.extui %36 : vector<96x48xi1> to vector<96x48xi32>
    %38 = arith.sitofp %37 : vector<96x48xi32> to vector<96x48xf32>
    %cst_23 = arith.constant dense<0.000000e+00> : vector<64x48xf32>
    %39 = tpu.matmul %24, %31, %cst_23 {dimension_numbers = #tpu.dot_dimension_numbers<[1], [0], [0], [1], [0, 0, 1, 1], [], []>} : vector<64x96xf32>, vector<96x48xf32>, vector<64x48xf32> -> vector<64x48xf32>
    %cst_24 = arith.constant dense<0.000000e+00> : vector<64x48xf32>
    %40 = tpu.matmul %24, %38, %cst_24 {dimension_numbers = #tpu.dot_dimension_numbers<[1], [0], [0], [1], [0, 0, 1, 1], [], []>} : vector<64x96xf32>, vector<96x48xf32>, vector<64x48xf32> -> vector<64x48xf32>
    %41 = arith.maximumf %39, %40 : vector<64x48xf32>
    %cst_25 = arith.constant 0.000000e+00 : f32
    %42 = vector.broadcast %cst_25 : f32 to vector<192x48xf32>
    %c0_26 = arith.constant 0 : index
    %c0_27 = arith.constant 0 : index
    %43 = vector.load %arg12[%c0_26, %c0_27] : memref<192x48xf32, #tpu.memory_space<vmem>>, vector<192x48xf32>
    tpu.vector_store %arg12[%c0_26, %c0_27], %42 {strides = array<i32>} : memref<192x48xf32, #tpu.memory_space<vmem>>, vector<192x48xf32>,
    %44 = vector.extract_strided_slice %41 {offsets = [0, 0], sizes = [64, 23], strides = [1, 1]} : vector<64x48xf32> to vector<64x23xf32>
    %c0_28 = arith.constant 0 : index
    %c1_29 = arith.constant 1 : index
    %45 = vector.load %arg12[%c0_28, %c1_29] : memref<192x48xf32, #tpu.memory_space<vmem>>, vector<64x23xf32>
    tpu.vector_store %arg12[%c0_28, %c1_29], %44 {strides = array<i32>} : memref<192x48xf32, #tpu.memory_space<vmem>>, vector<64x23xf32>,
    %46 = vector.extract_strided_slice %41 {offsets = [0, 0], sizes = [64, 24], strides = [1, 1]} : vector<64x48xf32> to vector<64x24xf32>
    %c64 = arith.constant 64 : index
    %c0_30 = arith.constant 0 : index
    %47 = vector.load %arg12[%c64, %c0_30] : memref<192x48xf32, #tpu.memory_space<vmem>>, vector<64x24xf32>
    tpu.vector_store %arg12[%c64, %c0_30], %46 {strides = array<i32>} : memref<192x48xf32, #tpu.memory_space<vmem>>, vector<64x24xf32>,
    %48 = vector.extract_strided_slice %41 {offsets = [0, 1], sizes = [64, 23], strides = [1, 1]} : vector<64x48xf32> to vector<64x23xf32>
    %c128 = arith.constant 128 : index
    %c0_31 = arith.constant 0 : index
    %49 = vector.load %arg12[%c128, %c0_31] : memref<192x48xf32, #tpu.memory_space<vmem>>, vector<64x23xf32>
    tpu.vector_store %arg12[%c128, %c0_31], %48 {strides = array<i32>} : memref<192x48xf32, #tpu.memory_space<vmem>>, vector<64x23xf32>,
    %50 = vector.extract_strided_slice %41 {offsets = [0, 24], sizes = [64, 23], strides = [1, 1]} : vector<64x48xf32> to vector<64x23xf32>
    %c0_32 = arith.constant 0 : index
    %c25 = arith.constant 25 : index
    %51 = vector.load %arg12[%c0_32, %c25] : memref<192x48xf32, #tpu.memory_space<vmem>>, vector<64x23xf32>
    tpu.vector_store %arg12[%c0_32, %c25], %50 {strides = array<i32>} : memref<192x48xf32, #tpu.memory_space<vmem>>, vector<64x23xf32>,
    %52 = vector.extract_strided_slice %41 {offsets = [0, 24], sizes = [64, 24], strides = [1, 1]} : vector<64x48xf32> to vector<64x24xf32>
    %c64_33 = arith.constant 64 : index
    %c24 = arith.constant 24 : index
    %53 = vector.load %arg12[%c64_33, %c24] : memref<192x48xf32, #tpu.memory_space<vmem>>, vector<64x24xf32>
    tpu.vector_store %arg12[%c64_33, %c24], %52 {strides = array<i32>} : memref<192x48xf32, #tpu.memory_space<vmem>>, vector<64x24xf32>,
    %54 = vector.extract_strided_slice %41 {offsets = [0, 25], sizes = [64, 23], strides = [1, 1]} : vector<64x48xf32> to vector<64x23xf32>
    %c128_34 = arith.constant 128 : index
    %c24_35 = arith.constant 24 : index
    %55 = vector.load %arg12[%c128_34, %c24_35] : memref<192x48xf32, #tpu.memory_space<vmem>>, vector<64x23xf32>
    tpu.vector_store %arg12[%c128_34, %c24_35], %54 {strides = array<i32>} : memref<192x48xf32, #tpu.memory_space<vmem>>, vector<64x23xf32>,
    %c0_36 = arith.constant 0 : index
    %c0_37 = arith.constant 0 : index
    %56 = vector.load %arg4[%c0_36, %c0_37] : memref<32x192xbf16, #tpu.memory_space<vmem>>, vector<32x192xbf16>
    %c0_38 = arith.constant 0 : index
    %c0_39 = arith.constant 0 : index
    %57 = vector.load %arg12[%c0_38, %c0_39] : memref<192x48xf32, #tpu.memory_space<vmem>>, vector<192x48xf32>
    %58 = arith.truncf %57 : vector<192x48xf32> to vector<192x48xbf16>
    %cst_40 = arith.constant dense<0.000000e+00> : vector<32x48xf32>
    %59 = tpu.matmul %56, %58, %cst_40 {dimension_numbers = #tpu.dot_dimension_numbers<[1], [0], [0], [1], [0, 0, 1, 1], [], []>} : vector<32x192xbf16>, vector<192x48xbf16>, vector<32x48xf32> -> vector<32x48xf32>
    %c0_41 = arith.constant 0 : index
    %c0_42 = arith.constant 0 : index
    %60 = vector.load %arg5[%c0_41, %c0_42] : memref<32x1xf32, #tpu.memory_space<vmem>>, vector<32x1xf32>
    %61 = vector.broadcast %60 : vector<32x1xf32> to vector<32x48xf32>
    %62 = arith.addf %59, %61 : vector<32x48xf32>
    %cst_43 = arith.constant 0.000000e+00 : f32
    %63 = vector.broadcast %cst_43 : f32 to vector<32x48xf32>
    %64 = arith.maximumf %62, %63 : vector<32x48xf32>
    %65 = tpu.iota {dimensions = array<i32: 0>} : vector<48x24xi32>
    %66 = tpu.iota {dimensions = array<i32: 1>} : vector<48x24xi32>
    %c2_i32_44 = arith.constant 2 : i32
    %67 = vector.broadcast %c2_i32_44 : i32 to vector<48x24xi32>
    %68 = arith.muli %67, %66 : vector<48x24xi32>
    %69 = arith.cmpi eq, %65, %68 : vector<48x24xi32>
    %70 = arith.extui %69 : vector<48x24xi1> to vector<48x24xi32>
    %71 = arith.sitofp %70 : vector<48x24xi32> to vector<48x24xf32>
    %c2_i32_45 = arith.constant 2 : i32
    %72 = vector.broadcast %c2_i32_45 : i32 to vector<48x24xi32>
    %73 = arith.muli %72, %66 : vector<48x24xi32>
    %c1_i32_46 = arith.constant 1 : i32
    %74 = vector.broadcast %c1_i32_46 : i32 to vector<48x24xi32>
    %75 = arith.addi %73, %74 : vector<48x24xi32>
    %76 = arith.cmpi eq, %65, %75 : vector<48x24xi32>
    %77 = arith.extui %76 : vector<48x24xi1> to vector<48x24xi32>
    %78 = arith.sitofp %77 : vector<48x24xi32> to vector<48x24xf32>
    %cst_47 = arith.constant dense<0.000000e+00> : vector<32x24xf32>
    %79 = tpu.matmul %64, %71, %cst_47 {dimension_numbers = #tpu.dot_dimension_numbers<[1], [0], [0], [1], [0, 0, 1, 1], [], []>} : vector<32x48xf32>, vector<48x24xf32>, vector<32x24xf32> -> vector<32x24xf32>
    %cst_48 = arith.constant dense<0.000000e+00> : vector<32x24xf32>
    %80 = tpu.matmul %64, %78, %cst_48 {dimension_numbers = #tpu.dot_dimension_numbers<[1], [0], [0], [1], [0, 0, 1, 1], [], []>} : vector<32x48xf32>, vector<48x24xf32>, vector<32x24xf32> -> vector<32x24xf32>
    %81 = arith.maximumf %79, %80 : vector<32x24xf32>
    %82 = tpu.iota {dimensions = array<i32: 0>} : vector<384x32xi32>
    %83 = tpu.iota {dimensions = array<i32: 1>} : vector<384x32xi32>
    %c12_i32 = arith.constant 12 : i32
    %84 = vector.broadcast %c12_i32 : i32 to vector<384x32xi32>
    %85 = arith.muli %84, %83 : vector<384x32xi32>
    %86 = arith.cmpi sge, %82, %85 : vector<384x32xi32>
    %c12_i32_49 = arith.constant 12 : i32
    %87 = vector.broadcast %c12_i32_49 : i32 to vector<384x32xi32>
    %88 = arith.muli %87, %83 : vector<384x32xi32>
    %c12_i32_50 = arith.constant 12 : i32
    %89 = vector.broadcast %c12_i32_50 : i32 to vector<384x32xi32>
    %90 = arith.addi %88, %89 : vector<384x32xi32>
    %91 = arith.cmpi slt, %82, %90 : vector<384x32xi32>
    %92 = arith.andi %86, %91 : vector<384x32xi1>
    %93 = arith.extui %92 : vector<384x32xi1> to vector<384x32xi32>
    %94 = arith.sitofp %93 : vector<384x32xi32> to vector<384x32xf32>
    %cst_51 = arith.constant dense<0.000000e+00> : vector<384x24xf32>
    %95 = tpu.matmul %94, %81, %cst_51 {dimension_numbers = #tpu.dot_dimension_numbers<[1], [0], [0], [1], [0, 0, 1, 1], [], []>} : vector<384x32xf32>, vector<32x24xf32>, vector<384x24xf32> -> vector<384x24xf32>
    %96 = tpu.iota {dimensions = array<i32: 0>} : vector<384x24xi32>
    %97 = tpu.iota {dimensions = array<i32: 1>} : vector<384x24xi32>
    %c12_i32_52 = arith.constant 12 : i32
    %c0_i32 = arith.constant 0 : i32
    %98 = arith.cmpi eq, %c12_i32_52, %c0_i32 : i32
    %c1_i32_53 = arith.constant 1 : i32
    %99 = arith.select %98, %c1_i32_53, %c12_i32_52 : i32
    %100 = vector.broadcast %99 : i32 to vector<384x24xi32>
    %101 = arith.remsi %96, %100 : vector<384x24xi32>
    %c0_i32_54 = arith.constant 0 : i32
    %102 = vector.broadcast %c0_i32_54 : i32 to vector<384x24xi32>
    %103 = arith.cmpi ne, %101, %102 : vector<384x24xi32>
    %c0_i32_55 = arith.constant 0 : i32
    %104 = vector.broadcast %c0_i32_55 : i32 to vector<384x24xi32>
    %105 = arith.cmpi slt, %101, %104 : vector<384x24xi32>
    %c0_i32_56 = arith.constant 0 : i32
    %106 = arith.cmpi slt, %99, %c0_i32_56 : i32
    %107 = vector.broadcast %106 : i1 to vector<384x24xi1>
    %108 = vector.broadcast %107 : vector<384x24xi1> to vector<384x24xi1>
    %109 = arith.xori %105, %108 : vector<384x24xi1>
    %110 = arith.andi %109, %103 : vector<384x24xi1>
    %111 = vector.broadcast %99 : i32 to vector<384x24xi32>
    %112 = arith.addi %101, %111 : vector<384x24xi32>
    %113 = arith.select %110, %112, %101 : vector<384x24xi1>, vector<384x24xi32>
    %c12_i32_57 = arith.constant 12 : i32
    %c0_i32_58 = arith.constant 0 : i32
    %114 = arith.cmpi eq, %c12_i32_57, %c0_i32_58 : i32
    %c1_i32_59 = arith.constant 1 : i32
    %115 = arith.select %114, %c1_i32_59, %c12_i32_57 : i32
    %116 = vector.broadcast %115 : i32 to vector<384x24xi32>
    %117 = arith.remsi %97, %116 : vector<384x24xi32>
    %c0_i32_60 = arith.constant 0 : i32
    %118 = vector.broadcast %c0_i32_60 : i32 to vector<384x24xi32>
    %119 = arith.cmpi ne, %117, %118 : vector<384x24xi32>
    %c0_i32_61 = arith.constant 0 : i32
    %120 = vector.broadcast %c0_i32_61 : i32 to vector<384x24xi32>
    %121 = arith.cmpi slt, %117, %120 : vector<384x24xi32>
    %c0_i32_62 = arith.constant 0 : i32
    %122 = arith.cmpi slt, %115, %c0_i32_62 : i32
    %123 = vector.broadcast %122 : i1 to vector<384x24xi1>
    %124 = vector.broadcast %123 : vector<384x24xi1> to vector<384x24xi1>
    %125 = arith.xori %121, %124 : vector<384x24xi1>
    %126 = arith.andi %125, %119 : vector<384x24xi1>
    %127 = vector.broadcast %115 : i32 to vector<384x24xi32>
    %128 = arith.addi %117, %127 : vector<384x24xi32>
    %129 = arith.select %126, %128, %117 : vector<384x24xi1>, vector<384x24xi32>
    %130 = arith.cmpi eq, %113, %129 : vector<384x24xi32>
    %131 = arith.extui %130 : vector<384x24xi1> to vector<384x24xi32>
    %132 = arith.sitofp %131 : vector<384x24xi32> to vector<384x24xf32>
    %133 = tpu.iota {dimensions = array<i32: 0>} : vector<24x2xi32>
    %134 = tpu.iota {dimensions = array<i32: 1>} : vector<24x2xi32>
    %c12_i32_63 = arith.constant 12 : i32
    %135 = vector.broadcast %c12_i32_63 : i32 to vector<24x2xi32>
    %136 = arith.muli %135, %134 : vector<24x2xi32>
    %137 = arith.cmpi sge, %133, %136 : vector<24x2xi32>
    %c12_i32_64 = arith.constant 12 : i32
    %138 = vector.broadcast %c12_i32_64 : i32 to vector<24x2xi32>
    %139 = arith.muli %138, %134 : vector<24x2xi32>
    %c12_i32_65 = arith.constant 12 : i32
    %140 = vector.broadcast %c12_i32_65 : i32 to vector<24x2xi32>
    %141 = arith.addi %139, %140 : vector<24x2xi32>
    %142 = arith.cmpi slt, %133, %141 : vector<24x2xi32>
    %143 = arith.andi %137, %142 : vector<24x2xi1>
    %144 = arith.extui %143 : vector<24x2xi1> to vector<24x2xi32>
    %145 = arith.sitofp %144 : vector<24x2xi32> to vector<24x2xf32>
    %146 = arith.mulf %95, %132 : vector<384x24xf32>
    %cst_66 = arith.constant dense<0.000000e+00> : vector<384x2xf32>
    %147 = tpu.matmul %146, %145, %cst_66 {dimension_numbers = #tpu.dot_dimension_numbers<[1], [0], [0], [1], [0, 0, 1, 1], [], []>} : vector<384x24xf32>, vector<24x2xf32>, vector<384x2xf32> -> vector<384x2xf32>
    %c0_67 = arith.constant 0 : index
    %c0_68 = arith.constant 0 : index
    %148 = vector.load %arg6[%c0_67, %c0_68] : memref<128x384xbf16, #tpu.memory_space<vmem>>, vector<128x384xbf16>
    %149 = arith.truncf %147 : vector<384x2xf32> to vector<384x2xbf16>
    %cst_69 = arith.constant dense<0.000000e+00> : vector<128x2xf32>
    %150 = tpu.matmul %148, %149, %cst_69 {dimension_numbers = #tpu.dot_dimension_numbers<[1], [0], [0], [1], [0, 0, 1, 1], [], []>} : vector<128x384xbf16>, vector<384x2xbf16>, vector<128x2xf32> -> vector<128x2xf32>
    %c0_70 = arith.constant 0 : index
    %c0_71 = arith.constant 0 : index
    %151 = vector.load %arg7[%c0_70, %c0_71] : memref<128x1xf32, #tpu.memory_space<vmem>>, vector<128x1xf32>
    %152 = vector.broadcast %151 : vector<128x1xf32> to vector<128x2xf32>
    %153 = arith.addf %150, %152 : vector<128x2xf32>
    %cst_72 = arith.constant 0.000000e+00 : f32
    %154 = vector.broadcast %cst_72 : f32 to vector<128x2xf32>
    %155 = arith.maximumf %153, %154 : vector<128x2xf32>
    %c0_73 = arith.constant 0 : index
    %c0_74 = arith.constant 0 : index
    %156 = vector.load %arg8[%c0_73, %c0_74] : memref<8x128xbf16, #tpu.memory_space<vmem>>, vector<8x128xbf16>
    %157 = arith.truncf %155 : vector<128x2xf32> to vector<128x2xbf16>
    %cst_75 = arith.constant dense<0.000000e+00> : vector<8x2xf32>
    %158 = tpu.matmul %156, %157, %cst_75 {dimension_numbers = #tpu.dot_dimension_numbers<[1], [0], [0], [1], [0, 0, 1, 1], [], []>} : vector<8x128xbf16>, vector<128x2xbf16>, vector<8x2xf32> -> vector<8x2xf32>
    %c0_76 = arith.constant 0 : index
    %c0_77 = arith.constant 0 : index
    %159 = vector.load %arg9[%c0_76, %c0_77] : memref<8x1xf32, #tpu.memory_space<vmem>>, vector<8x1xf32>
    %160 = vector.broadcast %159 : vector<8x1xf32> to vector<8x2xf32>
    %161 = arith.addf %158, %160 : vector<8x2xf32>
    %c0_78 = arith.constant 0 : index
    %c0_79 = arith.constant 0 : index
    %c0_80 = arith.constant 0 : index
    %162 = vector.load %arg10[%c0_78, %c0_79, %c0_80] : memref<1x8x2xf32, #tpu.memory_space<vmem>>, vector<1x8x2xf32>
    %163 = vector.shape_cast %162 : vector<1x8x2xf32> to vector<8x2xf32>
    %164 = vector.shape_cast %161 : vector<8x2xf32> to vector<1x8x2xf32>
    tpu.vector_store %arg10[%c0_78, %c0_79, %c0_80], %164 {strides = array<i32>} : memref<1x8x2xf32, #tpu.memory_space<vmem>>, vector<1x8x2xf32>,
    return
  }
  func.func @transform_0(%arg0: i32) -> (i32, i32, i32) {
    %c0_i32 = arith.constant 0 : i32
    %c0_i32_0 = arith.constant 0 : i32
    %c0_i32_1 = arith.constant 0 : i32
    return %arg0, %c0_i32, %c0_i32_0 : i32, i32, i32
  }
  func.func @transform_1(%arg0: i32) -> (i32, i32) {
    %c0_i32 = arith.constant 0 : i32
    %c0_i32_0 = arith.constant 0 : i32
    %c0_i32_1 = arith.constant 0 : i32
    return %c0_i32, %c0_i32_0 : i32, i32
  }
  func.func @transform_2(%arg0: i32) -> (i32, i32) {
    %c0_i32 = arith.constant 0 : i32
    %c0_i32_0 = arith.constant 0 : i32
    %c0_i32_1 = arith.constant 0 : i32
    return %c0_i32, %c0_i32_0 : i32, i32
  }
  func.func @transform_3(%arg0: i32) -> (i32, i32) {
    %c0_i32 = arith.constant 0 : i32
    %c0_i32_0 = arith.constant 0 : i32
    %c0_i32_1 = arith.constant 0 : i32
    return %c0_i32, %c0_i32_0 : i32, i32
  }
  func.func @transform_4(%arg0: i32) -> (i32, i32) {
    %c0_i32 = arith.constant 0 : i32
    %c0_i32_0 = arith.constant 0 : i32
    %c0_i32_1 = arith.constant 0 : i32
    return %c0_i32, %c0_i32_0 : i32, i32
  }
  func.func @transform_5(%arg0: i32) -> (i32, i32) {
    %c0_i32 = arith.constant 0 : i32
    %c0_i32_0 = arith.constant 0 : i32
    %c0_i32_1 = arith.constant 0 : i32
    return %c0_i32, %c0_i32_0 : i32, i32
  }
  func.func @transform_6(%arg0: i32) -> (i32, i32) {
    %c0_i32 = arith.constant 0 : i32
    %c0_i32_0 = arith.constant 0 : i32
    %c0_i32_1 = arith.constant 0 : i32
    return %c0_i32, %c0_i32_0 : i32, i32
  }
  func.func @transform_7(%arg0: i32) -> (i32, i32) {
    %c0_i32 = arith.constant 0 : i32
    %c0_i32_0 = arith.constant 0 : i32
    %c0_i32_1 = arith.constant 0 : i32
    return %c0_i32, %c0_i32_0 : i32, i32
  }
  func.func @transform_8(%arg0: i32) -> (i32, i32) {
    %c0_i32 = arith.constant 0 : i32
    %c0_i32_0 = arith.constant 0 : i32
    %c0_i32_1 = arith.constant 0 : i32
    return %c0_i32, %c0_i32_0 : i32, i32
  }
  func.func @transform_9(%arg0: i32) -> (i32, i32, i32) {
    %c0_i32 = arith.constant 0 : i32
    %c0_i32_0 = arith.constant 0 : i32
    %c0_i32_1 = arith.constant 0 : i32
    return %arg0, %c0_i32, %c0_i32_0 : i32, i32, i32
  }
}

</mosaic_0001>

<bundles_post_ra>
// kernel: cnn_forward.1
= control target key start
LH: loop header
LB: loop body
LE: loop exit
PB: predicated region body
PF: predicated region fallthrough
CT: control target
= control target key end

     0   :  { %vm33_vm0 = vcmask 785408   ;;  %v7340_v2 = vmov 0.0   ;;  %s4877_s13 = smov 49   ;;  %s4878_s14 = smov 1   ;;  %vm44_vm1 = vcmask 388096   ;;  %vm35_vm2 = vcmask 781312   ;;  %s7330_s0 = inlined_call_operand.vmem [shape: f32[2,4,48], index: 0, kind: input, shape index: {}]   ;;  %s7331_s1 = inlined_call_operand.vmem [shape: bf16[64,12], index: 1, kind: input, shape index: {}]   ;;  %s7332_s2 = inlined_call_operand.vmem [shape: f32[64,1], index: 2, kind: input, shape index: {}]   ;;  %s7333_s4 = inlined_call_operand.vmem [shape: f32[32,1], index: 4, kind: input, shape index: {}]   ;;  %s7334_s6 = inlined_call_operand.vmem [shape: f32[128,1], index: 6, kind: input, shape index: {}]   ;;  %s7335_s3 = inlined_call_operand.vmem [shape: bf16[32,192], index: 3, kind: input, shape index: {}]   ;;  %s7336_s8 = inlined_call_operand.vmem [shape: f32[8,1], index: 8, kind: input, shape index: {}]   ;;  %s7337_s5 = inlined_call_operand.vmem [shape: bf16[128,384], index: 5, kind: input, shape index: {}]   ;;  %s7338_s7 = inlined_call_operand.vmem [shape: bf16[8,128], index: 7, kind: input, shape index: {}]   ;;  %s7339_s9 = inlined_call_operand.vmem [shape: f32[1,8,2], index: 9, kind: output, shape index: {}]  }
   0x1   :  { %v3736_v0 = vld [vmem:[%s7330_s0 + $0x4] sm:$0xf]  ;;  %v37_v1 = vld [vmem:[%s7330_s0] sm:$0xf]  ;;  %34 = vst.msk [vmem:[#allocation2] sm:$0xff] %vm33_vm0, %v7340_v2  ;;  %s4879_s15 = smov 48   ;;  %v238_v6 = vlaneseq }
   0x2   :  { %54 = vrot.lane.b32.xlu1 %v3736_v0, %s4877_s13  ;;  %39 = vrot.lane.b32.xlu0 %v37_v1, %s4878_s14  ;;  %45 = vst.msk [vmem:[#allocation2 + $0x4] sm:$0xf] %vm44_vm1, %v37_v1  ;;  %s4880_s16 = smov 127   ;;  %v4834_v3 = vld [vmem:[%s7331_s1] sm:$0xff]   ;;  %vm148_vm3 = vcmask 97280   ;;  %s4881_s18 = smov 47  }
   0x3   :  { %36 = vst.msk [vmem:[#allocation2 + $0x8] sm:$0xf] %vm35_vm2, %v7340_v2  ;;  %4313 = vmatprep.mubr.msk.bf16.mxu0 %vm148_vm3, %v4834_v3  ;;  %v4882_v4 = vmov 0   ;;  %v80_v5 = vld [vmem:[%s7332_s2] sm:$0xff]  ;;  %v81_v7 = vld [vmem:[%s7332_s2 + $0x8] sm:$0xff]  ;;  %v82_v8 = vld [vmem:[%s7332_s2 + $0x10] sm:$0xff] }
   0x4   :  { %4832 = vset.pattern.permute.xlu1 %v4882_v4  ;;  %4833 = vset.pattern.permute.xlu0 %v4882_v4  ;;  %v4962_v9 = vshrl.u32 %v238_v6, 7  ;;  %v4964_v10 = vand.u32 127, %v238_v6  ;;  %v84_v11 = vld [vmem:[%s7332_s2 + $0x20] sm:$0xff]  ;;  %v83_v16 = vld [vmem:[%s7332_s2 + $0x18] sm:$0xff]  ;;  %v86_v17 = vld [vmem:[%s7332_s2 + $0x30] sm:$0xff]  ;;  %vm42_vm1 = vcmask 388104  }
   0x5   :  { %v4883_v19 = vmov 1.0|1.0   ;;  %v85_v23 = vld [vmem:[%s7332_s2 + $0x28] sm:$0xff]  ;;  %v87_v27 = vld [vmem:[%s7332_s2 + $0x38] sm:$0xff]  ;;  %vm57_vm2 = vcmask 781704   ;;  %v4836_v40 = vld [vmem:[%s7331_s1 + $0x10] sm:$0xff]  }
   0x6   :  { %59 = vrot.lane.b32.xlu1 %v3736_v0, %s4879_s15  ;;  %46 = vrot.lane.b32.xlu0 %v37_v1, %s4880_s16  ;;  %v4970_v12 = vadd.s32 8, %v4962_v9  ;;  %v4973_v13 = vmul.u32 2, %v4964_v10  ;;  %v4976_v14 = vadd.s32 16, %v4962_v9  ;;  %v4979_v15 = vadd.s32 24, %v4962_v9  ;;  %v4835_v39 = vld [vmem:[%s7331_s1 + $0x8] sm:$0xff]   ;;  %v4837_v43 = vld [vmem:[%s7331_s1 + $0x18] sm:$0xff]  }
   0x7   :  { %v5010_v21 = vadd.s32 32, %v4962_v9  ;;  %v5013_v22 = vadd.s32 40, %v4962_v9  ;;  %v5030_v25 = vadd.s32 48, %v4962_v9  ;;  %v5033_v26 = vadd.s32 56, %v4962_v9 }
   0x8   :  { %vm254_vm4 = vcmp.eq.s32.totalorder %v4962_v9, %v4973_v13  ;;  %vm255_vm5 = vcmp.eq.s32.totalorder %v4970_v12, %v4973_v13  ;;  %vm256_vm6 = vcmp.eq.s32.totalorder %v4976_v14, %v4973_v13  ;;  %vm257_vm8 = vcmp.eq.s32.totalorder %v4979_v15, %v4973_v13 }
   0x9   :  { %vm4993_vm7 = vmpackc.low %vm255_vm5, %vm254_vm4  ;;  %vm258_vm10 = vcmp.eq.s32.totalorder %v5010_v21, %v4973_v13  ;;  %vm259_vm11 = vcmp.eq.s32.totalorder %v5013_v22, %v4973_v13  ;;  %vm260_vm13 = vcmp.eq.s32.totalorder %v5030_v25, %v4973_v13  ;;  %vm261_vm14 = vcmp.eq.s32.totalorder %v5033_v26, %v4973_v13 }
   0xa   :  { %64 = vrot.lane.b32.xlu0 %v3736_v0, %s4881_s18  ;;  %90 = vperm.xlu1 %4832, %v80_v5   ;;  %vm5002_vm9 = vmpackc.low %vm257_vm8, %vm256_vm6  ;;  %vm62_vm4 = vcmask 781696   ;;  %vm49_vm5 = vcmask 379904   ;;  %vm67_vm6 = vcmask 773504   ;;  %v290_v33 = vadd.s32 1, %v4973_v13 }
   0xb   :  { %4640 = vmatprep.subr.msk.bf16.mxu1 %vm4993_vm7, %v4883_v19  ;;  %vm5025_vm12 = vmpackc.low %vm259_vm11, %vm258_vm10  ;;  %vm161_vm11 = vcmask 1045504   ;;  %v5107_v44 = vadd.s32 64, %v4962_v9  ;;  %v5110_v45 = vadd.s32 72, %v4962_v9  ;;  %v5120_v46 = vadd.s32 80, %v4962_v9 }
   0xc   :  { %4642 = vmatpush3.bf16.msk.msra.mxu1 %vm4993_vm7, %v4883_v19  ;;  %vm4651_vm15 = vmpackc.low %vm261_vm14, %vm260_vm13  ;;  %vm291_vm8 = vcmp.eq.s32.totalorder %v4962_v9, %v290_v33  ;;  %vm292_vm10 = vcmp.eq.s32.totalorder %v4970_v12, %v290_v33  ;;  %vm293_vm14 = vcmp.eq.s32.totalorder %v4976_v14, %v290_v33  ;;  %v5123_v47 = vadd.s32 88, %v4962_v9 }
   0xd   :  { %4644 = vmatprep.subr.msk.bf16.mxu1 %vm5002_vm9, %v4883_v19  ;;  %vm5056_vm13 = vmpackc.low %vm292_vm10, %vm291_vm8  ;;  %vm298_vm8 = vcmp.eq.s32.totalorder %v5033_v26, %v290_v33  ;;  %v5400_v37 = vmul.u32 12, %v4964_v10 }
   0xe   :  { %95 = vperm.xlu0 %4833, %v81_v7   ;;  %100 = vperm.xlu1 %4832, %v82_v8  }
   0xf   :  { %v5403_v41 = vadd.s32 12, %v5400_v37 }
  0x10   :  { %4646 = vmatpush3.bf16.msk.msra.mxu1 %vm5002_vm9, %v4883_v19 }
  0x11   :  { %4648 = vmatprep.subr.msk.bf16.mxu1 %vm5025_vm12, %v4883_v19 }
  0x12   :  { %110 = vperm.xlu0 %4833, %v84_v11   ;;  %105 = vperm.xlu1 %4832, %v83_v16  }
  0x14   :  { %4650 = vmatpush3.bf16.msk.msra.mxu1 %vm5025_vm12, %v4883_v19 }
  0x15   :  { %4652 = vmatprep.subr.msk.bf16.mxu1 %vm4651_vm15, %v4883_v19 }
  0x16   :  { %120 = vperm.xlu0 %4833, %v86_v17   ;;  %115 = vperm.xlu1 %4832, %v85_v23  }
  0x18   :  { %4654 = vmatpush3.bf16.msk.msra.mxu1 %vm4651_vm15, %v4883_v19  ;;  %vm294_vm15 = vcmp.eq.s32.totalorder %v4979_v15, %v290_v33 }
  0x1a   :  { %125 = vperm.xlu1 %4832, %v87_v27  }
  0x74   :  { %v55_v28 = vpop.permute.xlu1 %54  ;;  %v40_v29 = vpop.permute.xlu0 %39 }
  0x75   :  { %43 = vst.msk [vmem:[#allocation2] sm:$0xf] %vm42_vm1, %v40_v29  ;;  %vm5071_vm1 = vmpackc.low %vm294_vm15, %vm293_vm14  ;;  %vm299_vm14 = vcmp.eq.s32.totalorder %v5107_v44, %v290_v33  ;;  %vm300_vm15 = vcmp.eq.s32.totalorder %v5110_v45, %v290_v33 }
  0x76   :  { %58 = vst.msk [vmem:[#allocation2] sm:$0xf] %vm57_vm2, %v55_v28  ;;  %vm295_vm2 = vcmp.eq.s32.totalorder %v5010_v21, %v290_v33 }
  0x78   :  { %v60_v30 = vpop.permute.xlu1 %59  ;;  %v47_v31 = vpop.permute.xlu0 %46 }
  0x79   :  { %63 = vst.msk [vmem:[#allocation2 + $0x4] sm:$0xf] %vm62_vm4, %v60_v30  ;;  %vm296_vm4 = vcmp.eq.s32.totalorder %v5013_v22, %v290_v33 }
  0x7a   :  { %50 = vst.msk [vmem:[#allocation2 + $0x8] sm:$0xf] %vm49_vm5, %v47_v31  ;;  %vm5085_vm5 = vmpackc.low %vm296_vm4, %vm295_vm2 }
  0x7b   :  { %vm4679_vm4 = vmpackc.low %vm300_vm15, %vm299_vm14  ;;  %vm626_vm15 = vcmask 195592  }
  0x7c   :  { %v65_v32 = vpop.permute.xlu0 %64 }
  0x7d   :  { %68 = vst.msk [vmem:[#allocation2 + $0x8] sm:$0xf] %vm67_vm6, %v65_v32  ;;  %vm297_vm6 = vcmp.eq.s32.totalorder %v5030_v25, %v290_v33 }
  0x7e   :  { %vm4675_vm10 = vmpackc.low %vm298_vm8, %vm297_vm6  ;;  %vm264_vm6 = vcmp.eq.s32.totalorder %v5120_v46, %v4973_v13  ;;  %vm265_vm8 = vcmp.eq.s32.totalorder %v5123_v47, %v4973_v13 }
  0x80   :  { %v77_v34 = vld [vmem:[#allocation2] sm:$0xff] }
  0x84   :  { %v78_v35 = vld [vmem:[#allocation2 + $0x8] sm:$0xf] }
  0x85   :  { %v79_v36 = vpack.c.bf16 %v78_v35, %v77_v34 }
  0x87   :  { %4723 = vmatprep.subr.msk.bf16.mxu0 %vm161_vm11, %v79_v36  ;;  %v163_v38 = vsel %vm161_vm11, %v79_v36, 0  ;;  %vm262_vm11 = vcmp.eq.s32.totalorder %v5107_v44, %v4973_v13 }
  0x88   :  { %4312 = vmatpush3.bf16.msra.mxu0 %v163_v38 }
  0x89   :  { %4664 = vmatprep.subr.msk.bf16.mxu0 %vm5056_vm13, %v4883_v19  ;;  %v91_v48 = vpop.permute.xlu1 %90 }
  0x8b   :  { %4314 = vmatmul.mubr.msk.bf16.vlgmr.msra.gmra.mrb[0].mxu0 %vm148_vm3, %v4835_v39 }
  0x8c   :  { %4317 = vmatprep.mubr.msk.bf16.mxu0 %vm148_vm3, %v4836_v40  ;;  %4666 = vmatpush3.bf16.msk.msra.mxu0 %vm5056_vm13, %v4883_v19 }
  0x8d   :  { %4668 = vmatprep.subr.msk.bf16.mxu0 %vm5071_vm1, %v4883_v19  ;;  %v101_v49 = vpop.permute.xlu1 %100  ;;  %v96_v50 = vpop.permute.xlu0 %95 }
  0x90   :  { %4670 = vmatpush3.bf16.msk.msra.mxu0 %vm5071_vm1, %v4883_v19 }
  0x91   :  { %4672 = vmatprep.subr.msk.bf16.mxu0 %vm5085_vm5, %v4883_v19  ;;  %v106_v52 = vpop.permute.xlu1 %105  ;;  %v111_v58 = vpop.permute.xlu0 %110 }
  0x93   :  { %4318 = vmatmul.mubr.msk.bf16.gmra.mrb[4].mxu0 %vm148_vm3, %v4837_v43  ;;  %vm263_vm3 = vcmp.eq.s32.totalorder %v5110_v45, %v4973_v13 }
  0x94   :  { %4674 = vmatpush3.bf16.msk.msra.mxu0 %vm5085_vm5, %v4883_v19  ;;  %vm4655_vm2 = vmpackc.low %vm263_vm3, %vm262_vm11  ;;  %vm302_vm11 = vcmp.eq.s32.totalorder %v5123_v47, %v290_v33 }
  0x95   :  { %4676 = vmatprep.subr.msk.bf16.mxu0 %vm4675_vm10, %v4883_v19  ;;  %4656 = vmatprep.subr.msk.bf16.mxu1 %vm4655_vm2, %v4883_v19  ;;  %vm4659_vm3 = vmpackc.low %vm265_vm8, %vm264_vm6  ;;  %v116_v63 = vpop.permute.xlu1 %115  ;;  %v121_v6 = vpop.permute.xlu0 %120  ;;  %vm695_vm6 = vcmask 384192   ;;  %vm1310_vm8 = vcmask 261120  }
  0x96   :  { %4658 = vmatpush3.bf16.msk.msra.mxu1 %vm4655_vm2, %v4883_v19  ;;  %vm677_vm2 = vcmask 392392  }
  0x97   :  { %4660 = vmatprep.subr.msk.bf16.mxu1 %vm4659_vm3, %v4883_v19 }
  0x98   :  { %4678 = vmatpush3.bf16.msk.msra.mxu0 %vm4675_vm10, %v4883_v19  ;;  %vm301_vm10 = vcmp.eq.s32.totalorder %v5120_v46, %v290_v33 }
  0x99   :  { %4680 = vmatprep.subr.msk.bf16.mxu0 %vm4679_vm4, %v4883_v19  ;;  %vm4683_vm14 = vmpackc.low %vm302_vm11, %vm301_vm10  ;;  %v126_v23 = vpop.permute.xlu1 %125  ;;  %vm1070_vm10 = vcmp.ge.s32.totalorder %v4970_v12, %v5400_v37  ;;  %vm1119_vm11 = vcmp.lt.s32.totalorder %v4970_v12, %v5403_v41 }
  0x9a   :  { %4662 = vmatpush3.bf16.msk.msra.mxu1 %vm4659_vm3, %v4883_v19  ;;  %vm5415_vm3 = vmand %vm1070_vm10, %vm1119_vm11  ;;  %vm1123_vm10 = vcmp.lt.s32.totalorder %v5013_v22, %v5403_v41  ;;  %vm1075_vm11 = vcmp.ge.s32.totalorder %v5030_v25, %v5400_v37 }
  0x9b   :  { %793 = vmatprep.subr.bf16.mxu1 %v4882_v4 }
  0x9c   :  { %4682 = vmatpush3.bf16.msk.msra.mxu0 %vm4679_vm4, %v4883_v19  ;;  %vm668_vm4 = vcmask 187392  }
  0x9d   :  { %4684 = vmatprep.subr.msk.bf16.mxu0 %vm4683_vm14, %v4883_v19 }
  0xa0   :  { %4686 = vmatpush3.bf16.msk.msra.mxu0 %vm4683_vm14, %v4883_v19 }
  0xa1   :  { %4688 = vmatprep.subr.msk.bf16.mxu0 %vm4993_vm7, %v4883_v19 }
 0x15e   :  { %v4315_v51 = vpop.f32.mrb[0].mxu0 }
 0x15f   :  { %v199_v53 = vpop.f32.mrb[1].mxu0  ;;  %v208_v56 = vadd.f32 %v4315_v51, %v101_v49 }
 0x160   :  { %v200_v54 = vadd.f32 %v199_v53, %v91_v48  ;;  %v4316_v55 = vpop.f32.mrb[2].mxu0 }
 0x161   :  { %v202_v57 = vpop.f32.mrb[3].mxu0  ;;  %v211_v61 = vadd.f32 %v4316_v55, %v106_v52  ;;  %v232_v0 = vmax.f32 %v208_v56, 0.0 }
 0x162   :  { %v230_v59 = vmax.f32 %v200_v54, 0.0  ;;  %v203_v60 = vadd.f32 %v202_v57, %v96_v50 }
 0x163   :  { %v233_v5 = vmax.f32 %v211_v61, 0.0  ;;  %v747_v61 = vld [vmem:[%s7333_s4 + $0x18] sm:$0xff] }
 0x164   :  { %v231_v62 = vmax.f32 %v203_v60, 0.0  ;;  %4345 = vmatprep.mubr.msk.f32.mxu1 %vm33_vm0, %v230_v59  ;;  %4381 = vmatprep.mubr.msk.f32.mxu0 %vm33_vm0, %v230_v59  ;;  %v745_v59 = vld [vmem:[%s7333_s4 + $0x8] sm:$0xff]  ;;  %v744_v60 = vld [vmem:[%s7333_s4] sm:$0xff] }
 0x166   :  { %v4319_v1 = vpop.f32.mrb[4].mxu0  ;;  %4346 = vmatmul.mubr.msk.f32.vlgmr.msra.gmra.mrb[0].mxu1 %vm33_vm0, %v231_v62  ;;  %4382 = vmatmul.mubr.msk.f32.vlgmr.msra.gmra.mrb[8].mxu0 %vm33_vm0, %v231_v62  ;;  %v746_v62 = vld [vmem:[%s7333_s4 + $0x10] sm:$0xff] }
 0x167   :  { %v215_v3 = vpop.f32.mrb[5].mxu0  ;;  %4348 = vmatprep.mubr.msk.f32.mxu1 %vm33_vm0, %v232_v0  ;;  %4384 = vmatprep.mubr.msk.f32.mxu0 %vm33_vm0, %v232_v0  ;;  %v224_v11 = vadd.f32 %v4319_v1, %v121_v6  ;;  %v3241_v0 = vld [vmem:[%s7334_s6] sm:$0xff]  ;;  %v3244_v1 = vld [vmem:[%s7334_s6 + $0x18] sm:$0xff]  ;;  %v3246_v6 = vld [vmem:[%s7334_s6 + $0x28] sm:$0xff] }
 0x168   :  { %v216_v7 = vadd.f32 %v215_v3, %v111_v58  ;;  %v4320_v8 = vpop.f32.mrb[6].mxu0  ;;  %4690 = vmatpush3.bf16.msk.msra.mxu0 %vm4993_vm7, %v4883_v19  ;;  %vm569_vm7 = vcmask 392192   ;;  %v3243_v3 = vld [vmem:[%s7334_s6 + $0x10] sm:$0xff] }
 0x169   :  { %v218_v13 = vpop.f32.mrb[7].mxu0  ;;  %4692 = vmatprep.subr.msk.bf16.mxu0 %vm5002_vm9, %v4883_v19  ;;  %v227_v27 = vadd.f32 %v4320_v8, %v126_v23  ;;  %v236_v18 = vmax.f32 %v224_v11, 0.0  ;;  %579 = vst.msk [vmem:[#allocation3 + $0x48] sm:$0xff] %vm569_vm7, %v7340_v2  ;;  %570 = vst.msk [vmem:[#allocation3] sm:$0xff] %vm569_vm7, %v7340_v2  ;;  %v3248_v8 = vld [vmem:[%s7334_s6 + $0x38] sm:$0xff]  ;;  %v3247_v11 = vld [vmem:[%s7334_s6 + $0x30] sm:$0xff] }
 0x16a   :  { %v234_v16 = vmax.f32 %v216_v7, 0.0  ;;  %v219_v17 = vadd.f32 %v218_v13, %v116_v63  ;;  %4349 = vmatmul.mubr.msk.f32.gmra.mrb[2].mxu1 %vm33_vm0, %v233_v5  ;;  %4385 = vmatmul.mubr.msk.f32.gmra.mrb[10].mxu0 %vm33_vm0, %v233_v5  ;;  %571 = vst.msk [vmem:[#allocation3 + $0x8] sm:$0xff] %vm569_vm7, %v7340_v2  ;;  %572 = vst.msk [vmem:[#allocation3 + $0x10] sm:$0xff] %vm569_vm7, %v7340_v2  ;;  %v3242_v63 = vld [vmem:[%s7334_s6 + $0x8] sm:$0xff]  ;;  %v3245_v7 = vld [vmem:[%s7334_s6 + $0x20] sm:$0xff] }
 0x16b   :  { %v237_v29 = vmax.f32 %v227_v27, 0.0  ;;  %573 = vst.msk [vmem:[#allocation3 + $0x18] sm:$0xff] %vm569_vm7, %v7340_v2  ;;  %574 = vst.msk [vmem:[#allocation3 + $0x20] sm:$0xff] %vm569_vm7, %v7340_v2  ;;  %v4840_v5 = vld [vmem:[%s7335_s3 + $0x4] ss:$8 sps:$4 sm:$0xff]   ;;  %v3251_v23 = vld [vmem:[%s7334_s6 + $0x50] sm:$0xff] }
 0x16c   :  { %v235_v28 = vmax.f32 %v219_v17, 0.0  ;;  %4351 = vmatprep.mubr.msk.f32.mxu1 %vm33_vm0, %v234_v16  ;;  %4387 = vmatprep.mubr.msk.f32.mxu0 %vm33_vm0, %v234_v16  ;;  %575 = vst.msk [vmem:[#allocation3 + $0x28] sm:$0xff] %vm569_vm7, %v7340_v2  ;;  %576 = vst.msk [vmem:[#allocation3 + $0x30] sm:$0xff] %vm569_vm7, %v7340_v2  ;;  %v3250_v13 = vld [vmem:[%s7334_s6 + $0x48] sm:$0xff]  ;;  %v3249_v16 = vld [vmem:[%s7334_s6 + $0x40] sm:$0xff] }
 0x16d   :  { %4694 = vmatpush3.bf16.msk.msra.mxu0 %vm5002_vm9, %v4883_v19  ;;  %577 = vst.msk [vmem:[#allocation3 + $0x38] sm:$0xff] %vm569_vm7, %v7340_v2  ;;  %578 = vst.msk [vmem:[#allocation3 + $0x40] sm:$0xff] %vm569_vm7, %v7340_v2  ;;  %vm686_vm9 = vcmask 392384   ;;  %v3252_v17 = vld [vmem:[%s7334_s6 + $0x58] sm:$0xff]  ;;  %v3254_v27 = vld [vmem:[%s7334_s6 + $0x68] sm:$0xff] }
 0x16e   :  { %4352 = vmatmul.mubr.msk.f32.gmra.mrb[4].mxu1 %vm33_vm0, %v235_v28  ;;  %4388 = vmatmul.mubr.msk.f32.gmra.mrb[12].mxu0 %vm33_vm0, %v235_v28  ;;  %580 = vst.msk [vmem:[#allocation3 + $0x50] sm:$0xff] %vm569_vm7, %v7340_v2  ;;  %581 = vst.msk [vmem:[#allocation3 + $0x58] sm:$0xff] %vm569_vm7, %v7340_v2  ;;  %v3253_v28 = vld [vmem:[%s7334_s6 + $0x60] sm:$0xff] }
 0x16f   :  { %4354 = vmatprep.mubr.msk.f32.mxu1 %vm33_vm0, %v236_v18  ;;  %4390 = vmatprep.mubr.msk.f32.mxu0 %vm33_vm0, %v236_v18  ;;  %582 = vst.msk [vmem:[#allocation3 + $0x60] sm:$0xff] %vm569_vm7, %v7340_v2  ;;  %583 = vst.msk [vmem:[#allocation3 + $0x68] sm:$0xff] %vm569_vm7, %v7340_v2  ;;  %v3256_v18 = vld [vmem:[%s7334_s6 + $0x78] sm:$0xff] }
 0x170   :  { %4696 = vmatprep.subr.msk.bf16.mxu0 %vm5025_vm12, %v4883_v19  ;;  %584 = vst.msk [vmem:[#allocation3 + $0x70] sm:$0xff] %vm569_vm7, %v7340_v2  ;;  %585 = vst.msk [vmem:[#allocation3 + $0x78] sm:$0xff] %vm569_vm7, %v7340_v2 }
 0x171   :  { %4698 = vmatpush3.bf16.msk.msra.mxu0 %vm5025_vm12, %v4883_v19  ;;  %586 = vst.msk [vmem:[#allocation3 + $0x80] sm:$0xff] %vm569_vm7, %v7340_v2  ;;  %587 = vst.msk [vmem:[#allocation3 + $0x88] sm:$0xff] %vm569_vm7, %v7340_v2  ;;  %vm786_vm12 = vcmask 523264  }
 0x172   :  { %4355 = vmatmul.mubr.msk.f32.gmra.mrb[6].mxu1 %vm33_vm0, %v237_v29  ;;  %4391 = vmatmul.mubr.msk.f32.gmra.mrb[14].mxu0 %vm33_vm0, %v237_v29  ;;  %588 = vst.msk [vmem:[#allocation3 + $0x90] sm:$0xff] %vm569_vm7, %v7340_v2  ;;  %589 = vst.msk [vmem:[#allocation3 + $0x98] sm:$0xff] %vm569_vm7, %v7340_v2  ;;  %vm7358_vm0 = vcmask 195584   ;;  %v3255_v29 = vld [vmem:[%s7334_s6 + $0x70] sm:$0xff] }
 0x173   :  { %4700 = vmatprep.subr.msk.bf16.mxu0 %vm5056_vm13, %v4883_v19  ;;  %590 = vst.msk [vmem:[#allocation3 + $0xa0] sm:$0xff] %vm569_vm7, %v7340_v2  ;;  %591 = vst.msk [vmem:[#allocation3 + $0xa8] sm:$0xff] %vm569_vm7, %v7340_v2  ;;  %3813 = vmatprep.mubr.msk.bf16.mxu1 %vm786_vm12, %v4840_v5 }
 0x174   :  { %592 = vst.msk [vmem:[#allocation3 + $0xb0] sm:$0xff] %vm569_vm7, %v7340_v2  ;;  %593 = vst.msk [vmem:[#allocation3 + $0xb8] sm:$0xff] %vm569_vm7, %v7340_v2 }
 0x239   :  { %v4347_v20 = vpop.f32.mrb[0].mxu1  ;;  %v4383_v24 = vpop.f32.mrb[8].mxu0 }
 0x23a   :  { %v562_v30 = vmax.f32 %v4347_v20, %v4383_v24  ;;  %v417_v31 = vpop.f32.mrb[1].mxu1  ;;  %v522_v32 = vpop.f32.mrb[9].mxu0  ;;  %v3684_v20 = vld [vmem:[%s7336_s8] sm:$0xff] }
 0x23b   :  { %v561_v33 = vmax.f32 %v417_v31, %v522_v32 }
 0x23c   :  { %637 = vst.msk [vmem:[#allocation3 + $0x48] sm:$0xff] %vm7358_vm0, %v562_v30  ;;  %604 = vrot.lane.b32.xlu1 %v562_v30, %s4878_s14 }
 0x23d   :  { %688 = vst.msk [vmem:[#allocation3 + $0x48] sm:$0xff] %vm686_vm9, %v562_v30  ;;  %v4386_v34 = vpop.f32.mrb[10].mxu0  ;;  %602 = vrot.lane.b32.xlu0 %v561_v33, %s4878_s14  ;;  %v4350_v35 = vpop.f32.mrb[2].mxu1 }
 0x23e   :  { %636 = vst.msk [vmem:[#allocation3 + $0x40] sm:$0xff] %vm7358_vm0, %v561_v33  ;;  %v564_v36 = vmax.f32 %v4350_v35, %v4386_v34  ;;  %v427_v38 = vpop.f32.mrb[3].mxu1  ;;  %v532_v39 = vpop.f32.mrb[11].mxu0 }
 0x23f   :  { %687 = vst.msk [vmem:[#allocation3 + $0x40] sm:$0xff] %vm686_vm9, %v561_v33  ;;  %v563_v40 = vmax.f32 %v427_v38, %v532_v39 }
 0x240   :  { %639 = vst.msk [vmem:[#allocation3 + $0x58] sm:$0xff] %vm7358_vm0, %v564_v36  ;;  %608 = vrot.lane.b32.xlu1 %v564_v36, %s4878_s14 }
 0x241   :  { %690 = vst.msk [vmem:[#allocation3 + $0x58] sm:$0xff] %vm686_vm9, %v564_v36  ;;  %v4389_v43 = vpop.f32.mrb[12].mxu0  ;;  %606 = vrot.lane.b32.xlu0 %v563_v40, %s4878_s14  ;;  %v4353_v48 = vpop.f32.mrb[4].mxu1 }
 0x242   :  { %638 = vst.msk [vmem:[#allocation3 + $0x50] sm:$0xff] %vm7358_vm0, %v563_v40  ;;  %v566_v49 = vmax.f32 %v4353_v48, %v4389_v43  ;;  %v437_v50 = vpop.f32.mrb[5].mxu1  ;;  %v542_v51 = vpop.f32.mrb[13].mxu0 }
 0x243   :  { %689 = vst.msk [vmem:[#allocation3 + $0x50] sm:$0xff] %vm686_vm9, %v563_v40  ;;  %v565_v52 = vmax.f32 %v437_v50, %v542_v51 }
 0x244   :  { %641 = vst.msk [vmem:[#allocation3 + $0x68] sm:$0xff] %vm7358_vm0, %v566_v49  ;;  %612 = vrot.lane.b32.xlu1 %v566_v49, %s4878_s14 }
 0x245   :  { %692 = vst.msk [vmem:[#allocation3 + $0x68] sm:$0xff] %vm686_vm9, %v566_v49  ;;  %v4392_v53 = vpop.f32.mrb[14].mxu0  ;;  %610 = vrot.lane.b32.xlu0 %v565_v52, %s4878_s14  ;;  %v4356_v54 = vpop.f32.mrb[6].mxu1 }
 0x246   :  { %640 = vst.msk [vmem:[#allocation3 + $0x60] sm:$0xff] %vm7358_vm0, %v565_v52  ;;  %v568_v55 = vmax.f32 %v4356_v54, %v4392_v53  ;;  %v447_v56 = vpop.f32.mrb[7].mxu1  ;;  %v552_v57 = vpop.f32.mrb[15].mxu0 }
 0x247   :  { %691 = vst.msk [vmem:[#allocation3 + $0x60] sm:$0xff] %vm686_vm9, %v565_v52  ;;  %v567_v58 = vmax.f32 %v447_v56, %v552_v57 }
 0x248   :  { %643 = vst.msk [vmem:[#allocation3 + $0x78] sm:$0xff] %vm7358_vm0, %v568_v55  ;;  %616 = vrot.lane.b32.xlu1 %v568_v55, %s4878_s14  ;;  %v719_v5 = vld [vmem:[#allocation3 + $0x58] sm:$0xff] }
 0x249   :  { %694 = vst.msk [vmem:[#allocation3 + $0x78] sm:$0xff] %vm686_vm9, %v568_v55  ;;  %614 = vrot.lane.b32.xlu0 %v567_v58, %s4878_s14 }
 0x24a   :  { %642 = vst.msk [vmem:[#allocation3 + $0x70] sm:$0xff] %vm7358_vm0, %v567_v58 }
 0x24b   :  { %693 = vst.msk [vmem:[#allocation3 + $0x70] sm:$0xff] %vm686_vm9, %v567_v58  ;;  %vm1120_vm9 = vcmp.lt.s32.totalorder %v4976_v14, %v5403_v41 }
 0x24c   :  { %646 = vrot.lane.b32.xlu1 %v562_v30, %s4880_s16 }
 0x24d   :  { %644 = vrot.lane.b32.xlu0 %v561_v33, %s4880_s16 }
 0x250   :  { %650 = vrot.lane.b32.xlu1 %v564_v36, %s4880_s16 }
 0x251   :  { %648 = vrot.lane.b32.xlu0 %v563_v40, %s4880_s16 }
 0x254   :  { %654 = vrot.lane.b32.xlu1 %v566_v49, %s4880_s16 }
 0x255   :  { %652 = vrot.lane.b32.xlu0 %v565_v52, %s4880_s16 }
 0x258   :  { %658 = vrot.lane.b32.xlu1 %v568_v55, %s4880_s16 }
 0x259   :  { %656 = vrot.lane.b32.xlu0 %v567_v58, %s4880_s16 }
 0x25c   :  { %755 = vperm.xlu1 %4832, %v745_v59  }
 0x25d   :  { %750 = vperm.xlu0 %4833, %v744_v60  }
 0x260   :  { %765 = vperm.xlu1 %4832, %v747_v61   ;;  %v716_v61 = vld [vmem:[#allocation3 + $0x40] sm:$0xff] }
 0x261   :  { %760 = vperm.xlu0 %4833, %v746_v62   ;;  %v717_v62 = vld [vmem:[#allocation3 + $0x48] sm:$0xff] }
 0x264   :  { %3264 = vperm.xlu1 %4832, %v3242_v63  }
 0x265   :  { %3259 = vperm.xlu0 %4833, %v3241_v0   ;;  %v736_v0 = vpack.c.bf16 %v717_v62, %v716_v61 }
 0x268   :  { %3274 = vperm.xlu1 %4832, %v3244_v1  }
 0x269   :  { %3269 = vperm.xlu0 %4833, %v3243_v3   ;;  %v718_v3 = vld [vmem:[#allocation3 + $0x50] sm:$0xff] }
 0x26c   :  { %3284 = vperm.xlu1 %4832, %v3246_v6  }
 0x26d   :  { %3279 = vperm.xlu0 %4833, %v3245_v7   ;;  %v737_v7 = vpack.c.bf16 %v719_v5, %v718_v3 }
 0x270   :  { %3294 = vperm.xlu1 %4832, %v3248_v8   ;;  %v720_v8 = vld [vmem:[#allocation3 + $0x60] sm:$0xff] }
 0x271   :  { %3289 = vperm.xlu0 %4833, %v3247_v11   ;;  %v721_v11 = vld [vmem:[#allocation3 + $0x68] sm:$0xff] }
 0x274   :  { %3304 = vperm.xlu1 %4832, %v3250_v13   ;;  %v738_v13 = vpack.c.bf16 %v721_v11, %v720_v8 }
 0x275   :  { %3299 = vperm.xlu0 %4833, %v3249_v16   ;;  %v722_v16 = vld [vmem:[#allocation3 + $0x70] sm:$0xff] }
 0x278   :  { %3314 = vperm.xlu1 %4832, %v3252_v17   ;;  %v723_v17 = vld [vmem:[#allocation3 + $0x78] sm:$0xff] }
 0x279   :  { %3309 = vperm.xlu0 %4833, %v3251_v23   ;;  %v739_v23 = vpack.c.bf16 %v723_v17, %v722_v16 }
 0x27c   :  { %3324 = vperm.xlu1 %4832, %v3254_v27  }
 0x27d   :  { %3319 = vperm.xlu0 %4833, %v3253_v28  }
 0x280   :  { %3334 = vperm.xlu1 %4832, %v3256_v18  }
 0x281   :  { %3329 = vperm.xlu0 %4833, %v3255_v29  }
 0x285   :  { %3687 = vperm.xlu0 %4833, %v3684_v20  }
 0x2ae   :  { %v605_v24 = vpop.permute.xlu1 %604 }
 0x2af   :  { %628 = vst.msk [vmem:[#allocation3 + $0x8] sm:$0xff] %vm626_vm15, %v605_v24  ;;  %v603_v30 = vpop.permute.xlu0 %602 }
 0x2b0   :  { %679 = vst.msk [vmem:[#allocation3 + $0x8] sm:$0xff] %vm677_vm2, %v605_v24 }
 0x2b1   :  { %627 = vst.msk [vmem:[#allocation3] sm:$0xff] %vm626_vm15, %v603_v30 }
 0x2b2   :  { %678 = vst.msk [vmem:[#allocation3] sm:$0xff] %vm677_vm2, %v603_v30  ;;  %v609_v31 = vpop.permute.xlu1 %608 }
 0x2b3   :  { %630 = vst.msk [vmem:[#allocation3 + $0x18] sm:$0xff] %vm626_vm15, %v609_v31  ;;  %v607_v32 = vpop.permute.xlu0 %606 }
 0x2b4   :  { %681 = vst.msk [vmem:[#allocation3 + $0x18] sm:$0xff] %vm677_vm2, %v609_v31 }
 0x2b5   :  { %629 = vst.msk [vmem:[#allocation3 + $0x10] sm:$0xff] %vm626_vm15, %v607_v32 }
 0x2b6   :  { %680 = vst.msk [vmem:[#allocation3 + $0x10] sm:$0xff] %vm677_vm2, %v607_v32  ;;  %v613_v33 = vpop.permute.xlu1 %612 }
 0x2b7   :  { %632 = vst.msk [vmem:[#allocation3 + $0x28] sm:$0xff] %vm626_vm15, %v613_v33  ;;  %v611_v34 = vpop.permute.xlu0 %610  ;;  %v709_v35 = vld [vmem:[#allocation3 + $0x8] sm:$0xff] }
 0x2b8   :  { %683 = vst.msk [vmem:[#allocation3 + $0x28] sm:$0xff] %vm677_vm2, %v613_v33 }
 0x2b9   :  { %631 = vst.msk [vmem:[#allocation3 + $0x20] sm:$0xff] %vm626_vm15, %v611_v34  ;;  %v708_v36 = vld [vmem:[#allocation3] sm:$0xff] }
 0x2ba   :  { %682 = vst.msk [vmem:[#allocation3 + $0x20] sm:$0xff] %vm677_vm2, %v611_v34  ;;  %v732_v38 = vpack.c.bf16 %v709_v35, %v708_v36  ;;  %v617_v39 = vpop.permute.xlu1 %616  ;;  %v4838_v36 = vld [vmem:[%s7335_s3] ss:$8 sps:$4 sm:$0xff]  }
 0x2bb   :  { %634 = vst.msk [vmem:[#allocation3 + $0x38] sm:$0xff] %vm626_vm15, %v617_v39  ;;  %v615_v40 = vpop.permute.xlu0 %614  ;;  %v711_v43 = vld [vmem:[#allocation3 + $0x18] sm:$0xff] }
 0x2bc   :  { %794 = vmatpush1.bf16.msra.mxu1 %v732_v38  ;;  %685 = vst.msk [vmem:[#allocation3 + $0x38] sm:$0xff] %vm677_vm2, %v617_v39  ;;  %v4841_v38 = vld [vmem:[%s7335_s3 + $0x14] ss:$8 sps:$4 sm:$0xff]   ;;  %v4843_v39 = vld [vmem:[%s7335_s3 + $0x10] ss:$8 sps:$4 sm:$0xff]  }
 0x2bd   :  { %633 = vst.msk [vmem:[#allocation3 + $0x30] sm:$0xff] %vm626_vm15, %v615_v40  ;;  %795 = vmatprep.subr.bf16.mxu1 %v4882_v4  ;;  %v710_v48 = vld [vmem:[#allocation3 + $0x10] sm:$0xff]  ;;  %vm1072_vm15 = vcmp.ge.s32.totalorder %v4979_v15, %v5400_v37 }
 0x2be   :  { %684 = vst.msk [vmem:[#allocation3 + $0x30] sm:$0xff] %vm677_vm2, %v615_v40  ;;  %v733_v49 = vpack.c.bf16 %v711_v43, %v710_v48  ;;  %v647_v50 = vpop.permute.xlu1 %646  ;;  %vm1121_vm2 = vcmp.lt.s32.totalorder %v4979_v15, %v5403_v41 }
 0x2bf   :  { %670 = vst.msk [vmem:[#allocation3 + $0x88] sm:$0xff] %vm668_vm4, %v647_v50  ;;  %v645_v51 = vpop.permute.xlu0 %644  ;;  %v713_v52 = vld [vmem:[#allocation3 + $0x28] sm:$0xff] }
 0x2c0   :  { %796 = vmatpush1.bf16.msra.mxu1 %v733_v49  ;;  %697 = vst.msk [vmem:[#allocation3 + $0x88] sm:$0xff] %vm695_vm6, %v647_v50 }
 0x2c1   :  { %669 = vst.msk [vmem:[#allocation3 + $0x80] sm:$0xff] %vm668_vm4, %v645_v51  ;;  %797 = vmatprep.subr.bf16.mxu1 %v4882_v4  ;;  %v712_v53 = vld [vmem:[#allocation3 + $0x20] sm:$0xff] }
 0x2c2   :  { %696 = vst.msk [vmem:[#allocation3 + $0x80] sm:$0xff] %vm695_vm6, %v645_v51  ;;  %v734_v54 = vpack.c.bf16 %v713_v52, %v712_v53  ;;  %v651_v55 = vpop.permute.xlu1 %650 }
 0x2c3   :  { %672 = vst.msk [vmem:[#allocation3 + $0x98] sm:$0xff] %vm668_vm4, %v651_v55  ;;  %v649_v56 = vpop.permute.xlu0 %648  ;;  %v715_v57 = vld [vmem:[#allocation3 + $0x38] sm:$0xff] }
 0x2c4   :  { %798 = vmatpush1.bf16.msra.mxu1 %v734_v54  ;;  %699 = vst.msk [vmem:[#allocation3 + $0x98] sm:$0xff] %vm695_vm6, %v651_v55 }
 0x2c5   :  { %671 = vst.msk [vmem:[#allocation3 + $0x90] sm:$0xff] %vm668_vm4, %v649_v56  ;;  %799 = vmatprep.subr.bf16.mxu1 %v4882_v4  ;;  %v714_v58 = vld [vmem:[#allocation3 + $0x30] sm:$0xff] }
 0x2c6   :  { %698 = vst.msk [vmem:[#allocation3 + $0x90] sm:$0xff] %vm695_vm6, %v649_v56  ;;  %v735_v59 = vpack.c.bf16 %v715_v57, %v714_v58  ;;  %v655_v60 = vpop.permute.xlu1 %654 }
 0x2c7   :  { %674 = vst.msk [vmem:[#allocation3 + $0xa8] sm:$0xff] %vm668_vm4, %v655_v60  ;;  %v653_v63 = vpop.permute.xlu0 %652  ;;  %v725_v28 = vld [vmem:[#allocation3 + $0x88] sm:$0xff] }
 0x2c8   :  { %800 = vmatpush1.bf16.msra.mxu1 %v735_v59  ;;  %701 = vst.msk [vmem:[#allocation3 + $0xa8] sm:$0xff] %vm695_vm6, %v655_v60 }
 0x2c9   :  { %673 = vst.msk [vmem:[#allocation3 + $0xa0] sm:$0xff] %vm668_vm4, %v653_v63  ;;  %801 = vmatprep.subr.bf16.mxu1 %v4882_v4  ;;  %v724_v27 = vld [vmem:[#allocation3 + $0x80] sm:$0xff] }
 0x2ca   :  { %700 = vst.msk [vmem:[#allocation3 + $0xa0] sm:$0xff] %vm695_vm6, %v653_v63  ;;  %v659_v1 = vpop.permute.xlu1 %658  ;;  %v740_v18 = vpack.c.bf16 %v725_v28, %v724_v27 }
 0x2cb   :  { %676 = vst.msk [vmem:[#allocation3 + $0xb8] sm:$0xff] %vm668_vm4, %v659_v1  ;;  %v657_v6 = vpop.permute.xlu0 %656  ;;  %v727_v20 = vld [vmem:[#allocation3 + $0x98] sm:$0xff] }
 0x2cc   :  { %802 = vmatpush1.bf16.msra.mxu1 %v736_v0  ;;  %703 = vst.msk [vmem:[#allocation3 + $0xb8] sm:$0xff] %vm695_vm6, %v659_v1 }
 0x2cd   :  { %675 = vst.msk [vmem:[#allocation3 + $0xb0] sm:$0xff] %vm668_vm4, %v657_v6  ;;  %803 = vmatprep.subr.bf16.mxu1 %v4882_v4  ;;  %v726_v29 = vld [vmem:[#allocation3 + $0x90] sm:$0xff]  ;;  %vm1073_vm4 = vcmp.ge.s32.totalorder %v5010_v21, %v5400_v37 }
 0x2ce   :  { %702 = vst.msk [vmem:[#allocation3 + $0xb0] sm:$0xff] %vm695_vm6, %v657_v6  ;;  %v741_v24 = vpack.c.bf16 %v727_v20, %v726_v29  ;;  %vm1122_vm6 = vcmp.lt.s32.totalorder %v5010_v21, %v5403_v41  ;;  %v3836_v20 = vsel %vm5415_vm3, 1.0, %v7340_v2 }
 0x2cf   :  { %v729_v31 = vld [vmem:[#allocation3 + $0xa8] sm:$0xff] }
 0x2d0   :  { %804 = vmatpush1.bf16.msra.mxu1 %v737_v7 }
 0x2d1   :  { %805 = vmatprep.subr.bf16.mxu1 %v4882_v4  ;;  %v728_v30 = vld [vmem:[#allocation3 + $0xa0] sm:$0xff] }
 0x2d2   :  { %v742_v32 = vpack.c.bf16 %v729_v31, %v728_v30 }
 0x2d3   :  { %v731_v34 = vld [vmem:[#allocation3 + $0xb8] sm:$0xff] }
 0x2d4   :  { %806 = vmatpush1.bf16.msra.mxu1 %v738_v13 }
 0x2d5   :  { %807 = vmatprep.subr.bf16.mxu1 %v4882_v4  ;;  %v730_v33 = vld [vmem:[#allocation3 + $0xb0] sm:$0xff] }
 0x2d6   :  { %v743_v35 = vpack.c.bf16 %v731_v34, %v730_v33  ;;  %v5479_v34 = vadd.s32 96, %v4962_v9 }
 0x2d8   :  { %808 = vmatpush1.bf16.msra.mxu1 %v739_v23 }
 0x2d9   :  { %809 = vmatprep.subr.bf16.mxu1 %v4882_v4 }
 0x2db   :  { %v756_v49 = vpop.permute.xlu1 %755 }
 0x2dc   :  { %810 = vmatpush1.bf16.msra.mxu1 %v740_v18  ;;  %v751_v40 = vpop.permute.xlu0 %750 }
 0x2dd   :  { %811 = vmatprep.subr.bf16.mxu1 %v4882_v4 }
 0x2df   :  { %v766_v59 = vpop.permute.xlu1 %765 }
 0x2e0   :  { %812 = vmatpush1.bf16.msra.mxu1 %v741_v24  ;;  %v761_v55 = vpop.permute.xlu0 %760 }
 0x2e1   :  { %813 = vmatprep.subr.bf16.mxu1 %v4882_v4 }
 0x2e4   :  { %814 = vmatpush1.bf16.msra.mxu1 %v742_v32 }
 0x2e5   :  { %815 = vmatprep.subr.bf16.mxu1 %v4882_v4 }
 0x2e8   :  { %816 = vmatpush1.bf16.msra.mxu1 %v743_v35 }
 0x2eb   :  { %826 = vmatmul.mubr.bf16.vlgmr.msra.gmra.mrb[8].mxu1 %v4838_v36 }
 0x2ec   :  { %3814 = vmatprep.mubr.msk.bf16.mxu1 %vm786_vm12, %v4841_v38  ;;  %v5489_v38 = vadd.s32 104, %v4962_v9 }
 0x2f3   :  { %834 = vmatmul.mubr.bf16.gmra.mrb[12].mxu1 %v4843_v39  ;;  %v5497_v39 = vadd.s32 112, %v4962_v9 }
 0x3be   :  { %v827_v4 = vpop.f32.mrb[8].mxu1 }
 0x3bf   :  { %v828_v43 = vadd.f32 %v827_v4, %v751_v40  ;;  %v829_v48 = vpop.f32.mrb[9].mxu1 }
 0x3c0   :  { %v830_v50 = vpop.f32.mrb[10].mxu1  ;;  %v5515_v48 = vadd.s32 128, %v4962_v9 }
 0x3c1   :  { %v842_v51 = vmax.f32 %v828_v43, 0.0  ;;  %v831_v52 = vadd.f32 %v830_v50, %v756_v49  ;;  %v832_v53 = vpop.f32.mrb[11].mxu1  ;;  %v5507_v43 = vadd.s32 120, %v4962_v9 }
 0x3c3   :  { %v843_v54 = vmax.f32 %v831_v52, 0.0  ;;  %4405 = vmatprep.mubr.msk.f32.mxu0 %vm569_vm7, %v842_v51  ;;  %v5533_v52 = vadd.s32 144, %v4962_v9 }
 0x3c5   :  { %4406 = vmatmul.mubr.msk.f32.vlgmr.msra.gmra.mrb[16].mxu0 %vm569_vm7, %v843_v54 }
 0x3c6   :  { %v835_v56 = vpop.f32.mrb[12].mxu1  ;;  %4702 = vmatpush3.bf16.msk.msra.mxu0 %vm5056_vm13, %v4883_v19  ;;  %vm1069_vm13 = vcmp.ge.s32.totalorder %v4962_v9, %v5400_v37 }
 0x3c7   :  { %v836_v57 = vadd.f32 %v835_v56, %v761_v55  ;;  %v837_v58 = vpop.f32.mrb[13].mxu1  ;;  %4704 = vmatprep.subr.msk.bf16.mxu0 %vm5071_vm1, %v4883_v19  ;;  %v5543_v55 = vadd.s32 152, %v4962_v9  ;;  %v5551_v56 = vadd.s32 160, %v4962_v9 }
 0x3c8   :  { %v838_v60 = vpop.f32.mrb[14].mxu1 }
 0x3c9   :  { %v844_v61 = vmax.f32 %v836_v57, 0.0  ;;  %v839_v62 = vadd.f32 %v838_v60, %v766_v59  ;;  %v840_v63 = vpop.f32.mrb[15].mxu1  ;;  %v5561_v59 = vadd.s32 168, %v4962_v9  ;;  %v5569_v60 = vadd.s32 176, %v4962_v9 }
 0x3ca   :  { %4706 = vmatpush3.bf16.msk.msra.mxu0 %vm5071_vm1, %v4883_v19  ;;  %vm1118_vm1 = vcmp.lt.s32.totalorder %v4962_v9, %v5403_v41  ;;  %v5579_v63 = vadd.s32 184, %v4962_v9 }
 0x3cb   :  { %v845_v0 = vmax.f32 %v839_v62, 0.0  ;;  %4408 = vmatprep.mubr.msk.f32.mxu0 %vm569_vm7, %v844_v61  ;;  %4708 = vmatprep.subr.msk.bf16.mxu0 %vm5085_vm5, %v4883_v19 }
 0x3cd   :  { %4409 = vmatmul.mubr.msk.f32.gmra.mrb[18].mxu0 %vm569_vm7, %v845_v0 }
 0x3ce   :  { %4710 = vmatpush3.bf16.msk.msra.mxu0 %vm5085_vm5, %v4883_v19  ;;  %4423 = vmatprep.mubr.msk.f32.mxu0 %vm569_vm7, %v842_v51  ;;  %vm1166_vm5 = vmand %vm1069_vm13, %vm1118_vm1  ;;  %v5525_v51 = vadd.s32 136, %v4962_v9 }
 0x3cf   :  { %v3835_v42 = vsel %vm1166_vm5, 1.0, %v7340_v2  ;;  %vm4719_vm14 = vmpackc.low %vm5415_vm3, %vm1166_vm5  ;;  %vm1074_vm5 = vcmp.ge.s32.totalorder %v5013_v22, %v5400_v37  ;;  %vm1124_vm3 = vcmp.lt.s32.totalorder %v5030_v25, %v5403_v41 }
 0x3d0   :  { %4720 = vmatprep.subr.msk.bf16.mxu1 %vm4719_vm14, %v4883_v19  ;;  %vm1169_vm13 = vmand %vm1072_vm15, %vm1121_vm2  ;;  %vm1125_vm15 = vcmp.lt.s32.totalorder %v5033_v26, %v5403_v41  ;;  %vm1077_vm2 = vcmp.ge.s32.totalorder %v5107_v44, %v5400_v37 }
 0x3d1   :  { %4424 = vmatmul.mubr.msk.f32.vlgmr.msra.gmra.mrb[20].mxu0 %vm569_vm7, %v843_v54  ;;  %4722 = vmatpush3.bf16.msk.msra.mxu1 %vm4719_vm14, %v4883_v19  ;;  %vm1170_vm1 = vmand %vm1073_vm4, %vm1122_vm6  ;;  %v3838_v30 = vsel %vm1169_vm13, 1.0, %v7340_v2  ;;  %vm1126_vm4 = vcmp.lt.s32.totalorder %v5107_v44, %v5403_v41 }
 0x3d2   :  { %4426 = vmatprep.mubr.msk.f32.mxu0 %vm569_vm7, %v844_v61  ;;  %v3839_v31 = vsel %vm1170_vm1, 1.0, %v7340_v2  ;;  %vm1171_vm14 = vmand %vm1074_vm5, %vm1123_vm10  ;;  %vm1078_vm1 = vcmp.ge.s32.totalorder %v5110_v45, %v5400_v37  ;;  %vm1127_vm5 = vcmp.lt.s32.totalorder %v5110_v45, %v5403_v41  ;;  %vm1079_vm10 = vcmp.ge.s32.totalorder %v5120_v46, %v5400_v37 }
 0x3d3   :  { %v3840_v32 = vsel %vm1171_vm14, 1.0, %v7340_v2  ;;  %vm1174_vm13 = vmand %vm1077_vm2, %vm1126_vm4  ;;  %vm1130_vm2 = vcmp.lt.s32.totalorder %v5479_v34, %v5403_v41 }
 0x3d4   :  { %v3843_v36 = vsel %vm1174_vm13, 1.0, %v7340_v2  ;;  %vm1082_vm13 = vcmp.ge.s32.totalorder %v5489_v38, %v5400_v37 }
 0x3d5   :  { %4427 = vmatmul.mubr.msk.f32.gmra.mrb[22].mxu0 %vm569_vm7, %v845_v0  ;;  %vm1071_vm7 = vcmp.ge.s32.totalorder %v4976_v14, %v5400_v37  ;;  %v5587_v0 = vadd.s32 192, %v4962_v9 }
 0x3d6   :  { %4437 = vmatprep.mubr.msk.f32.mxu0 %vm1310_vm8, %v3835_v42  ;;  %vm5427_vm12 = vmand %vm1071_vm7, %vm1120_vm9  ;;  %vm1076_vm9 = vcmp.ge.s32.totalorder %v5033_v26, %v5400_v37 }
 0x3d7   :  { %v3837_v24 = vsel %vm5427_vm12, 1.0, %v7340_v2  ;;  %vm1172_vm7 = vmand %vm1075_vm11, %vm1124_vm3  ;;  %vm1128_vm11 = vcmp.lt.s32.totalorder %v5120_v46, %v5403_v41 }
 0x3d8   :  { %v3841_v33 = vsel %vm1172_vm7, 1.0, %v7340_v2  ;;  %vm1173_vm6 = vmand %vm1076_vm9, %vm1125_vm15  ;;  %vm1080_vm7 = vcmp.ge.s32.totalorder %v5123_v47, %v5400_v37  ;;  %vm1129_vm9 = vcmp.lt.s32.totalorder %v5123_v47, %v5403_v41  ;;  %vm1081_vm15 = vcmp.ge.s32.totalorder %v5479_v34, %v5400_v37 }
 0x3d9   :  { %v3842_v35 = vsel %vm1173_vm6, 1.0, %v7340_v2  ;;  %vm1175_vm3 = vmand %vm1078_vm1, %vm1127_vm5  ;;  %vm1131_vm1 = vcmp.lt.s32.totalorder %v5489_v38, %v5403_v41  ;;  %vm1083_vm5 = vcmp.ge.s32.totalorder %v5497_v39, %v5400_v37 }
 0x3da   :  { %vm1176_vm14 = vmand %vm1079_vm10, %vm1128_vm11  ;;  %v3844_v40 = vsel %vm1175_vm3, 1.0, %v7340_v2  ;;  %vm1132_vm10 = vcmp.lt.s32.totalorder %v5497_v39, %v5403_v41 }
 0x3db   :  { %v3845_v4 = vsel %vm1176_vm14, 1.0, %v7340_v2  ;;  %vm1177_vm4 = vmand %vm1080_vm7, %vm1129_vm9  ;;  %vm1084_vm14 = vcmp.ge.s32.totalorder %v5507_v43, %v5400_v37  ;;  %vm1133_vm7 = vcmp.lt.s32.totalorder %v5507_v43, %v5403_v41  ;;  %vm1085_vm9 = vcmp.ge.s32.totalorder %v5515_v48, %v5400_v37 }
 0x3dc   :  { %vm1178_vm6 = vmand %vm1081_vm15, %vm1130_vm2  ;;  %v3846_v49 = vsel %vm1177_vm4, 1.0, %v7340_v2  ;;  %vm1134_vm15 = vcmp.lt.s32.totalorder %v5515_v48, %v5403_v41 }
 0x3dd   :  { %v3847_v50 = vsel %vm1178_vm6, 1.0, %v7340_v2  ;;  %vm1179_vm11 = vmand %vm1082_vm13, %vm1131_vm1  ;;  %vm1086_vm6 = vcmp.ge.s32.totalorder %v5525_v51, %v5400_v37  ;;  %vm1135_vm13 = vcmp.lt.s32.totalorder %v5525_v51, %v5403_v41  ;;  %vm1087_vm1 = vcmp.ge.s32.totalorder %v5533_v52, %v5400_v37 }
 0x3de   :  { %vm1180_vm3 = vmand %vm1083_vm5, %vm1132_vm10  ;;  %v3848_v53 = vsel %vm1179_vm11, 1.0, %v7340_v2  ;;  %vm1136_vm5 = vcmp.lt.s32.totalorder %v5533_v52, %v5403_v41 }
 0x3df   :  { %v3849_v54 = vsel %vm1180_vm3, 1.0, %v7340_v2  ;;  %vm1181_vm2 = vmand %vm1084_vm14, %vm1133_vm7  ;;  %vm1088_vm3 = vcmp.ge.s32.totalorder %v5543_v55, %v5400_v37  ;;  %vm1137_vm14 = vcmp.lt.s32.totalorder %v5543_v55, %v5403_v41  ;;  %vm1089_vm7 = vcmp.ge.s32.totalorder %v5551_v56, %v5400_v37 }
 0x3e0   :  { %vm1182_vm4 = vmand %vm1085_vm9, %vm1134_vm15  ;;  %v3850_v57 = vsel %vm1181_vm2, 1.0, %v7340_v2  ;;  %vm1138_vm9 = vcmp.lt.s32.totalorder %v5551_v56, %v5403_v41 }
 0x3e1   :  { %v3851_v58 = vsel %vm1182_vm4, 1.0, %v7340_v2  ;;  %vm1183_vm10 = vmand %vm1086_vm6, %vm1135_vm13  ;;  %vm1090_vm4 = vcmp.ge.s32.totalorder %v5561_v59, %v5400_v37  ;;  %vm1139_vm6 = vcmp.lt.s32.totalorder %v5561_v59, %v5403_v41  ;;  %vm1091_vm13 = vcmp.ge.s32.totalorder %v5569_v60, %v5400_v37 }
 0x3e2   :  { %vm1184_vm11 = vmand %vm1087_vm1, %vm1136_vm5  ;;  %v3852_v61 = vsel %vm1183_vm10, 1.0, %v7340_v2  ;;  %vm1140_vm1 = vcmp.lt.s32.totalorder %v5569_v60, %v5403_v41 }
 0x3e3   :  { %v3853_v62 = vsel %vm1184_vm11, 1.0, %v7340_v2  ;;  %vm1185_vm15 = vmand %vm1088_vm3, %vm1137_vm14  ;;  %vm1092_vm11 = vcmp.ge.s32.totalorder %v5579_v63, %v5400_v37  ;;  %vm1141_vm3 = vcmp.lt.s32.totalorder %v5579_v63, %v5403_v41  ;;  %vm1093_vm14 = vcmp.ge.s32.totalorder %v5587_v0, %v5400_v37 }
 0x3e4   :  { %vm1186_vm2 = vmand %vm1089_vm7, %vm1138_vm9  ;;  %v3854_v42 = vsel %vm1185_vm15, 1.0, %v7340_v2  ;;  %vm1142_vm7 = vcmp.lt.s32.totalorder %v5587_v0, %v5403_v41 }
 0x3e5   :  { %v3855_v1 = vsel %vm1186_vm2, 1.0, %v7340_v2  ;;  %vm1187_vm5 = vmand %vm1090_vm4, %vm1139_vm6 }
 0x3e6   :  { %vm1188_vm10 = vmand %vm1091_vm13, %vm1140_vm1 }
 0x3e7   :  { %vm1189_vm9 = vmand %vm1092_vm11, %vm1141_vm3 }
 0x3e8   :  { %vm1190_vm15 = vmand %vm1093_vm14, %vm1142_vm7 }
 0x498   :  { %v4407_v3 = vpop.f32.mrb[16].mxu0 }
 0x499   :  { %v924_v5 = vpop.f32.mrb[17].mxu0 }
 0x4a0   :  { %v4410_v6 = vpop.f32.mrb[18].mxu0 }
 0x4a1   :  { %v934_v7 = vpop.f32.mrb[19].mxu0 }
 0x4a4   :  { %v4425_v8 = vpop.f32.mrb[20].mxu0 }
 0x4a5   :  { %v1029_v11 = vmax.f32 %v4407_v3, %v4425_v8  ;;  %v1009_v13 = vpop.f32.mrb[21].mxu0  ;;  %v5597_v3 = vadd.s32 200, %v4962_v9  ;;  %v5615_v8 = vadd.s32 216, %v4962_v9 }
 0x4a6   :  { %v1028_v16 = vmax.f32 %v924_v5, %v1009_v13  ;;  %v5605_v5 = vadd.s32 208, %v4962_v9  ;;  %v3858_v13 = vsel %vm1189_vm9, 1.0, %v7340_v2 }
 0x4a7   :  { %vm1094_vm2 = vcmp.ge.s32.totalorder %v5597_v3, %v5400_v37  ;;  %vm1143_vm4 = vcmp.lt.s32.totalorder %v5597_v3, %v5403_v41  ;;  %vm1145_vm11 = vcmp.lt.s32.totalorder %v5615_v8, %v5403_v41 }
 0x4a8   :  { %v4711_v17 = vpack.c.bf16 %v1029_v11, %v1028_v16  ;;  %v4428_v23 = vpop.f32.mrb[22].mxu0  ;;  %vm1095_vm6 = vcmp.ge.s32.totalorder %v5605_v5, %v5400_v37  ;;  %vm1144_vm13 = vcmp.lt.s32.totalorder %v5605_v5, %v5403_v41  ;;  %v5623_v11 = vadd.s32 224, %v4962_v9  ;;  %vm1191_vm1 = vmand %vm1094_vm2, %vm1143_vm4 }
 0x4a9   :  { %v1031_v27 = vmax.f32 %v4410_v6, %v4428_v23  ;;  %v1019_v28 = vpop.f32.mrb[23].mxu0  ;;  %v3856_v6 = vsel %vm1187_vm5, 1.0, %v7340_v2  ;;  %v3859_v16 = vsel %vm1190_vm15, 1.0, %v7340_v2  ;;  %vm1192_vm5 = vmand %vm1095_vm6, %vm1144_vm13  ;;  %v5641_v23 = vadd.s32 240, %v4962_v9 }
 0x4aa   :  { %v1030_v18 = vmax.f32 %v934_v7, %v1019_v28  ;;  %4712 = vmatprep.subr.bf16.mxu0 %v4711_v17  ;;  %v3857_v7 = vsel %vm1188_vm10, 1.0, %v7340_v2  ;;  %vm1096_vm10 = vcmp.ge.s32.totalorder %v5615_v8, %v5400_v37  ;;  %vm1097_vm3 = vcmp.ge.s32.totalorder %v5623_v11, %v5400_v37 }
 0x4ab   :  { %4714 = vmatpush3.bf16.msra.mxu0 %v4711_v17  ;;  %v5633_v17 = vadd.s32 232, %v4962_v9  ;;  %vm1146_vm14 = vcmp.lt.s32.totalorder %v5623_v11, %v5403_v41  ;;  %v3861_v28 = vsel %vm1192_vm5, 1.0, %v7340_v2  ;;  %vm1193_vm7 = vmand %vm1096_vm10, %vm1145_vm11  ;;  %vm1099_vm4 = vcmp.ge.s32.totalorder %v5641_v23, %v5400_v37 }
 0x4ac   :  { %v4715_v19 = vpack.c.bf16 %v1031_v27, %v1030_v18  ;;  %v3860_v27 = vsel %vm1191_vm1, 1.0, %v7340_v2  ;;  %vm1194_vm9 = vmand %vm1097_vm3, %vm1146_vm14  ;;  %v5651_v18 = vadd.s32 248, %v4962_v9  ;;  %vm1148_vm6 = vcmp.lt.s32.totalorder %v5641_v23, %v5403_v41 }
 0x4ad   :  { %vm1098_vm15 = vcmp.ge.s32.totalorder %v5633_v17, %v5400_v37  ;;  %vm1147_vm2 = vcmp.lt.s32.totalorder %v5633_v17, %v5403_v41  ;;  %vm1196_vm1 = vmand %vm1099_vm4, %vm1148_vm6 }
 0x4ae   :  { %4716 = vmatprep.subr.bf16.mxu0 %v4715_v19  ;;  %vm1195_vm13 = vmand %vm1098_vm15, %vm1147_vm2  ;;  %vm1100_vm5 = vcmp.ge.s32.totalorder %v5651_v18, %v5400_v37  ;;  %vm1149_vm10 = vcmp.lt.s32.totalorder %v5651_v18, %v5403_v41 }
 0x4af   :  { %4718 = vmatpush3.bf16.msra.mxu0 %v4715_v19  ;;  %v5659_v19 = vadd.s32 256, %v4962_v9  ;;  %vm1197_vm14 = vmand %vm1100_vm5, %vm1149_vm10 }
 0x4b1   :  { %vm1101_vm11 = vcmp.ge.s32.totalorder %v5659_v19, %v5400_v37  ;;  %vm1150_vm3 = vcmp.lt.s32.totalorder %v5659_v19, %v5403_v41 }
 0x4b2   :  { %4438 = vmatmul.mubr.msk.f32.vlgmr.msra.gmra.mrb[24].mxu0 %vm1310_vm8, %v3836_v20  ;;  %v3862_v20 = vsel %vm1193_vm7, 1.0, %v7340_v2  ;;  %vm1198_vm7 = vmand %vm1101_vm11, %vm1150_vm3 }
 0x4b3   :  { %4440 = vmatprep.mubr.msk.f32.mxu0 %vm1310_vm8, %v3837_v24  ;;  %v3863_v24 = vsel %vm1194_vm9, 1.0, %v7340_v2 }
 0x4b6   :  { %4441 = vmatmul.mubr.msk.f32.gmra.mrb[26].mxu0 %vm1310_vm8, %v3838_v30  ;;  %v5669_v30 = vadd.s32 264, %v4962_v9 }
 0x4b7   :  { %4443 = vmatprep.mubr.msk.f32.mxu0 %vm1310_vm8, %v3839_v31  ;;  %v5677_v31 = vadd.s32 272, %v4962_v9 }
 0x4b8   :  { %vm1102_vm9 = vcmp.ge.s32.totalorder %v5669_v30, %v5400_v37  ;;  %vm1151_vm15 = vcmp.lt.s32.totalorder %v5669_v30, %v5403_v41 }
 0x4b9   :  { %vm1103_vm2 = vcmp.ge.s32.totalorder %v5677_v31, %v5400_v37  ;;  %vm1152_vm4 = vcmp.lt.s32.totalorder %v5677_v31, %v5403_v41  ;;  %vm1199_vm6 = vmand %vm1102_vm9, %vm1151_vm15 }
 0x4ba   :  { %4444 = vmatmul.mubr.msk.f32.gmra.mrb[28].mxu0 %vm1310_vm8, %v3840_v32  ;;  %v3864_v32 = vsel %vm1195_vm13, 1.0, %v7340_v2  ;;  %vm1200_vm13 = vmand %vm1103_vm2, %vm1152_vm4 }
 0x4bb   :  { %4446 = vmatprep.mubr.msk.f32.mxu0 %vm1310_vm8, %v3841_v33  ;;  %v3865_v33 = vsel %vm1196_vm1, 1.0, %v7340_v2 }
 0x4be   :  { %4447 = vmatmul.mubr.msk.f32.gmra.mrb[30].mxu0 %vm1310_vm8, %v3842_v35  ;;  %v5687_v35 = vadd.s32 280, %v4962_v9 }
 0x4bf   :  { %4449 = vmatprep.mubr.msk.f32.mxu0 %vm1310_vm8, %v3843_v36  ;;  %v5695_v36 = vadd.s32 288, %v4962_v9 }
 0x4c0   :  { %vm1104_vm1 = vcmp.ge.s32.totalorder %v5687_v35, %v5400_v37  ;;  %vm1153_vm5 = vcmp.lt.s32.totalorder %v5687_v35, %v5403_v41 }
 0x4c1   :  { %vm1105_vm10 = vcmp.ge.s32.totalorder %v5695_v36, %v5400_v37  ;;  %vm1154_vm11 = vcmp.lt.s32.totalorder %v5695_v36, %v5403_v41  ;;  %vm1201_vm3 = vmand %vm1104_vm1, %vm1153_vm5 }
 0x4c2   :  { %4450 = vmatmul.mubr.msk.f32.gmra.mrb[32].mxu0 %vm1310_vm8, %v3844_v40  ;;  %v3866_v40 = vsel %vm1197_vm14, 1.0, %v7340_v2  ;;  %vm1202_vm14 = vmand %vm1105_vm10, %vm1154_vm11 }
 0x4c3   :  { %4452 = vmatprep.mubr.msk.f32.mxu0 %vm1310_vm8, %v3845_v4  ;;  %v3867_v4 = vsel %vm1198_vm7, 1.0, %v7340_v2 }
 0x4c6   :  { %4453 = vmatmul.mubr.msk.f32.gmra.mrb[34].mxu0 %vm1310_vm8, %v3846_v49  ;;  %v5705_v49 = vadd.s32 296, %v4962_v9 }
 0x4c7   :  { %4455 = vmatprep.mubr.msk.f32.mxu0 %vm1310_vm8, %v3847_v50  ;;  %v5713_v50 = vadd.s32 304, %v4962_v9 }
 0x4c8   :  { %vm1106_vm7 = vcmp.ge.s32.totalorder %v5705_v49, %v5400_v37  ;;  %vm1155_vm9 = vcmp.lt.s32.totalorder %v5705_v49, %v5403_v41 }
 0x4c9   :  { %vm1107_vm15 = vcmp.ge.s32.totalorder %v5713_v50, %v5400_v37  ;;  %vm1156_vm2 = vcmp.lt.s32.totalorder %v5713_v50, %v5403_v41  ;;  %vm1203_vm4 = vmand %vm1106_vm7, %vm1155_vm9 }
 0x4ca   :  { %4456 = vmatmul.mubr.msk.f32.gmra.mrb[36].mxu0 %vm1310_vm8, %v3848_v53  ;;  %v3868_v53 = vsel %vm1199_vm6, 1.0, %v7340_v2  ;;  %vm1204_vm6 = vmand %vm1107_vm15, %vm1156_vm2 }
 0x4cb   :  { %4458 = vmatprep.mubr.msk.f32.mxu0 %vm1310_vm8, %v3849_v54  ;;  %v3869_v54 = vsel %vm1200_vm13, 1.0, %v7340_v2 }
 0x4ce   :  { %4459 = vmatmul.mubr.msk.f32.gmra.mrb[38].mxu0 %vm1310_vm8, %v3850_v57  ;;  %v5723_v57 = vadd.s32 312, %v4962_v9 }
 0x4cf   :  { %4461 = vmatprep.mubr.msk.f32.mxu0 %vm1310_vm8, %v3851_v58  ;;  %v5731_v58 = vadd.s32 320, %v4962_v9 }
 0x4d0   :  { %vm1108_vm13 = vcmp.ge.s32.totalorder %v5723_v57, %v5400_v37  ;;  %vm1157_vm1 = vcmp.lt.s32.totalorder %v5723_v57, %v5403_v41 }
 0x4d1   :  { %7375 = vst [vmem:[#allocation4_spill] sm:$0xff] %v5731_v58  ;;  %vm1109_vm5 = vcmp.ge.s32.totalorder %v5731_v58, %v5400_v37  ;;  %vm1158_vm10 = vcmp.lt.s32.totalorder %v5731_v58, %v5403_v41  ;;  %vm1205_vm11 = vmand %vm1108_vm13, %vm1157_vm1 }
 0x4d2   :  { %4462 = vmatmul.mubr.msk.f32.gmra.mrb[40].mxu0 %vm1310_vm8, %v3852_v61  ;;  %v3870_v61 = vsel %vm1201_vm3, 1.0, %v7340_v2  ;;  %vm1206_vm3 = vmand %vm1109_vm5, %vm1158_vm10 }
 0x4d3   :  { %4464 = vmatprep.mubr.msk.f32.mxu0 %vm1310_vm8, %v3853_v62  ;;  %v3871_v62 = vsel %vm1202_vm14, 1.0, %v7340_v2 }
 0x4d6   :  { %4465 = vmatmul.mubr.msk.f32.gmra.mrb[42].mxu0 %vm1310_vm8, %v3854_v42  ;;  %v5741_v42 = vadd.s32 328, %v4962_v9 }
 0x4d7   :  { %4467 = vmatprep.mubr.msk.f32.mxu0 %vm1310_vm8, %v3855_v1  ;;  %v5749_v1 = vadd.s32 336, %v4962_v9 }
 0x4d8   :  { %7376 = vst [vmem:[#allocation5_spill] sm:$0xff] %v5741_v42  ;;  %vm1110_vm14 = vcmp.ge.s32.totalorder %v5741_v42, %v5400_v37  ;;  %vm1159_vm7 = vcmp.lt.s32.totalorder %v5741_v42, %v5403_v41 }
 0x4d9   :  { %7377 = vst [vmem:[#allocation6_spill] sm:$0xff] %v5749_v1  ;;  %vm1111_vm9 = vcmp.ge.s32.totalorder %v5749_v1, %v5400_v37  ;;  %vm1160_vm15 = vcmp.lt.s32.totalorder %v5749_v1, %v5403_v41  ;;  %vm1207_vm2 = vmand %vm1110_vm14, %vm1159_vm7 }
 0x4da   :  { %4468 = vmatmul.mubr.msk.f32.gmra.mrb[44].mxu0 %vm1310_vm8, %v3856_v6  ;;  %v3872_v6 = vsel %vm1203_vm4, 1.0, %v7340_v2  ;;  %vm1208_vm4 = vmand %vm1111_vm9, %vm1160_vm15 }
 0x4db   :  { %4470 = vmatprep.mubr.msk.f32.mxu0 %vm1310_vm8, %v3857_v7  ;;  %v3873_v7 = vsel %vm1204_vm6, 1.0, %v7340_v2 }
 0x4de   :  { %4471 = vmatmul.mubr.msk.f32.gmra.mrb[46].mxu0 %vm1310_vm8, %v3858_v13  ;;  %v5759_v13 = vadd.s32 344, %v4962_v9 }
 0x4df   :  { %4473 = vmatprep.mubr.msk.f32.mxu0 %vm1310_vm8, %v3859_v16  ;;  %v5767_v16 = vadd.s32 352, %v4962_v9 }
 0x4e0   :  { %7378 = vst [vmem:[#allocation7_spill] sm:$0xff] %v5759_v13  ;;  %vm1112_vm6 = vcmp.ge.s32.totalorder %v5759_v13, %v5400_v37  ;;  %vm1161_vm13 = vcmp.lt.s32.totalorder %v5759_v13, %v5403_v41 }
 0x4e1   :  { %7379 = vst [vmem:[#allocation8_spill] sm:$0xff] %v5767_v16  ;;  %vm1113_vm1 = vcmp.ge.s32.totalorder %v5767_v16, %v5400_v37  ;;  %vm1162_vm5 = vcmp.lt.s32.totalorder %v5767_v16, %v5403_v41  ;;  %vm1209_vm10 = vmand %vm1112_vm6, %vm1161_vm13 }
 0x4e2   :  { %4474 = vmatmul.mubr.msk.f32.gmra.mrb[48].mxu0 %vm1310_vm8, %v3860_v27  ;;  %v3874_v27 = vsel %vm1205_vm11, 1.0, %v7340_v2  ;;  %vm1210_vm11 = vmand %vm1113_vm1, %vm1162_vm5 }
 0x4e3   :  { %4476 = vmatprep.mubr.msk.f32.mxu0 %vm1310_vm8, %v3861_v28  ;;  %v3875_v28 = vsel %vm1206_vm3, 1.0, %v7340_v2 }
 0x4e6   :  { %4477 = vmatmul.mubr.msk.f32.gmra.mrb[50].mxu0 %vm1310_vm8, %v3862_v20  ;;  %v5777_v20 = vadd.s32 360, %v4962_v9 }
 0x4e7   :  { %4479 = vmatprep.mubr.msk.f32.mxu0 %vm1310_vm8, %v3863_v24  ;;  %v5785_v24 = vadd.s32 368, %v4962_v9 }
 0x4e8   :  { %7380 = vst [vmem:[#allocation9_spill] sm:$0xff] %v5777_v20  ;;  %vm1114_vm3 = vcmp.ge.s32.totalorder %v5777_v20, %v5400_v37  ;;  %vm1163_vm14 = vcmp.lt.s32.totalorder %v5777_v20, %v5403_v41 }
 0x4e9   :  { %7381 = vst [vmem:[#allocation10_spill] sm:$0xff] %v5785_v24  ;;  %vm1115_vm7 = vcmp.ge.s32.totalorder %v5785_v24, %v5400_v37  ;;  %vm1164_vm9 = vcmp.lt.s32.totalorder %v5785_v24, %v5403_v41  ;;  %vm1211_vm15 = vmand %vm1114_vm3, %vm1163_vm14 }
 0x4ea   :  { %4480 = vmatmul.mubr.msk.f32.gmra.mrb[52].mxu0 %vm1310_vm8, %v3864_v32  ;;  %v3876_v32 = vsel %vm1207_vm2, 1.0, %v7340_v2  ;;  %vm1212_vm2 = vmand %vm1115_vm7, %vm1164_vm9 }
 0x4eb   :  { %4482 = vmatprep.mubr.msk.f32.mxu0 %vm1310_vm8, %v3865_v33  ;;  %v3877_v33 = vsel %vm1208_vm4, 1.0, %v7340_v2 }
 0x4ee   :  { %4483 = vmatmul.mubr.msk.f32.gmra.mrb[54].mxu0 %vm1310_vm8, %v3866_v40  ;;  %v5795_v40 = vadd.s32 376, %v4962_v9 }
 0x4ef   :  { %4485 = vmatprep.mubr.msk.f32.mxu0 %vm1310_vm8, %v3867_v4  ;;  %v3878_v4 = vsel %vm1209_vm10, 1.0, %v7340_v2 }
 0x4f0   :  { %7382 = vst [vmem:[#allocation11_spill] sm:$0xff] %v5795_v40  ;;  %vm1116_vm4 = vcmp.ge.s32.totalorder %v5795_v40, %v5400_v37  ;;  %vm1165_vm6 = vcmp.lt.s32.totalorder %v5795_v40, %v5403_v41 }
 0x4f1   :  { %vm1213_vm13 = vmand %vm1116_vm4, %vm1165_vm6 }
 0x4f2   :  { %4486 = vmatmul.mubr.msk.f32.gmra.mrb[56].mxu0 %vm1310_vm8, %v3868_v53  ;;  %v3879_v53 = vsel %vm1210_vm11, 1.0, %v7340_v2  ;;  %v3882_v37 = vsel %vm1213_vm13, 1.0, %v7340_v2 }
 0x4f3   :  { %4488 = vmatprep.mubr.msk.f32.mxu0 %vm1310_vm8, %v3869_v54  ;;  %v3880_v54 = vsel %vm1211_vm15, 1.0, %v7340_v2 }
 0x4f6   :  { %4489 = vmatmul.mubr.msk.f32.gmra.mrb[58].mxu0 %vm1310_vm8, %v3870_v61  ;;  %v3881_v61 = vsel %vm1212_vm2, 1.0, %v7340_v2 }
 0x4f7   :  { %4491 = vmatprep.mubr.msk.f32.mxu0 %vm1310_vm8, %v3871_v62  ;;  %v4884_v62 = vmov 1.0  }
 0x4f8   :  { %4513 = vmatprep.subr.msk.mxu1 %vm5427_vm12, %v4884_v62 }
 0x4f9   :  { %4514 = vmatpush3.msk.msra.mxu1 %vm5427_vm12, %v4884_v62 }
 0x4fa   :  { %4492 = vmatmul.mubr.msk.f32.gmra.mrb[60].mxu0 %vm1310_vm8, %v3872_v6  ;;  %v5822_v41 = vmul.u32.u64.low 2863311531, %v4964_v10  ;;  %v5823_v6 = vmul.u32.u64.high 2863311531, %v4964_v10, %v5822_v41 }
 0x4fb   :  { %4494 = vmatprep.mubr.msk.f32.mxu0 %vm1310_vm8, %v3873_v7 }
 0x4fc   :  { %v2534_v62 = vshrl.u32 %v5823_v6, 3  ;;  %v5856_v6 = vmul.u32.u64.low 2863311531, %v5033_v26  ;;  %v5857_v16 = vmul.u32.u64.high 2863311531, %v5033_v26, %v5856_v6 }
 0x4fe   :  { %4495 = vmatmul.mubr.msk.f32.gmra.mrb[62].mxu0 %vm1310_vm8, %v3874_v27  ;;  %v5826_v7 = vmul.u32.u64.low 2863311531, %v4970_v12  ;;  %v5827_v27 = vmul.u32.u64.high 2863311531, %v4970_v12, %v5826_v7 }
 0x4ff   :  { %4497 = vmatprep.mubr.msk.f32.mxu0 %vm1310_vm8, %v3875_v28  ;;  %v5830_v28 = vmul.u32.u64.low 2863311531, %v4962_v9  ;;  %v5831_v29 = vmul.u32.u64.high 2863311531, %v4962_v9, %v5830_v28 }
 0x500   :  { %v2535_v28 = vmul.u32 12, %v2534_v62 }
 0x501   :  { %v1766_v41 = vshrl.u32 %v5831_v29, 3 }
 0x502   :  { %4498 = vmatmul.mubr.msk.f32.gmra.mrb[64].mxu0 %vm1310_vm8, %v3876_v32 }
 0x503   :  { %4500 = vmatprep.mubr.msk.f32.mxu0 %vm1310_vm8, %v3877_v33  ;;  %v5834_v32 = vmul.u32.u64.low 2863311531, %v4979_v15  ;;  %v5835_v33 = vmul.u32.u64.high 2863311531, %v4979_v15, %v5834_v32  ;;  %v1767_v40 = vmul.u32 12, %v1766_v41 }
 0x505   :  { %v1799_v7 = vshrl.u32 %v5835_v33, 3  ;;  %v5861_v33 = vmul.u32.u64.low 2863311531, %v5030_v25  ;;  %v5862_v62 = vmul.u32.u64.high 2863311531, %v5030_v25, %v5861_v33  ;;  %v1768_v41 = vsub.s32 %v4962_v9, %v1767_v40 }
 0x506   :  { %4501 = vmatmul.mubr.msk.f32.gmra.mrb[66].mxu0 %vm1310_vm8, %v3878_v4 }
 0x507   :  { %4503 = vmatprep.mubr.msk.f32.mxu0 %vm1310_vm8, %v3879_v53  ;;  %v5838_v4 = vmul.u32.u64.low 2863311531, %v4976_v14  ;;  %v5839_v53 = vmul.u32.u64.high 2863311531, %v4976_v14, %v5838_v4  ;;  %vm2288_vm10 = vcmp.ne.s32.totalorder %v1768_v41, 0  ;;  %vm2336_vm11 = vcmp.lt.s32.totalorder %v1768_v41, 0 }
 0x508   :  { %v5852_v4 = vmul.u32.u64.low 2863311531, %v5010_v21  ;;  %v5853_v20 = vmul.u32.u64.high 2863311531, %v5010_v21, %v5852_v4  ;;  %vm5889_vm2 = vmand %vm2336_vm11, %vm2288_vm10 }
 0x509   :  { %v1788_v2 = vshrl.u32 %v5839_v53, 3  ;;  %v5871_v4 = vmul.u32.u64.low 2863311531, %v5107_v44  ;;  %v5872_v13 = vmul.u32.u64.high 2863311531, %v5107_v44, %v5871_v4 }
 0x50a   :  { %4504 = vmatmul.mubr.msk.f32.gmra.mrb[68].mxu0 %vm1310_vm8, %v3880_v54  ;;  %v1810_v9 = vshrl.u32 %v5853_v20, 3 }
 0x50b   :  { %4506 = vmatprep.mubr.msk.f32.mxu0 %vm1310_vm8, %v3881_v61  ;;  %v5842_v54 = vmul.u32.u64.low 2863311531, %v5013_v22  ;;  %v5843_v61 = vmul.u32.u64.high 2863311531, %v5013_v22, %v5842_v54  ;;  %v1789_v29 = vmul.u32 12, %v1788_v2 }
 0x50c   :  { %v1800_v54 = vmul.u32 12, %v1799_v7 }
 0x50d   :  { %v1821_v24 = vshrl.u32 %v5843_v61, 3  ;;  %v1790_v2 = vsub.s32 %v4976_v14, %v1789_v29 }
 0x50e   :  { %4507 = vmatmul.mubr.msk.f32.gmra.mrb[70].mxu0 %vm1310_vm8, %v3882_v37  ;;  %v1777_v37 = vshrl.u32 %v5827_v27, 3  ;;  %v2536_v27 = vsub.s32 %v4964_v10, %v2535_v28  ;;  %v1801_v10 = vsub.s32 %v4979_v15, %v1800_v54  ;;  %v1843_v15 = vshrl.u32 %v5857_v16, 3 }
 0x50f   :  { %v1822_v7 = vmul.u32 12, %v1821_v24  ;;  %vm2290_vm15 = vcmp.ne.s32.totalorder %v1790_v2, 0  ;;  %vm2338_vm4 = vcmp.lt.s32.totalorder %v1790_v2, 0 }
 0x510   :  { %v1778_v32 = vmul.u32 12, %v1777_v37  ;;  %v5866_v61 = vmul.u32.u64.low 2863311531, %v5110_v45  ;;  %v5867_v37 = vmul.u32.u64.high 2863311531, %v5110_v45, %v5866_v61  ;;  %vm2539_vm8 = vcmp.ne.s32.totalorder %v2536_v27, 0 }
 0x511   :  { %vm2540_vm12 = vcmp.lt.s32.totalorder %v2536_v27, 0  ;;  %v2542_v28 = vadd.s32 12, %v2536_v27  ;;  %vm2291_vm14 = vcmp.ne.s32.totalorder %v1801_v10, 0  ;;  %vm2339_vm7 = vcmp.lt.s32.totalorder %v1801_v10, 0 }
 0x512   :  { %v1779_v53 = vsub.s32 %v4970_v12, %v1778_v32  ;;  %v1823_v12 = vsub.s32 %v5013_v22, %v1822_v7  ;;  %vm5878_vm3 = vmand %vm2540_vm12, %vm2539_vm8  ;;  %v2432_v32 = vadd.s32 12, %v1768_v41  ;;  %v2435_v54 = vadd.s32 12, %v1801_v10 }
 0x513   :  { %v1832_v22 = vshrl.u32 %v5862_v62, 3  ;;  %v1865_v6 = vshrl.u32 %v5867_v37, 3  ;;  %v5895_v29 = vmul.u32.u64.low 2863311531, %v5123_v47  ;;  %v5896_v16 = vmul.u32.u64.high 2863311531, %v5123_v47, %v5895_v29  ;;  %vm5898_vm6 = vmand %vm2339_vm7, %vm2291_vm14 }
 0x514   :  { %vm2289_vm1 = vcmp.ne.s32.totalorder %v1779_v53, 0  ;;  %vm2337_vm5 = vcmp.lt.s32.totalorder %v1779_v53, 0  ;;  %v2433_v40 = vadd.s32 12, %v1779_v53  ;;  %vm2293_vm13 = vcmp.ne.s32.totalorder %v1823_v12, 0  ;;  %vm5910_vm12 = vmand %vm2338_vm4, %vm2290_vm15 }
 0x515   :  { %vm5883_vm9 = vmand %vm2337_vm5, %vm2289_vm1  ;;  %vm2341_vm8 = vcmp.lt.s32.totalorder %v1823_v12, 0  ;;  %v1811_v61 = vmul.u32 12, %v1810_v9  ;;  %v1854_v62 = vshrl.u32 %v5872_v13, 3  ;;  %v2434_v7 = vadd.s32 12, %v1790_v2 }
 0x516   :  { %v1844_v4 = vmul.u32 12, %v1843_v15  ;;  %v5905_v1 = vsel %vm5878_vm3, %v2542_v28, %v2536_v27  ;;  %v2481_v37 = vsel %vm5883_vm9, %v2433_v40, %v1779_v53  ;;  %v2437_v58 = vadd.s32 12, %v1823_v12  ;;  %vm5918_vm1 = vmand %vm2341_vm8, %vm2293_vm13 }
 0x517   :  { %v1833_v42 = vmul.u32 12, %v1832_v22  ;;  %v2480_v9 = vsel %vm5889_vm2, %v2432_v32, %v1768_v41  ;;  %v2483_v13 = vsel %vm5898_vm6, %v2435_v54, %v1801_v10  ;;  %v1866_v27 = vmul.u32 12, %v1865_v6 }
 0x518   :  { %v1812_v53 = vsub.s32 %v5010_v21, %v1811_v61  ;;  %v1855_v28 = vmul.u32 12, %v1854_v62  ;;  %v5924_v40 = vmul.u32.u64.low 2863311531, %v5120_v46  ;;  %v5925_v15 = vmul.u32.u64.high 2863311531, %v5120_v46, %v5924_v40 }
 0x519   :  { %vm5928_vm5 = vcmp.eq.s32.totalorder %v2481_v37, %v5905_v1  ;;  %v2482_v41 = vsel %vm5910_vm12, %v2434_v7, %v1790_v2  ;;  %v5935_v10 = vsub.s32 %v5033_v26, %v1844_v4  ;;  %vm5942_vm10 = vcmp.eq.s32.totalorder %v2480_v9, %v5905_v1 }
 0x51a   :  { %v5938_v32 = vmul.u32.u64.low 2863311531, %v5489_v38  ;;  %v5939_v54 = vmul.u32.u64.high 2863311531, %v5489_v38, %v5938_v32  ;;  %vm5947_vm11 = vcmp.eq.s32.totalorder %v2483_v13, %v5905_v1  ;;  %v2485_v2 = vsel %vm5918_vm1, %v2437_v58, %v1823_v12 }
 0x51b   :  { %v5954_v26 = vsub.s32 %v5030_v25, %v1833_v42  ;;  %v5957_v20 = vsub.s32 %v5110_v45, %v1866_v27  ;;  %v1887_v6 = vshrl.u32 %v5896_v16, 3  ;;  %vm5965_vm3 = vcmp.eq.s32.totalorder %v2482_v41, %v5905_v1 }
 0x51c   :  { %v5961_v33 = vmul.u32.u64.low 2863311531, %v5479_v34  ;;  %v5962_v61 = vmul.u32.u64.high 2863311531, %v5479_v34, %v5961_v33  ;;  %vm2292_vm14 = vcmp.ne.s32.totalorder %v1812_v53, 0  ;;  %vm2340_vm7 = vcmp.lt.s32.totalorder %v1812_v53, 0 }
 0x51d   :  { %v5970_v58 = vsub.s32 %v5107_v44, %v1855_v28  ;;  %vm5973_vm9 = vcmp.eq.s32.totalorder %v2485_v2, %v5905_v1  ;;  %v2436_v45 = vadd.s32 12, %v1812_v53  ;;  %vm2295_vm15 = vcmp.ne.s32.totalorder %v5935_v10, 0  ;;  %vm5988_vm12 = vmand %vm2340_vm7, %vm2292_vm14 }
 0x51e   :  { %vm2343_vm2 = vcmp.lt.s32.totalorder %v5935_v10, 0  ;;  %v2439_v42 = vadd.s32 12, %v5935_v10  ;;  %vm2294_vm4 = vcmp.ne.s32.totalorder %v5954_v26, 0  ;;  %vm2342_vm6 = vcmp.lt.s32.totalorder %v5954_v26, 0 }
 0x51f   :  { %v2438_v12 = vadd.s32 12, %v5954_v26  ;;  %vm2297_vm13 = vcmp.ne.s32.totalorder %v5957_v20, 0  ;;  %vm2345_vm8 = vcmp.lt.s32.totalorder %v5957_v20, 0  ;;  %v2441_v44 = vadd.s32 12, %v5957_v20  ;;  %vm6002_vm0 = vmand %vm2343_vm2, %vm2295_vm15 }
 0x520   :  { %v1888_v16 = vmul.u32 12, %v1887_v6  ;;  %vm2296_vm1 = vcmp.ne.s32.totalorder %v5970_v58, 0  ;;  %v1876_v4 = vshrl.u32 %v5925_v15, 3  ;;  %vm2344_vm14 = vcmp.lt.s32.totalorder %v5970_v58, 0  ;;  %vm6016_vm7 = vmand %vm2342_vm6, %vm2294_vm4 }
 0x521   :  { %v5995_v37 = vmul.u32.u64.low 2863311531, %v5507_v43  ;;  %v5996_v29 = vmul.u32.u64.high 2863311531, %v5507_v43, %v5995_v37  ;;  %v1909_v13 = vshrl.u32 %v5939_v54, 3  ;;  %v2484_v54 = vsel %vm5988_vm12, %v2436_v45, %v1812_v53  ;;  %vm6034_vm15 = vmand %vm2345_vm8, %vm2297_vm13 }
 0x522   :  { %v6009_v24 = vmul.u32.u64.low 2863311531, %v5497_v39  ;;  %v6010_v27 = vmul.u32.u64.high 2863311531, %v5497_v39, %v6009_v24  ;;  %v6021_v40 = vmul.u32.u64.low 2863311531, %v5525_v51  ;;  %v6022_v15 = vmul.u32.u64.high 2863311531, %v5525_v51, %v6021_v40  ;;  %vm6055_vm2 = vmand %vm2344_vm14, %vm2296_vm1 }
 0x523   :  { %v6025_v41 = vmul.u32.u64.low 2863311531, %v5515_v48  ;;  %v6026_v32 = vmul.u32.u64.high 2863311531, %v5515_v48, %v6025_v41  ;;  %v2440_v6 = vadd.s32 12, %v5970_v58  ;;  %v6040_v33 = vsub.s32 %v5123_v47, %v1888_v16 }
 0x524   :  { %v1898_v37 = vshrl.u32 %v5962_v61, 3  ;;  %v7413_v24 = vmov 0.0   ;;  %v1877_v47 = vmul.u32 12, %v1876_v4  ;;  %v1910_v16 = vmul.u32 12, %v1909_v13 }
 0x525   :  { %v6046_v7 = vsel %vm5928_vm5, 1.0, %v7413_v24  ;;  %v6051_v53 = vsel %vm5942_vm10, 1.0, %v7413_v24  ;;  %v6062_v61 = vsel %vm5947_vm11, 1.0, %v7413_v24  ;;  %v6067_v14 = vsel %vm5965_vm3, 1.0, %v7413_v24 }
 0x526   :  { %v6072_v21 = vsel %vm5973_vm9, 1.0, %v7413_v24  ;;  %vm6075_vm5 = vcmp.eq.s32.totalorder %v2484_v54, %v5905_v1  ;;  %v2487_v22 = vsel %vm6002_vm0, %v2439_v42, %v5935_v10  ;;  %v2486_v62 = vsel %vm6016_vm7, %v2438_v12, %v5954_v26 }
 0x527   :  { %v2489_v25 = vsel %vm6034_vm15, %v2441_v44, %v5957_v20  ;;  %v2488_v4 = vsel %vm6055_vm2, %v2440_v6, %v5970_v58  ;;  %vm2299_vm10 = vcmp.ne.s32.totalorder %v6040_v33, 0  ;;  %vm2347_vm11 = vcmp.lt.s32.totalorder %v6040_v33, 0 }
 0x528   :  { %v1899_v13 = vmul.u32 12, %v1898_v37  ;;  %v6094_v9 = vsub.s32 %v5120_v46, %v1877_v47  ;;  %v1931_v10 = vshrl.u32 %v5996_v29, 3  ;;  %v6102_v20 = vsub.s32 %v5489_v38, %v1910_v16  ;;  %vm6148_vm6 = vmand %vm2347_vm11, %vm2299_vm10 }
 0x529   :  { %v6098_v26 = vmul.u32.u64.low 2863311531, %v5543_v55  ;;  %v6099_v42 = vmul.u32.u64.high 2863311531, %v5543_v55, %v6098_v26  ;;  %v1920_v12 = vshrl.u32 %v6010_v27, 3  ;;  %v1953_v28 = vshrl.u32 %v6022_v15, 3 }
 0x52a   :  { %v6106_v58 = vmul.u32.u64.low 2863311531, %v5533_v52  ;;  %v6107_v44 = vmul.u32.u64.high 2863311531, %v5533_v52, %v6106_v58  ;;  %v1942_v46 = vshrl.u32 %v6026_v32, 3  ;;  %v6118_v54 = vsel %vm6075_vm5, 1.0, %v7413_v24 }
 0x52b   :  { %v6112_v41 = vmul.u32.u64.low 2863311531, %v5561_v59  ;;  %v6113_v29 = vmul.u32.u64.high 2863311531, %v5561_v59, %v6112_v41  ;;  %vm6121_vm0 = vcmp.eq.s32.totalorder %v2487_v22, %v5905_v1  ;;  %vm6126_vm3 = vcmp.eq.s32.totalorder %v2486_v62, %v5905_v1 }
 0x52c   :  { %v6131_v15 = vsub.s32 %v5479_v34, %v1899_v13  ;;  %vm6134_vm9 = vcmp.eq.s32.totalorder %v2489_v25, %v5905_v1  ;;  %vm6139_vm4 = vcmp.eq.s32.totalorder %v2488_v4, %v5905_v1  ;;  %v2443_v6 = vadd.s32 12, %v6040_v33 }
 0x52d   :  { %v1932_v37 = vmul.u32 12, %v1931_v10  ;;  %vm2298_vm13 = vcmp.ne.s32.totalorder %v6094_v9, 0  ;;  %vm2346_vm8 = vcmp.lt.s32.totalorder %v6094_v9, 0  ;;  %v2442_v45 = vadd.s32 12, %v6094_v9 }
 0x52e   :  { %v1921_v47 = vmul.u32 12, %v1920_v12  ;;  %vm2301_vm12 = vcmp.ne.s32.totalorder %v6102_v20, 0  ;;  %vm2349_vm1 = vcmp.lt.s32.totalorder %v6102_v20, 0  ;;  %v1954_v16 = vmul.u32 12, %v1953_v28  ;;  %vm6166_vm15 = vmand %vm2346_vm8, %vm2298_vm13 }
 0x52f   :  { %v1943_v40 = vmul.u32 12, %v1942_v46  ;;  %vm2300_vm14 = vcmp.ne.s32.totalorder %v6131_v15, 0  ;;  %vm2348_vm7 = vcmp.lt.s32.totalorder %v6131_v15, 0  ;;  %v2491_v25 = vsel %vm6148_vm6, %v2443_v6, %v6040_v33  ;;  %vm6180_vm2 = vmand %vm2349_vm1, %vm2301_vm12 }
 0x530   :  { %v6160_v22 = vmul.u32.u64.low 2863311531, %v5551_v56  ;;  %v6161_v62 = vmul.u32.u64.high 2863311531, %v5551_v56, %v6160_v22  ;;  %v2445_v13 = vadd.s32 12, %v6102_v20  ;;  %v6172_v10 = vsub.s32 %v5507_v43, %v1932_v37  ;;  %vm6194_vm5 = vmand %vm2348_vm7, %vm2300_vm14 }
 0x531   :  { %v1975_v26 = vshrl.u32 %v6099_v42, 3  ;;  %v6178_v12 = vsel %vm6121_vm0, 1.0, %v7413_v24  ;;  %v2444_v33 = vadd.s32 12, %v6131_v15  ;;  %v6186_v28 = vsub.s32 %v5497_v39, %v1921_v47 }
 0x532   :  { %v1964_v46 = vshrl.u32 %v6107_v44, 3  ;;  %v6192_v43 = vsel %vm6126_vm3, 1.0, %v7413_v24  ;;  %v6199_v41 = vsub.s32 %v5525_v51, %v1954_v16  ;;  %v6202_v38 = vsub.s32 %v5515_v48, %v1943_v40 }
 0x533   :  { %v1997_v39 = vshrl.u32 %v6113_v29, 3  ;;  %v6208_v44 = vsel %vm6134_vm9, 1.0, %v7413_v24  ;;  %v6213_v27 = vsel %vm6139_vm4, 1.0, %v7413_v24  ;;  %vm6216_vm10 = vcmp.eq.s32.totalorder %v2491_v25, %v5905_v1 }
 0x534   :  { %v2490_v48 = vsel %vm6166_vm15, %v2442_v45, %v6094_v9  ;;  %v2493_v51 = vsel %vm6180_vm2, %v2445_v13, %v6102_v20  ;;  %vm2303_vm11 = vcmp.ne.s32.totalorder %v6172_v10, 0  ;;  %vm2351_vm0 = vcmp.lt.s32.totalorder %v6172_v10, 0 }
 0x535   :  { %v1976_v29 = vmul.u32 12, %v1975_v26  ;;  %v2492_v32 = vsel %vm6194_vm5, %v2444_v33, %v6131_v15  ;;  %vm2302_vm3 = vcmp.ne.s32.totalorder %v6186_v28, 0  ;;  %vm2350_vm9 = vcmp.lt.s32.totalorder %v6186_v28, 0  ;;  %vm6236_vm8 = vmand %vm2351_vm0, %vm2303_vm11 }
 0x536   :  { %v1965_v2 = vmul.u32 12, %v1964_v46  ;;  %vm2305_vm4 = vcmp.ne.s32.totalorder %v6199_v41, 0  ;;  %vm2353_vm6 = vcmp.lt.s32.totalorder %v6199_v41, 0  ;;  %vm2304_vm13 = vcmp.ne.s32.totalorder %v6202_v38, 0  ;;  %vm6247_vm1 = vmand %vm2350_vm9, %vm2302_vm3 }
 0x537   :  { %v1998_v9 = vmul.u32 12, %v1997_v39  ;;  %vm2352_vm12 = vcmp.lt.s32.totalorder %v6202_v38, 0  ;;  %v1986_v15 = vshrl.u32 %v6161_v62, 3  ;;  %v2447_v45 = vadd.s32 12, %v6172_v10  ;;  %vm6256_vm14 = vmand %vm2353_vm6, %vm2305_vm4 }
 0x538   :  { %v6243_v37 = vmul.u32.u64.low 2863311531, %v5579_v63  ;;  %v6244_v34 = vmul.u32.u64.high 2863311531, %v5579_v63, %v6243_v37  ;;  %v2446_v16 = vadd.s32 12, %v6186_v28  ;;  %v2449_v40 = vadd.s32 12, %v6199_v41  ;;  %vm6275_vm7 = vmand %vm2352_vm12, %vm2304_vm13 }
 0x539   :  { %v6254_v22 = vsub.s32 %v5543_v55, %v1976_v29  ;;  %v2448_v62 = vadd.s32 12, %v6202_v38  ;;  %v6262_v4 = vsub.s32 %v5533_v52, %v1965_v2  ;;  %v6271_v58 = vsel %vm6216_vm10, 1.0, %v7413_v24 }
 0x53a   :  { %v6265_v13 = vmul.u32.u64.low 2863311531, %v5569_v60  ;;  %v6266_v26 = vmul.u32.u64.high 2863311531, %v5569_v60, %v6265_v13  ;;  %v6280_v33 = vsub.s32 %v5561_v59, %v1998_v9  ;;  %vm6287_vm15 = vcmp.eq.s32.totalorder %v2490_v48, %v5905_v1 }
 0x53b   :  { %v6283_v52 = vmul.u32.u64.low 2863311531, %v5597_v3  ;;  %v6284_v46 = vmul.u32.u64.high 2863311531, %v5597_v3, %v6283_v52  ;;  %vm6292_vm2 = vcmp.eq.s32.totalorder %v2493_v51, %v5905_v1  ;;  %vm6297_vm5 = vcmp.eq.s32.totalorder %v2492_v32, %v5905_v1 }
 0x53c   :  { %v1987_v59 = vmul.u32 12, %v1986_v15  ;;  %v2495_v29 = vsel %vm6236_vm8, %v2447_v45, %v6172_v10  ;;  %v2494_v48 = vsel %vm6247_vm1, %v2446_v16, %v6186_v28  ;;  %vm2307_vm10 = vcmp.ne.s32.totalorder %v6254_v22, 0 }
 0x53d   :  { %vm2355_vm11 = vcmp.lt.s32.totalorder %v6254_v22, 0  ;;  %v2497_v51 = vsel %vm6256_vm14, %v2449_v40, %v6199_v41  ;;  %v2496_v32 = vsel %vm6275_vm7, %v2448_v62, %v6202_v38  ;;  %vm2306_vm0 = vcmp.ne.s32.totalorder %v6262_v4, 0 }
 0x53e   :  { %vm2354_vm3 = vcmp.lt.s32.totalorder %v6262_v4, 0  ;;  %vm2309_vm9 = vcmp.ne.s32.totalorder %v6280_v33, 0  ;;  %vm2357_vm4 = vcmp.lt.s32.totalorder %v6280_v33, 0  ;;  %vm6323_vm6 = vmand %vm2355_vm11, %vm2307_vm10  ;;  %v6328_v41 = vsub.s32 %v5551_v56, %v1987_v59 }
 0x53f   :  { %v6320_v10 = vmul.u32.u64.low 2863311531, %v5587_v0  ;;  %v6321_v28 = vmul.u32.u64.high 2863311531, %v5587_v0, %v6320_v10  ;;  %v2019_v38 = vshrl.u32 %v6244_v34, 3  ;;  %v6338_v15 = vsel %vm6287_vm15, 1.0, %v7413_v24  ;;  %vm6341_vm13 = vmand %vm2354_vm3, %vm2306_vm0 }
 0x540   :  { %v6332_v9 = vmul.u32.u64.low 2863311531, %v5615_v8  ;;  %v6333_v20 = vmul.u32.u64.high 2863311531, %v5615_v8, %v6332_v9  ;;  %v2451_v37 = vadd.s32 12, %v6254_v22  ;;  %v2450_v56 = vadd.s32 12, %v6262_v4  ;;  %vm6366_vm12 = vmand %vm2357_vm4, %vm2309_vm9 }
 0x541   :  { %v2453_v47 = vadd.s32 12, %v6280_v33  ;;  %v6350_v16 = vsel %vm6292_vm2, 1.0, %v7413_v24  ;;  %v6355_v40 = vsel %vm6297_vm5, 1.0, %v7413_v24  ;;  %vm6358_vm8 = vcmp.eq.s32.totalorder %v2495_v29, %v5905_v1 }
 0x542   :  { %v2008_v13 = vshrl.u32 %v6266_v26, 3  ;;  %vm6372_vm1 = vcmp.eq.s32.totalorder %v2494_v48, %v5905_v1  ;;  %vm6377_vm14 = vcmp.eq.s32.totalorder %v2497_v51, %v5905_v1  ;;  %vm6382_vm7 = vcmp.eq.s32.totalorder %v2496_v32, %v5905_v1 }
 0x543   :  { %v2041_v6 = vshrl.u32 %v6284_v46, 3  ;;  %vm2308_vm15 = vcmp.ne.s32.totalorder %v6328_v41, 0  ;;  %vm2356_vm2 = vcmp.lt.s32.totalorder %v6328_v41, 0  ;;  %v2020_v59 = vmul.u32 12, %v2019_v38 }
 0x544   :  { %v2499_v48 = vsel %vm6323_vm6, %v2451_v37, %v6254_v22  ;;  %v2498_v51 = vsel %vm6341_vm13, %v2450_v56, %v6262_v4  ;;  %v2501_v46 = vsel %vm6366_vm12, %v2453_v47, %v6280_v33  ;;  %vm7464_vm5 = vcmask 195584   ;;  %vm6409_vm11 = vmand %vm2356_vm2, %vm2308_vm15 }
 0x545   :  { %v2452_v32 = vadd.s32 12, %v6328_v41  ;;  %v2009_v10 = vmul.u32 12, %v2008_v13  ;;  %vm7465_vm10 = vmmov %vm7464_vm5  ;;  %v2042_v4 = vmul.u32 12, %v2041_v6  ;;  %v2030_v33 = vshrl.u32 %v6321_v28, 3 }
 0x546   :  { %v6415_v9 = vmul.u32.u64.low 2863311531, %v5633_v17  ;;  %v6416_v37 = vmul.u32.u64.high 2863311531, %v5633_v17, %v6415_v9  ;;  %vm6420_vm0 = vcmp.eq.s32.totalorder %v2499_v48, %v5905_v1  ;;  %v6425_v47 = vsub.s32 %v5579_v63, %v2020_v59  ;;  %vm7470_vm3 = vmmov %vm7464_vm5 }
 0x547   :  { %v6432_v28 = vsel %vm6358_vm8, 1.0, %v7413_v24  ;;  %v6442_v13 = vsel %vm6377_vm14, 1.0, %v7413_v24  ;;  %vm6446_vm9 = vcmp.eq.s32.totalorder %v2498_v51, %v5905_v1  ;;  %vm6451_vm4 = vcmp.eq.s32.totalorder %v2501_v46, %v5905_v1  ;;  %vm7475_vm6 = vmmov %vm7470_vm3 }
 0x548   :  { %v2500_v25 = vsel %vm6409_vm11, %v2452_v32, %v6328_v41  ;;  %v6465_v42 = vsel %vm6382_vm7, 1.0, %v7413_v24  ;;  %v6470_v6 = vsel %vm6420_vm0, 1.0, %v7413_v24  ;;  %v2031_v41 = vmul.u32 12, %v2030_v33 }
 0x549   :  { %vm2311_vm13 = vcmp.ne.s32.totalorder %v6425_v47, 0  ;;  %vm2359_vm8 = vcmp.lt.s32.totalorder %v6425_v47, 0  ;;  %vm6490_vm12 = vcmp.eq.s32.totalorder %v2500_v25, %v5905_v1 }
 0x54a   :  { %vm6502_vm2 = vmand %vm2359_vm8, %vm2311_vm13 }
 0x585   :  { %v4439_v34 = vpop.f32.mrb[24].mxu0 }
 0x586   :  { %v1521_v55 = vpop.f32.mrb[25].mxu0  ;;  %v2689_v29 = vmul.f32 %v4439_v34, %v6046_v7  ;;  %v6403_v7 = vmul.u32.u64.low 2863311531, %v5605_v5  ;;  %v6404_v38 = vmul.u32.u64.high 2863311531, %v5605_v5, %v6403_v7  ;;  %v2063_v34 = vshrl.u32 %v6333_v20, 3 }
 0x587   :  { %v2688_v26 = vmul.f32 %v6051_v53, %v1521_v55  ;;  %v6459_v55 = vsub.s32 %v5569_v60, %v2009_v10  ;;  %v6511_v10 = vsub.s32 %v5587_v0, %v2031_v41  ;;  %v2085_v7 = vshrl.u32 %v6416_v37, 3 }
 0x588   :  { %v2064_v59 = vmul.u32 12, %v2063_v34  ;;  %v2052_v51 = vshrl.u32 %v6404_v38, 3  ;;  %v6541_v37 = vmul.u32.u64.low 2863311531, %v5641_v23  ;;  %v6542_v56 = vmul.u32.u64.high 2863311531, %v5641_v23, %v6541_v37 }
 0x589   :  { %v4442_v53 = vpop.f32.mrb[26].mxu0  ;;  %4515 = vmatprep.mubr.msk.f32.mxu1 %vm7464_vm5, %v2688_v26  ;;  %v6473_v26 = vsub.s32 %v5597_v3, %v2042_v4  ;;  %v6487_v3 = vsel %vm6451_vm4, 1.0, %v7413_v24  ;;  %vm2310_vm14 = vcmp.ne.s32.totalorder %v6459_v55, 0  ;;  %vm2358_vm7 = vcmp.lt.s32.totalorder %v6459_v55, 0 }
 0x58a   :  { %v1531_v2 = vpop.f32.mrb[27].mxu0  ;;  %4516 = vmatmul.mubr.msk.f32.vlgmr.msra.gmra.mrb[16].mxu1 %vm7465_vm10, %v2689_v29  ;;  %v2691_v62 = vmul.f32 %v4442_v53, %v6062_v61  ;;  %v6482_v29 = vsel %vm6446_vm9, 1.0, %v7413_v24  ;;  %v6507_v32 = vadd.s32 12, %v6459_v55  ;;  %vm6536_vm0 = vmand %vm2358_vm7, %vm2310_vm14  ;;  %vm2312_vm9 = vcmp.ne.s32.totalorder %v6511_v10, 0 }
 0x58b   :  { %v2690_v45 = vmul.f32 %v6067_v14, %v1531_v2  ;;  %v6437_v14 = vsel %vm6372_vm1, 1.0, %v7413_v24  ;;  %vm7478_vm1 = vmmov %vm7470_vm3  ;;  %vm2313_vm5 = vcmp.ne.s32.totalorder %v6473_v26, 0  ;;  %v6516_v2 = vsub.s32 %v5615_v8, %v2064_v59 }
 0x58c   :  { %vm7479_vm15 = vmmov %vm7478_vm1  ;;  %v6519_v22 = vmul.u32.u64.low 2863311531, %v5623_v11  ;;  %v6520_v4 = vmul.u32.u64.high 2863311531, %v5623_v11, %v6519_v22  ;;  %vm2361_vm10 = vcmp.lt.s32.totalorder %v6473_v26, 0  ;;  %vm2360_vm4 = vcmp.lt.s32.totalorder %v6511_v10, 0 }
 0x58d   :  { %v4445_v63 = vpop.f32.mrb[28].mxu0  ;;  %4518 = vmatprep.mubr.msk.f32.mxu1 %vm7470_vm3, %v2690_v45  ;;  %v6525_v9 = vmul.u32.u64.low 2863311531, %v5651_v18  ;;  %v6526_v45 = vmul.u32.u64.high 2863311531, %v5651_v18, %v6525_v9  ;;  %vm7482_vm11 = vmmov %vm7478_vm1  ;;  %v6552_v61 = vsel %vm6490_vm12, 1.0, %v7413_v24  ;;  %vm2315_vm13 = vcmp.ne.s32.totalorder %v6516_v2, 0 }
 0x58e   :  { %v1541_v52 = vpop.f32.mrb[29].mxu0  ;;  %4519 = vmatmul.mubr.msk.f32.gmra.mrb[18].mxu1 %vm7475_vm6, %v2691_v62  ;;  %v2693_v39 = vmul.f32 %v4445_v63, %v6072_v21  ;;  %v2455_v21 = vadd.s32 12, %v6425_v47  ;;  %vm7485_vm3 = vmmov %vm7478_vm1  ;;  %v2457_v62 = vadd.s32 12, %v6473_v26  ;;  %vm2363_vm8 = vcmp.lt.s32.totalorder %v6516_v2, 0 }
 0x58f   :  { %v2692_v60 = vmul.f32 %v6118_v54, %v1541_v52  ;;  %vm6558_vm6 = vmand %vm2361_vm10, %vm2313_vm5  ;;  %v2502_v52 = vsel %vm6536_vm0, %v6507_v32, %v6459_v55  ;;  %v2456_v41 = vadd.s32 12, %v6511_v10  ;;  %v2459_v59 = vadd.s32 12, %v6516_v2 }
 0x590   :  { %v2503_v8 = vsel %vm6502_vm2, %v2455_v21, %v6425_v47  ;;  %v2086_v47 = vmul.u32 12, %v2085_v7  ;;  %vm7490_vm12 = vmmov %vm7485_vm3  ;;  %v6589_v55 = vmul.u32.u64.low 2863311531, %v5669_v30  ;;  %v6590_v54 = vmul.u32.u64.high 2863311531, %v5669_v30, %v6589_v55 }
 0x591   :  { %v4448_v48 = vpop.f32.mrb[30].mxu0  ;;  %4521 = vmatprep.mubr.msk.f32.mxu1 %vm7478_vm1, %v2692_v60  ;;  %vm6566_vm1 = vcmp.eq.s32.totalorder %v2503_v8, %v5905_v1  ;;  %vm6580_vm14 = vmand %vm2360_vm4, %vm2312_vm9  ;;  %v2505_v21 = vsel %vm6558_vm6, %v2457_v62, %v6473_v26  ;;  %v2074_v7 = vshrl.u32 %v6520_v4, 3  ;;  %v2107_v9 = vshrl.u32 %v6526_v45, 3 }
 0x592   :  { %v1551_v46 = vpop.f32.mrb[31].mxu0  ;;  %4522 = vmatmul.mubr.msk.f32.gmra.mrb[20].mxu1 %vm7479_vm15, %v2693_v39  ;;  %v2695_v33 = vmul.f32 %v4448_v48, %v6178_v12  ;;  %v2053_v12 = vmul.u32 12, %v2052_v51  ;;  %vm7493_vm7 = vmmov %vm7485_vm3  ;;  %vm6636_vm0 = vcmp.eq.s32.totalorder %v2502_v52, %v5905_v1  ;;  %v2129_v20 = vshrl.u32 %v6590_v54, 3 }
 0x593   :  { %v2694_v38 = vmul.f32 %v6192_v43, %v1551_v46  ;;  %vm6600_vm15 = vmand %vm2363_vm8, %vm2315_vm13  ;;  %v6608_v46 = vmul.u32.u64.low 2863311531, %v5659_v19  ;;  %v6609_v53 = vmul.u32.u64.high 2863311531, %v5659_v19, %v6608_v46  ;;  %v2108_v62 = vmul.u32 12, %v2107_v9 }
 0x594   :  { %v6586_v39 = vsub.s32 %v5605_v5, %v2053_v12  ;;  %v6605_v5 = vsub.s32 %v5633_v17, %v2086_v47  ;;  %v2504_v17 = vsel %vm6580_vm14, %v2456_v41, %v6511_v10  ;;  %vm7496_vm2 = vmmov %vm7485_vm3  ;;  %v2507_v4 = vsel %vm6600_vm15, %v2459_v59, %v6516_v2 }
 0x595   :  { %v4451_v0 = vpop.f32.mrb[32].mxu0  ;;  %4524 = vmatprep.mubr.msk.f32.mxu1 %vm7482_vm11, %v2694_v38  ;;  %v6614_v26 = vmul.u32.u64.low 2863311531, %v5687_v35  ;;  %v6615_v38 = vmul.u32.u64.high 2863311531, %v5687_v35, %v6614_v26  ;;  %vm7497_vm11 = vmmov %vm7496_vm2  ;;  %vm6649_vm6 = vcmp.eq.s32.totalorder %v2504_v17, %v5905_v1  ;;  %v2075_v12 = vmul.u32 12, %v2074_v7 }
 0x596   :  { %v1561_v34 = vpop.f32.mrb[33].mxu0  ;;  %4525 = vmatmul.mubr.msk.f32.gmra.mrb[22].mxu1 %vm7485_vm3, %v2695_v33  ;;  %v2697_v25 = vmul.f32 %v4451_v0, %v6208_v44  ;;  %v6621_v33 = vsel %vm6566_vm1, 1.0, %v7413_v24  ;;  %vm2314_vm5 = vcmp.ne.s32.totalorder %v6586_v39, 0  ;;  %vm2362_vm10 = vcmp.lt.s32.totalorder %v6586_v39, 0  ;;  %vm7508_vm1 = vmmov %vm7496_vm2 }
 0x597   :  { %v2696_v63 = vmul.f32 %v6213_v27, %v1561_v34  ;;  %vm6641_vm3 = vcmp.eq.s32.totalorder %v2505_v21, %v5905_v1  ;;  %vm2317_vm9 = vcmp.ne.s32.totalorder %v6605_v5, 0  ;;  %vm2365_vm4 = vcmp.lt.s32.totalorder %v6605_v5, 0  ;;  %vm6664_vm8 = vmand %vm2362_vm10, %vm2314_vm5 }
 0x598   :  { %v2458_v43 = vadd.s32 12, %v6586_v39  ;;  %vm6656_vm13 = vcmp.eq.s32.totalorder %v2507_v4, %v5905_v1  ;;  %v2461_v34 = vadd.s32 12, %v6605_v5  ;;  %vm7511_vm14 = vmmov %vm7508_vm1  ;;  %v6685_v41 = vsel %vm6636_vm0, 1.0, %v7413_v24 }
 0x599   :  { %v4454_v60 = vpop.f32.mrb[34].mxu0  ;;  %4527 = vmatprep.mubr.msk.f32.mxu1 %vm7490_vm12, %v2696_v63  ;;  %vm6672_vm12 = vmand %vm2365_vm4, %vm2317_vm9  ;;  %v6695_v44 = vsel %vm6649_vm6, 1.0, %v7413_v24  ;;  %v2118_v59 = vshrl.u32 %v6609_v53, 3  ;;  %v2151_v21 = vshrl.u32 %v6615_v38, 3  ;;  %v6710_v46 = vsel %vm6656_vm13, 1.0, %v7413_v24 }
 0x59a   :  { %v1571_v48 = vpop.f32.mrb[35].mxu0  ;;  %4528 = vmatmul.mubr.msk.f32.gmra.mrb[24].mxu1 %vm7493_vm7, %v2697_v25  ;;  %v2699_v22 = vmul.f32 %v4454_v60, %v6271_v58  ;;  %v2096_v58 = vshrl.u32 %v6542_v56, 3  ;;  %v6678_v25 = vmul.u32.u64.low 2863311531, %v5677_v31  ;;  %v6679_v27 = vmul.u32.u64.high 2863311531, %v5677_v31, %v6678_v25  ;;  %vm7512_vm7 = vmmov %vm7508_vm1 }
 0x59b   :  { %v2698_v32 = vmul.f32 %v6338_v15, %v1571_v48  ;;  %v6690_v60 = vsel %vm6641_vm3, 1.0, %v7413_v24  ;;  %v2506_v54 = vsel %vm6664_vm8, %v2458_v43, %v6586_v39  ;;  %v6703_v48 = vsub.s32 %v5623_v11, %v2075_v12  ;;  %vm7513_vm15 = vmmov %vm7508_vm1 }
 0x59c   :  { %v2097_v63 = vmul.u32 12, %v2096_v58  ;;  %v6716_v53 = vsub.s32 %v5651_v18, %v2108_v62  ;;  %v2119_v18 = vmul.u32 12, %v2118_v59  ;;  %vm7518_vm3 = vmmov %vm7508_vm1 }
 0x59d   :  { %v4457_v15 = vpop.f32.mrb[36].mxu0  ;;  %4530 = vmatprep.mubr.msk.f32.mxu1 %vm7496_vm2, %v2698_v32  ;;  %v2130_v32 = vmul.u32 12, %v2129_v20  ;;  %vm6728_vm2 = vcmp.eq.s32.totalorder %v2506_v54, %v5905_v1  ;;  %vm2316_vm10 = vcmp.ne.s32.totalorder %v6703_v48, 0  ;;  %v2152_v9 = vmul.u32 12, %v2151_v21  ;;  %vm7519_vm6 = vmmov %vm7508_vm1 }
 0x59e   :  { %v1581_v0 = vpop.f32.mrb[37].mxu0  ;;  %4531 = vmatmul.mubr.msk.f32.gmra.mrb[26].mxu1 %vm7497_vm11, %v2699_v22  ;;  %v2701_v37 = vmul.f32 %v4457_v15, %v6350_v16  ;;  %v6720_v11 = vsub.s32 %v5641_v23, %v2097_v63  ;;  %v6733_v38 = vmul.u32.u64.low 2863311531, %v5695_v36  ;;  %v6734_v22 = vmul.u32.u64.high 2863311531, %v5695_v36, %v6733_v38 }
 0x59f   :  { %v2700_v2 = vmul.f32 %v6355_v40, %v1581_v0  ;;  %vm2364_vm11 = vcmp.lt.s32.totalorder %v6703_v48, 0  ;;  %v6746_v4 = vadd.s32 12, %v6703_v48  ;;  %vm2319_vm0 = vcmp.ne.s32.totalorder %v6716_v53, 0  ;;  %v7537_v38 = vld [vmem:[#allocation4_spill] sm:$0xff] }
 0x5a0   :  { %vm2367_vm9 = vcmp.lt.s32.totalorder %v6716_v53, 0  ;;  %vm2318_vm4 = vcmp.ne.s32.totalorder %v6720_v11, 0  ;;  %v2140_v0 = vshrl.u32 %v6679_v27, 3  ;;  %vm2366_vm13 = vcmp.lt.s32.totalorder %v6720_v11, 0  ;;  %vm6770_vm8 = vmand %vm2364_vm11, %vm2316_vm10 }
 0x5a1   :  { %v4460_v47 = vpop.f32.mrb[38].mxu0  ;;  %4533 = vmatprep.mubr.msk.f32.mxu1 %vm7508_vm1, %v2700_v2  ;;  %v6759_v10 = vsub.s32 %v5659_v19, %v2119_v18  ;;  %v6762_v45 = vmul.u32.u64.low 2863311531, %v5723_v57  ;;  %v6763_v2 = vmul.u32.u64.high 2863311531, %v5723_v57, %v6762_v45  ;;  %v6775_v43 = vsub.s32 %v5687_v35, %v2152_v9  ;;  %vm6791_vm1 = vmand %vm2367_vm9, %vm2319_vm0 }
 0x5a2   :  { %v1591_v52 = vpop.f32.mrb[39].mxu0  ;;  %4534 = vmatmul.mubr.msk.f32.gmra.mrb[28].mxu1 %vm7511_vm14, %v2701_v37  ;;  %v2703_v51 = vmul.f32 %v4460_v47, %v6432_v28  ;;  %v6723_v28 = vmul.u32.u64.low 2863311531, %v5705_v49  ;;  %v6724_v7 = vmul.u32.u64.high 2863311531, %v5705_v49, %v6723_v28  ;;  %v2463_v35 = vadd.s32 12, %v6716_v53  ;;  %vm6802_vm14 = vmand %vm2366_vm13, %vm2318_vm4 }
 0x5a3   :  { %v2702_v55 = vmul.f32 %v6437_v14, %v1591_v52  ;;  %v2509_v14 = vsel %vm6672_vm12, %v2461_v34, %v6605_v5  ;;  %v6778_v19 = vmul.u32.u64.low 2863311531, %v5713_v50  ;;  %v6779_v12 = vmul.u32.u64.high 2863311531, %v5713_v50, %v6778_v19  ;;  %vm7524_vm12 = vmmov %vm7518_vm3 }
 0x5a4   :  { %vm6738_vm5 = vcmp.eq.s32.totalorder %v2509_v14, %v5905_v1  ;;  %v2462_v40 = vadd.s32 12, %v6720_v11  ;;  %v2141_v62 = vmul.u32 12, %v2140_v0  ;;  %v2173_v47 = vshrl.u32 %v6724_v7, 3  ;;  %v7536_v7 = vld [vmem:[#allocation5_spill] sm:$0xff] }
 0x5a5   :  { %v4463_v39 = vpop.f32.mrb[40].mxu0  ;;  %4536 = vmatprep.mubr.msk.f32.mxu1 %vm7512_vm7, %v2702_v55  ;;  %v6813_v63 = vsel %vm6738_vm5, 1.0, %v7413_v24  ;;  %vm2320_vm10 = vcmp.ne.s32.totalorder %v6759_v10, 0  ;;  %vm2368_vm11 = vcmp.lt.s32.totalorder %v6759_v10, 0  ;;  %v2162_v20 = vshrl.u32 %v6734_v22, 3 }
 0x5a6   :  { %v1601_v26 = vpop.f32.mrb[41].mxu0  ;;  %4537 = vmatmul.mubr.msk.f32.gmra.mrb[30].mxu1 %vm7513_vm15, %v2703_v51  ;;  %v2705_v15 = vmul.f32 %v4463_v39, %v6442_v13  ;;  %v2508_v27 = vsel %vm6770_vm8, %v6746_v4, %v6703_v48  ;;  %vm2323_vm0 = vcmp.ne.s32.totalorder %v6775_v43, 0  ;;  %v2511_v59 = vsel %vm6791_vm1, %v2463_v35, %v6716_v53  ;;  %vm6846_vm4 = vmand %vm2368_vm11, %vm2320_vm10 }
 0x5a7   :  { %v2704_v23 = vmul.f32 %v6465_v42, %v1601_v26  ;;  %v6753_v42 = vsub.s32 %v5669_v30, %v2130_v32  ;;  %v2510_v55 = vsel %vm6802_vm14, %v2462_v40, %v6720_v11  ;;  %v2464_v21 = vadd.s32 12, %v6759_v10  ;;  %v7546_v30 = vld [vmem:[#allocation6_spill] sm:$0xff]  ;;  %v7552_v40 = vld [vmem:[#allocation7_spill] sm:$0xff] }
 0x5a8   :  { %v2467_v51 = vadd.s32 12, %v6775_v43  ;;  %v6853_v14 = vsub.s32 %v5677_v31, %v2141_v62  ;;  %v2174_v53 = vmul.u32 12, %v2173_v47  ;;  %v2163_v32 = vmul.u32 12, %v2162_v20 }
 0x5a9   :  { %v4466_v58 = vpop.f32.mrb[42].mxu0  ;;  %4539 = vmatprep.mubr.msk.f32.mxu1 %vm7518_vm3, %v2704_v23  ;;  %vm2321_vm7 = vcmp.ne.s32.totalorder %v6753_v42, 0  ;;  %vm2369_vm15 = vcmp.lt.s32.totalorder %v6753_v42, 0  ;;  %v2465_v54 = vadd.s32 12, %v6753_v42  ;;  %v2195_v28 = vshrl.u32 %v6763_v2, 3 }
 0x5aa   :  { %v1611_v13 = vpop.f32.mrb[43].mxu0  ;;  %4540 = vmatmul.mubr.msk.f32.gmra.mrb[32].mxu1 %vm7519_vm6, %v2705_v15  ;;  %v2707_v37 = vmul.f32 %v4466_v58, %v6470_v6  ;;  %vm6836_vm5 = vmand %vm2369_vm15, %vm2321_vm7  ;;  %v6866_v26 = vmul.u32.u64.low 2863311531, %v7536_v7  ;;  %v6867_v5 = vmul.u32.u64.high 2863311531, %v7536_v7, %v6866_v26  ;;  %v2184_v18 = vshrl.u32 %v6779_v12, 3  ;;  %v7570_v15 = vld [vmem:[#allocation11_spill] sm:$0xff] }
 0x5ab   :  { %v2706_v8 = vmul.f32 %v6482_v29, %v1611_v13  ;;  %v6785_v29 = vsel %vm6728_vm2, 1.0, %v7413_v24  ;;  %vm7527_vm2 = vmmov %vm7518_vm3  ;;  %vm2371_vm3 = vcmp.lt.s32.totalorder %v6775_v43, 0  ;;  %vm6877_vm8 = vcmp.eq.s32.totalorder %v2508_v27, %v5905_v1 }
 0x5ac   :  { %vm7530_vm9 = vmmov %vm7527_vm2  ;;  %v6872_v22 = vmul.u32.u64.low 2863311531, %v7537_v38  ;;  %v6873_v23 = vmul.u32.u64.high 2863311531, %v7537_v38, %v6872_v22  ;;  %vm6882_vm1 = vcmp.eq.s32.totalorder %v2511_v59, %v5905_v1  ;;  %v2512_v58 = vsel %vm6846_vm4, %v2464_v21, %v6759_v10 }
 0x5ad   :  { %v4469_v34 = vpop.f32.mrb[44].mxu0  ;;  %4542 = vmatprep.mubr.msk.f32.mxu1 %vm7524_vm12, %v2706_v8  ;;  %vm7533_vm6 = vmmov %vm7527_vm2  ;;  %vm6887_vm12 = vcmp.eq.s32.totalorder %v2510_v55, %v5905_v1  ;;  %vm2322_vm7 = vcmp.ne.s32.totalorder %v6853_v14, 0  ;;  %v6905_v45 = vsub.s32 %v5705_v49, %v2174_v53  ;;  %v2196_v2 = vmul.u32 12, %v2195_v28 }
 0x5ae   :  { %v1621_v16 = vpop.f32.mrb[45].mxu0  ;;  %4543 = vmatmul.mubr.msk.f32.gmra.mrb[34].mxu1 %vm7527_vm2, %v2707_v37  ;;  %v2709_v52 = vmul.f32 %v4469_v34, %v6487_v3  ;;  %vm6860_vm13 = vmand %vm2371_vm3, %vm2323_vm0  ;;  %v2185_v8 = vmul.u32 12, %v2184_v18  ;;  %v3959_v37 = vsel %vm6877_vm8, 1.0, %v7413_v24  ;;  %v6922_v49 = vsel %vm6882_vm1, 1.0, %v7413_v24  ;;  %v7560_v3 = vld [vmem:[#allocation9_spill] sm:$0xff] }
 0x5af   :  { %v2708_v25 = vmul.f32 %v6552_v61, %v1621_v16  ;;  %vm7544_vm14 = vmmov %vm7527_vm2  ;;  %v2515_v0 = vsel %vm6860_vm13, %v2467_v51, %v6775_v43  ;;  %v6912_v19 = vmul.u32.u64.low 2863311531, %v7546_v30  ;;  %v6913_v43 = vmul.u32.u64.high 2863311531, %v7546_v30, %v6912_v19  ;;  %v7558_v61 = vld [vmem:[#allocation8_spill] sm:$0xff] }
 0x5b0   :  { %vm7545_vm15 = vmmov %vm7527_vm2  ;;  %vm2370_vm2 = vcmp.lt.s32.totalorder %v6853_v14, 0  ;;  %vm6934_vm0 = vcmp.eq.s32.totalorder %v2512_v58, %v5905_v1  ;;  %v2466_v35 = vadd.s32 12, %v6853_v14  ;;  %vm2325_vm4 = vcmp.ne.s32.totalorder %v6905_v45, 0 }
 0x5b1   :  { %v4472_v48 = vpop.f32.mrb[46].mxu0  ;;  %4545 = vmatprep.mubr.msk.f32.mxu1 %vm7530_vm9, %v2708_v25  ;;  %vm7547_vm10 = vmmov %vm7533_vm6  ;;  %v6940_v34 = vmul.u32.u64.low 2863311531, %v7552_v40  ;;  %v6941_v6 = vmul.u32.u64.high 2863311531, %v7552_v40, %v6940_v34  ;;  %v6960_v20 = vsub.s32 %v5723_v57, %v2196_v2  ;;  %v2217_v25 = vshrl.u32 %v6867_v5, 3 }
 0x5b2   :  { %v1631_v39 = vpop.f32.mrb[47].mxu0  ;;  %4546 = vmatmul.mubr.msk.f32.gmra.mrb[36].mxu1 %vm7533_vm6, %v2709_v52  ;;  %v2711_v17 = vmul.f32 %v4472_v48, %v6621_v33  ;;  %v2513_v33 = vsel %vm6836_vm5, %v2465_v54, %v6753_v42  ;;  %v6908_v42 = vsub.s32 %v5695_v36, %v2163_v32  ;;  %v3961_v36 = vsel %vm6887_vm12, 1.0, %v7413_v24  ;;  %vm7553_vm3 = vmmov %vm7533_vm6 }
 0x5b3   :  { %v2710_v31 = vmul.f32 %v6685_v41, %v1631_v39  ;;  %vm6929_vm11 = vcmp.eq.s32.totalorder %v2513_v33, %v5905_v1  ;;  %vm6945_vm5 = vcmp.eq.s32.totalorder %v2515_v0, %v5905_v1  ;;  %vm6953_vm9 = vmand %vm2370_vm2, %vm2322_vm7  ;;  %vm2373_vm6 = vcmp.lt.s32.totalorder %v6905_v45, 0 }
 0x5b4   :  { %vm2324_vm13 = vcmp.ne.s32.totalorder %v6908_v42, 0  ;;  %v6966_v52 = vsub.s32 %v5713_v50, %v2185_v8  ;;  %v2206_v59 = vshrl.u32 %v6873_v23, 3  ;;  %vm2372_vm8 = vcmp.lt.s32.totalorder %v6908_v42, 0  ;;  %vm7559_vm1 = vmmov %vm7553_vm3 }
 0x5b5   :  { %v4475_v4 = vpop.f32.mrb[48].mxu0  ;;  %4548 = vmatprep.mubr.msk.f32.mxu1 %vm7544_vm14, %v2710_v31  ;;  %v6972_v54 = vmul.u32.u64.low 2863311531, %v7558_v61  ;;  %v6973_v48 = vmul.u32.u64.high 2863311531, %v7558_v61, %v6972_v54  ;;  %v2469_v50 = vadd.s32 12, %v6905_v45  ;;  %vm7561_vm12 = vmmov %vm7559_vm1  ;;  %v2468_v39 = vadd.s32 12, %v6908_v42  ;;  %v7566_v31 = vld [vmem:[#allocation10_spill] sm:$0xff] }
 0x5b6   :  { %v1641_v13 = vpop.f32.mrb[49].mxu0  ;;  %4549 = vmatmul.mubr.msk.f32.gmra.mrb[38].mxu1 %vm7545_vm15, %v2711_v17  ;;  %v2713_v12 = vmul.f32 %v4475_v4, %v6690_v60  ;;  %v6981_v21 = vmul.u32.u64.low 2863311531, %v7560_v3  ;;  %v6982_v51 = vmul.u32.u64.high 2863311531, %v7560_v3, %v6981_v21  ;;  %vm6989_vm14 = vmand %vm2373_vm6, %vm2325_vm4  ;;  %vm2327_vm7 = vcmp.ne.s32.totalorder %v6960_v20, 0 }
 0x5b7   :  { %v2712_v10 = vmul.f32 %v6695_v44, %v1641_v13  ;;  %vm2375_vm15 = vcmp.lt.s32.totalorder %v6960_v20, 0  ;;  %vm7000_vm2 = vmand %vm2372_vm8, %vm2324_vm13  ;;  %v2207_v28 = vmul.u32 12, %v2206_v59  ;;  %v2228_v26 = vshrl.u32 %v6913_v43, 3 }
 0x5b8   :  { %v7009_v18 = vmul.u32.u64.low 2863311531, %v7566_v31  ;;  %v7010_v22 = vmul.u32.u64.high 2863311531, %v7566_v31, %v7009_v18  ;;  %v2239_v9 = vshrl.u32 %v6941_v6, 3  ;;  %vm7571_vm6 = vmmov %vm7559_vm1  ;;  %v2517_v33 = vsel %vm6989_vm14, %v2469_v50, %v6905_v45 }
 0x5b9   :  { %v4478_v44 = vpop.f32.mrb[50].mxu0  ;;  %4551 = vmatprep.mubr.msk.f32.mxu1 %vm7547_vm10, %v2712_v10  ;;  %vm2326_vm10 = vcmp.ne.s32.totalorder %v6966_v52, 0  ;;  %v7020_v41 = vmul.u32.u64.low 2863311531, %v7570_v15  ;;  %v7021_v4 = vmul.u32.u64.high 2863311531, %v7570_v15, %v7020_v41  ;;  %v2516_v58 = vsel %vm7000_vm2, %v2468_v39, %v6908_v42  ;;  %vm7034_vm13 = vmand %vm2375_vm15, %vm2327_vm7 }
 0x5ba   :  { %v1651_v62 = vpop.f32.mrb[51].mxu0  ;;  %4552 = vmatmul.mubr.msk.f32.gmra.mrb[40].mxu1 %vm7553_vm3, %v2713_v12  ;;  %v2715_v55 = vmul.f32 %v4478_v44, %v6710_v46  ;;  %vm2374_vm3 = vcmp.lt.s32.totalorder %v6966_v52, 0  ;;  %v2471_v13 = vadd.s32 12, %v6960_v20  ;;  %v2470_v2 = vadd.s32 12, %v6966_v52  ;;  %vm7581_vm15 = vmmov %vm7559_vm1 }
 0x5bb   :  { %v2714_v27 = vmul.f32 %v6785_v29, %v1651_v62  ;;  %v2514_v29 = vsel %vm6953_vm9, %v2466_v35, %v6853_v14  ;;  %v2218_v14 = vmul.u32 12, %v2217_v25  ;;  %vm7567_vm9 = vmmov %vm7559_vm1  ;;  %v7052_v8 = vsub.s32 %v7537_v38, %v2207_v28 }
 0x5bc   :  { %vm7014_vm4 = vcmp.eq.s32.totalorder %v2514_v29, %v5905_v1  ;;  %vm7044_vm8 = vmand %vm2374_vm3, %vm2326_vm10  ;;  %v2229_v19 = vmul.u32 12, %v2228_v26  ;;  %v3964_v12 = vsel %vm6929_vm11, 1.0, %v7413_v24  ;;  %v2261_v56 = vshrl.u32 %v6982_v51, 3 }
 0x5bd   :  { %v4481_v57 = vpop.f32.mrb[52].mxu0  ;;  %4554 = vmatprep.mubr.msk.f32.mxu1 %vm7559_vm1, %v2714_v27  ;;  %v7049_v42 = vsub.s32 %v7536_v7, %v2218_v14  ;;  %v3966_v7 = vsel %vm6945_vm5, 1.0, %v7413_v24  ;;  %v3965_v38 = vsel %vm7014_vm4, 1.0, %v7413_v24  ;;  %vm7576_vm11 = vmmov %vm7559_vm1  ;;  %v2519_v6 = vsel %vm7034_vm13, %v2471_v13, %v6960_v20 }
 0x5be   :  { %v1661_v46 = vpop.f32.mrb[53].mxu0  ;;  %4555 = vmatmul.mubr.msk.f32.gmra.mrb[42].mxu1 %vm7561_vm12, %v2715_v55  ;;  %v2717_v5 = vmul.f32 %v4481_v57, %v6813_v63  ;;  %vm7077_vm12 = vcmp.eq.s32.totalorder %v2516_v58, %v5905_v1  ;;  %v2518_v62 = vsel %vm7044_vm8, %v2470_v2, %v6966_v52  ;;  %vm2328_vm14 = vcmp.ne.s32.totalorder %v7052_v8, 0  ;;  %vm7582_vm10 = vmmov %vm7559_vm1 }
 0x5bf   :  { %v2716_v11 = vmul.f32 %v3959_v37, %v1661_v46  ;;  %v3963_v37 = vsel %vm6934_vm0, 1.0, %v7413_v24  ;;  %vm7072_vm0 = vcmp.eq.s32.totalorder %v2517_v33, %v5905_v1  ;;  %vm2329_vm5 = vcmp.ne.s32.totalorder %v7049_v42, 0 }
 0x5c0   :  { %v7090_v16 = vsub.s32 %v7546_v30, %v2229_v19  ;;  %vm2376_vm7 = vcmp.lt.s32.totalorder %v7052_v8, 0  ;;  %v2272_v59 = vshrl.u32 %v7010_v22, 3  ;;  %vm2377_vm2 = vcmp.lt.s32.totalorder %v7049_v42, 0 }
 0x5c1   :  { %v4484_v23 = vpop.f32.mrb[54].mxu0  ;;  %4557 = vmatprep.mubr.msk.f32.mxu1 %vm7567_vm9, %v2716_v11  ;;  %v2262_v52 = vmul.u32 12, %v2261_v56  ;;  %v2283_v54 = vshrl.u32 %v7021_v4, 3  ;;  %v3968_v30 = vsel %vm7072_vm0, 1.0, %v7413_v24  ;;  %v3967_v57 = vsel %vm7077_vm12, 1.0, %v7413_v24  ;;  %vm7123_vm4 = vmand %vm2376_vm7, %vm2328_vm14 }
 0x5c2   :  { %v1671_v63 = vpop.f32.mrb[55].mxu0  ;;  %4558 = vmatmul.mubr.msk.f32.gmra.mrb[44].mxu1 %vm7571_vm6, %v2717_v5  ;;  %v2719_v43 = vmul.f32 %v4484_v23, %v6922_v49  ;;  %v2240_v49 = vmul.u32 12, %v2239_v9  ;;  %vm7108_vm3 = vcmp.eq.s32.totalorder %v2519_v6, %v5905_v1  ;;  %vm7114_vm9 = vcmp.eq.s32.totalorder %v2518_v62, %v5905_v1  ;;  %vm7132_vm13 = vmand %vm2377_vm2, %vm2329_vm5 }
 0x5c3   :  { %v2718_v10 = vmul.f32 %v3961_v36, %v1671_v63  ;;  %v2250_v36 = vshrl.u32 %v6973_v48, 3  ;;  %v2473_v51 = vadd.s32 12, %v7049_v42  ;;  %vm2330_vm6 = vcmp.ne.s32.totalorder %v7090_v16, 0  ;;  %vm7591_vm12 = vmmov %vm7559_vm1 }
 0x5c4   :  { %v7097_v20 = vsub.s32 %v7552_v40, %v2240_v49  ;;  %v2472_v40 = vadd.s32 12, %v7052_v8  ;;  %vm2378_vm8 = vcmp.lt.s32.totalorder %v7090_v16, 0  ;;  %v2273_v11 = vmul.u32 12, %v2272_v59  ;;  %vm7596_vm2 = vmmov %vm7559_vm1 }
 0x5c5   :  { %v4487_v44 = vpop.f32.mrb[56].mxu0  ;;  %4560 = vmatprep.mubr.msk.f32.mxu1 %vm7559_vm1, %v2718_v10  ;;  %v2251_v27 = vmul.u32 12, %v2250_v36  ;;  %v2263_v28 = vsub.s32 %v7560_v3, %v2262_v52  ;;  %v2284_v26 = vmul.u32 12, %v2283_v54  ;;  %v3970_v18 = vsel %vm7108_vm3, 1.0, %v7413_v24  ;;  %vm7163_vm5 = vmand %vm2378_vm8, %vm2330_vm6 }
 0x5c6   :  { %v1681_v35 = vpop.f32.mrb[57].mxu0  ;;  %4561 = vmatmul.mubr.msk.f32.gmra.mrb[46].mxu1 %vm7576_vm11, %v2719_v43  ;;  %v2721_v25 = vmul.f32 %v4487_v44, %v3964_v12  ;;  %vm2331_vm11 = vcmp.ne.s32.totalorder %v7097_v20, 0  ;;  %vm2379_vm0 = vcmp.lt.s32.totalorder %v7097_v20, 0  ;;  %v2474_v22 = vadd.s32 12, %v7090_v16 }
 0x5c7   :  { %v2720_v47 = vmul.f32 %v3963_v37, %v1681_v35  ;;  %v7138_v14 = vsub.s32 %v7558_v61, %v2251_v27  ;;  %v2520_v61 = vsel %vm7123_vm4, %v2472_v40, %v7052_v8  ;;  %v3969_v17 = vsel %vm7114_vm9, 1.0, %v7413_v24  ;;  %vm7169_vm14 = vmand %vm2379_vm0, %vm2331_vm11 }
 0x5c8   :  { %v2521_v3 = vsel %vm7132_vm13, %v2473_v51, %v7049_v42  ;;  %v2475_v9 = vadd.s32 12, %v7097_v20  ;;  %v2274_v33 = vsub.s32 %v7566_v31, %v2273_v11  ;;  %vm2333_vm3 = vcmp.ne.s32.totalorder %v2263_v28, 0  ;;  %vm7597_vm4 = vmmov %vm7559_vm1 }
 0x5c9   :  { %v4490_v55 = vpop.f32.mrb[58].mxu0  ;;  %4563 = vmatprep.mubr.msk.f32.mxu1 %vm7581_vm15, %v2720_v47  ;;  %vm2332_vm7 = vcmp.ne.s32.totalorder %v7138_v14, 0  ;;  %vm2380_vm15 = vcmp.lt.s32.totalorder %v7138_v14, 0  ;;  %vm2381_vm9 = vcmp.lt.s32.totalorder %v2263_v28, 0  ;;  %v2285_v0 = vsub.s32 %v7570_v15, %v2284_v26  ;;  %vm7602_vm0 = vmmov %vm7596_vm2 }
 0x5ca   :  { %v1691_v48 = vpop.f32.mrb[59].mxu0  ;;  %4564 = vmatmul.mubr.msk.f32.gmra.mrb[48].mxu1 %vm7582_vm10, %v2721_v25  ;;  %v2723_v53 = vmul.f32 %v4490_v55, %v3966_v7  ;;  %vm2584_vm10 = vcmp.eq.s32.totalorder %v2520_v61, %v5905_v1  ;;  %vm2585_vm6 = vcmp.eq.s32.totalorder %v2521_v3, %v5905_v1  ;;  %v2522_v2 = vsel %vm7163_vm5, %v2474_v22, %v7090_v16  ;;  %vm7192_vm13 = vmand %vm2380_vm15, %vm2332_vm7 }
 0x5cb   :  { %v2722_v50 = vmul.f32 %v3965_v38, %v1691_v48  ;;  %v2476_v31 = vadd.s32 12, %v7138_v14  ;;  %v2523_v45 = vsel %vm7169_vm14, %v2475_v9, %v7097_v20  ;;  %v2477_v42 = vadd.s32 12, %v2263_v28  ;;  %vm7197_vm8 = vmand %vm2381_vm9, %vm2333_vm3 }
 0x5cc   :  { %v3971_v19 = vsel %vm2584_vm10, 1.0, %v7413_v24  ;;  %vm2382_vm11 = vcmp.lt.s32.totalorder %v2274_v33, 0  ;;  %v3972_v37 = vsel %vm2585_vm6, 1.0, %v7413_v24  ;;  %vm2335_vm5 = vcmp.ne.s32.totalorder %v2285_v0, 0  ;;  %vm7603_vm7 = vmmov %vm7602_vm0 }
 0x5cd   :  { %v4493_v32 = vpop.f32.mrb[60].mxu0  ;;  %4566 = vmatprep.mubr.msk.f32.mxu1 %vm7559_vm1, %v2722_v50  ;;  %vm2334_vm1 = vcmp.ne.s32.totalorder %v2274_v33, 0  ;;  %vm2383_vm14 = vcmp.lt.s32.totalorder %v2285_v0, 0  ;;  %vm2587_vm15 = vcmp.eq.s32.totalorder %v2523_v45, %v5905_v1  ;;  %v2524_v44 = vsel %vm7192_vm13, %v2476_v31, %v7138_v14  ;;  %vm7608_vm3 = vmmov %vm7602_vm0 }
 0x5ce   :  { %v1701_v5 = vpop.f32.mrb[61].mxu0  ;;  %4567 = vmatmul.mubr.msk.f32.gmra.mrb[50].mxu1 %vm7591_vm12, %v2723_v53  ;;  %v2725_v4 = vmul.f32 %v4493_v32, %v3968_v30  ;;  %vm2586_vm12 = vcmp.eq.s32.totalorder %v2522_v2, %v5905_v1  ;;  %v2478_v7 = vadd.s32 12, %v2274_v33  ;;  %v2525_v49 = vsel %vm7197_vm8, %v2477_v42, %v2263_v28  ;;  %vm7218_vm10 = vmand %vm2383_vm14, %vm2335_vm5  ;;  %v4858_v53 = vld [vmem:[%s7337_s5 + $0x8] ss:$12 sps:$4 sm:$0xff]  }
 0x5cf   :  { %v2724_v23 = vmul.f32 %v3967_v57, %v1701_v5  ;;  %v2479_v56 = vadd.s32 12, %v2285_v0  ;;  %v3973_v34 = vsel %vm2586_vm12, 1.0, %v7413_v24  ;;  %v3974_v47 = vsel %vm2587_vm15, 1.0, %v7413_v24  ;;  %vm7610_vm13 = vmmov %vm7602_vm0 }
 0x5d0   :  { %vm2588_vm9 = vcmp.eq.s32.totalorder %v2524_v44, %v5905_v1  ;;  %vm2589_vm6 = vcmp.eq.s32.totalorder %v2525_v49, %v5905_v1  ;;  %vm7612_vm12 = vmmov %vm7602_vm0  ;;  %vm3730_vm15 = vcmask 15360  }
 0x5d1   :  { %v4496_v58 = vpop.f32.mrb[62].mxu0  ;;  %4569 = vmatprep.mubr.msk.f32.mxu1 %vm7596_vm2, %v2724_v23  ;;  %vm7213_vm2 = vmand %vm2382_vm11, %vm2334_vm1  ;;  %v2527_v59 = vsel %vm7218_vm10, %v2479_v56, %v2285_v0  ;;  %v3975_v20 = vsel %vm2588_vm9, 1.0, %v7413_v24  ;;  %v3976_v54 = vsel %vm2589_vm6, 1.0, %v7413_v24 }
 0x5d2   :  { %v1711_v13 = vpop.f32.mrb[63].mxu0  ;;  %4570 = vmatmul.mubr.msk.f32.gmra.mrb[52].mxu1 %vm7597_vm4, %v2725_v4  ;;  %v2727_v8 = vmul.f32 %v4496_v58, %v3970_v18  ;;  %vm7609_vm4 = vmmov %vm7602_vm0  ;;  %v2526_v25 = vsel %vm7213_vm2, %v2478_v7, %v2274_v33  ;;  %vm2591_vm11 = vcmp.eq.s32.totalorder %v2527_v59, %v5905_v1 }
 0x5d3   :  { %v2726_v10 = vmul.f32 %v3969_v17, %v1711_v13  ;;  %vm2590_vm8 = vcmp.eq.s32.totalorder %v2526_v25, %v5905_v1  ;;  %vm7611_vm1 = vmmov %vm7602_vm0  ;;  %v3978_v50 = vsel %vm2591_vm11, 1.0, %v7413_v24  ;;  %v4846_v1 = vld [vmem:[%s7337_s5 + $0x4] ss:$12 sps:$4 sm:$0xff]  }
 0x5d4   :  { %v3977_v29 = vsel %vm2590_vm8, 1.0, %v7413_v24  ;;  %vm7613_vm5 = vmmov %vm7602_vm0  ;;  %3497 = vmatprep.mubr.bf16.mxu0 %v4846_v1 }
 0x5d5   :  { %v4499_v12 = vpop.f32.mrb[64].mxu0  ;;  %4572 = vmatprep.mubr.msk.f32.mxu1 %vm7602_vm0, %v2726_v10  ;;  %vm7614_vm14 = vmmov %vm7602_vm0 }
 0x5d6   :  { %v1721_v36 = vpop.f32.mrb[65].mxu0  ;;  %4573 = vmatmul.mubr.msk.f32.gmra.mrb[54].mxu1 %vm7603_vm7, %v2727_v8  ;;  %v2729_v60 = vmul.f32 %v4499_v12, %v3972_v37  ;;  %vm4885_vm7 = vmmov 0  }
 0x5d7   :  { %v2728_v38 = vmul.f32 %v3971_v19, %v1721_v36 }
 0x5d9   :  { %v4502_v62 = vpop.f32.mrb[66].mxu0  ;;  %4575 = vmatprep.mubr.msk.f32.mxu1 %vm7608_vm3, %v2728_v38 }
 0x5da   :  { %v1731_v16 = vpop.f32.mrb[67].mxu0  ;;  %4576 = vmatmul.mubr.msk.f32.gmra.mrb[56].mxu1 %vm7609_vm4, %v2729_v60  ;;  %v2731_v55 = vmul.f32 %v4502_v62, %v3974_v47 }
 0x5db   :  { %v2730_v27 = vmul.f32 %v3973_v34, %v1731_v16 }
 0x5dd   :  { %v4505_v52 = vpop.f32.mrb[68].mxu0  ;;  %4578 = vmatprep.mubr.msk.f32.mxu1 %vm7610_vm13, %v2730_v27 }
 0x5de   :  { %v1741_v48 = vpop.f32.mrb[69].mxu0  ;;  %4579 = vmatmul.mubr.msk.f32.gmra.mrb[58].mxu1 %vm7611_vm1, %v2731_v55  ;;  %v2733_v57 = vmul.f32 %v4505_v52, %v3976_v54  ;;  %v4847_v54 = vld [vmem:[%s7337_s5 + $0x1c] ss:$12 sps:$4 sm:$0xff]  }
 0x5df   :  { %v2732_v30 = vmul.f32 %v3975_v20, %v1741_v48  ;;  %v4844_v20 = vld [vmem:[%s7337_s5] ss:$12 sps:$4 sm:$0xff]  }
 0x5e1   :  { %v4508_v40 = vpop.f32.mrb[70].mxu0  ;;  %4581 = vmatprep.mubr.msk.f32.mxu1 %vm7602_vm0, %v2732_v30 }
 0x5e2   :  { %v1751_v21 = vpop.f32.mrb[71].mxu0  ;;  %4582 = vmatmul.mubr.msk.f32.gmra.mrb[60].mxu1 %vm7612_vm12, %v2733_v57  ;;  %v2735_v46 = vmul.f32 %v4508_v40, %v3978_v50  ;;  %v4849_v50 = vld [vmem:[%s7337_s5 + $0x18] ss:$12 sps:$4 sm:$0xff]  }
 0x5e3   :  { %v2734_v51 = vmul.f32 %v3977_v29, %v1751_v21 }
 0x5e5   :  { %4584 = vmatprep.mubr.msk.f32.mxu1 %vm7613_vm5, %v2734_v51  ;;  %v4850_v51 = vld [vmem:[%s7337_s5 + $0x34] ss:$12 sps:$4 sm:$0xff]  }
 0x5e6   :  { %4585 = vmatmul.mubr.msk.f32.gmra.mrb[62].mxu1 %vm7614_vm14, %v2735_v46 }
 0x5e7   :  { %4603 = vmatprep.mubr.bf16.mxu1 %v4858_v53 }
 0x65d   :  { %v4517_v39 = vpop.f32.mrb[16].mxu1 }
 0x65e   :  { %v2946_v14 = vpop.f32.mrb[17].mxu1 }
 0x65f   :  { %v3217_v11 = vpack.c.bf16 %v4517_v39, %v2946_v14 }
 0x661   :  { %v4520_v32 = vpop.f32.mrb[18].mxu1 }
 0x662   :  { %v2956_v28 = vpop.f32.mrb[19].mxu1 }
 0x663   :  { %v3218_v26 = vpack.c.bf16 %v4520_v32, %v2956_v28  ;;  %v4853_v28 = vld [vmem:[%s7337_s5 + $0x4c] ss:$12 sps:$4 sm:$0xff]  }
 0x665   :  { %v4523_v5 = vpop.f32.mrb[20].mxu1 }
 0x666   :  { %v2966_v18 = vpop.f32.mrb[21].mxu1 }
 0x667   :  { %v3219_v61 = vpack.c.bf16 %v4523_v5, %v2966_v18 }
 0x669   :  { %v4526_v22 = vpop.f32.mrb[22].mxu1 }
 0x66a   :  { %v2976_v23 = vpop.f32.mrb[23].mxu1 }
 0x66b   :  { %v3220_v17 = vpack.c.bf16 %v4526_v22, %v2976_v23  ;;  %v4855_v23 = vld [vmem:[%s7337_s5 + $0x48] ss:$12 sps:$4 sm:$0xff]  }
 0x66d   :  { %v4529_v3 = vpop.f32.mrb[24].mxu1 }
 0x66e   :  { %v2986_v9 = vpop.f32.mrb[25].mxu1 }
 0x66f   :  { %v3221_v41 = vpack.c.bf16 %v4529_v3, %v2986_v9  ;;  %v4856_v3 = vld [vmem:[%s7337_s5 + $0x64] ss:$12 sps:$4 sm:$0xff]  }
 0x671   :  { %v4532_v4 = vpop.f32.mrb[26].mxu1 }
 0x672   :  { %v2996_v63 = vpop.f32.mrb[27].mxu1 }
 0x673   :  { %v3222_v33 = vpack.c.bf16 %v4532_v4, %v2996_v63 }
 0x675   :  { %v4535_v58 = vpop.f32.mrb[28].mxu1 }
 0x676   :  { %v3006_v0 = vpop.f32.mrb[29].mxu1 }
 0x677   :  { %v3223_v13 = vpack.c.bf16 %v4535_v58, %v3006_v0  ;;  %v4860_v58 = vld [vmem:[%s7337_s5 + $0x20] ss:$12 sps:$4 sm:$0xff]   ;;  %v4861_v0 = vld [vmem:[%s7337_s5 + $0x7c] ss:$12 sps:$4 sm:$0xff]  }
 0x679   :  { %v4538_v2 = vpop.f32.mrb[30].mxu1 }
 0x67a   :  { %v3016_v31 = vpop.f32.mrb[31].mxu1 }
 0x67b   :  { %v3224_v10 = vpack.c.bf16 %v4538_v2, %v3016_v31  ;;  %v4864_v2 = vld [vmem:[%s7337_s5 + $0x78] ss:$12 sps:$4 sm:$0xff]   ;;  %v4865_v31 = vld [vmem:[%s7337_s5 + $0x50] ss:$12 sps:$4 sm:$0xff]  }
 0x67d   :  { %v4541_v45 = vpop.f32.mrb[32].mxu1 }
 0x67e   :  { %v3026_v42 = vpop.f32.mrb[33].mxu1 }
 0x67f   :  { %v3225_v15 = vpack.c.bf16 %v4541_v45, %v3026_v42  ;;  %v4868_v45 = vld [vmem:[%s7337_s5 + $0x68] ss:$12 sps:$4 sm:$0xff]   ;;  %v4869_v42 = vld [vmem:[%s7337_s5 + $0x90] ss:$12 sps:$4 sm:$0xff]  }
 0x681   :  { %v4544_v8 = vpop.f32.mrb[34].mxu1  ;;  %4222 = vmatprep.subr.bf16.mxu0 %v3225_v15  ;;  %v4870_v15 = vld [vmem:[%s7337_s5 + $0x80] ss:$12 sps:$4 sm:$0xff]  }
 0x682   :  { %v3036_v19 = vpop.f32.mrb[35].mxu1  ;;  %4223 = vmatpush3.bf16.msra.mxu0 %v3217_v11  ;;  %v4852_v11 = vld [vmem:[%s7337_s5 + $0x30] ss:$12 sps:$4 sm:$0xff]  }
 0x683   :  { %v3226_v43 = vpack.c.bf16 %v4544_v8, %v3036_v19  ;;  %v4871_v8 = vld [vmem:[%s7337_s5 + $0xac] ss:$12 sps:$4 sm:$0xff]  }
 0x684   :  { %v4873_v19 = vld [vmem:[%s7337_s5 + $0x98] ss:$12 sps:$4 sm:$0xff]  }
 0x685   :  { %v4547_v12 = vpop.f32.mrb[36].mxu1  ;;  %4224 = vmatprep.subr.bf16.mxu0 %v3226_v43  ;;  %v4874_v43 = vld [vmem:[%s7337_s5 + $0xa8] ss:$12 sps:$4 sm:$0xff]  }
 0x686   :  { %v3046_v37 = vpop.f32.mrb[37].mxu1  ;;  %4225 = vmatpush3.bf16.msra.mxu0 %v3218_v26 }
 0x687   :  { %v3227_v36 = vpack.c.bf16 %v4547_v12, %v3046_v37  ;;  %v4875_v12 = vld [vmem:[%s7337_s5 + $0xb0] ss:$12 sps:$4 sm:$0xff]  }
 0x689   :  { %v4550_v44 = vpop.f32.mrb[38].mxu1  ;;  %4226 = vmatprep.subr.bf16.mxu0 %v3227_v36 }
 0x68a   :  { %v3056_v7 = vpop.f32.mrb[39].mxu1  ;;  %4227 = vmatpush3.bf16.msra.mxu0 %v3219_v61 }
 0x68b   :  { %v3228_v38 = vpack.c.bf16 %v4550_v44, %v3056_v7 }
 0x68d   :  { %v4553_v49 = vpop.f32.mrb[40].mxu1  ;;  %4228 = vmatprep.subr.bf16.mxu0 %v3228_v38 }
 0x68e   :  { %v3066_v56 = vpop.f32.mrb[41].mxu1  ;;  %4229 = vmatpush3.bf16.msra.mxu0 %v3220_v17 }
 0x68f   :  { %v3229_v35 = vpack.c.bf16 %v4553_v49, %v3066_v56  ;;  %v3260_v56 = vpop.permute.xlu0 %3259 }
 0x691   :  { %v4556_v60 = vpop.f32.mrb[42].mxu1  ;;  %4230 = vmatprep.subr.bf16.mxu0 %v3229_v35 }
 0x692   :  { %v3076_v34 = vpop.f32.mrb[43].mxu1  ;;  %4231 = vmatpush3.bf16.msra.mxu0 %v3221_v41 }
 0x693   :  { %v3230_v6 = vpack.c.bf16 %v4556_v60, %v3076_v34 }
 0x695   :  { %v4559_v62 = vpop.f32.mrb[44].mxu1  ;;  %4232 = vmatprep.subr.bf16.mxu0 %v3230_v6 }
 0x696   :  { %v3086_v47 = vpop.f32.mrb[45].mxu1  ;;  %4233 = vmatpush3.bf16.msra.mxu0 %v3222_v33  ;;  %v4859_v33 = vld [vmem:[%s7337_s5 + $0x60] ss:$12 sps:$4 sm:$0xff]  }
 0x697   :  { %v3231_v16 = vpack.c.bf16 %v4559_v62, %v3086_v47  ;;  %v3265_v47 = vpop.permute.xlu1 %3264 }
 0x699   :  { %v4562_v25 = vpop.f32.mrb[46].mxu1  ;;  %4234 = vmatprep.subr.bf16.mxu0 %v3231_v16 }
 0x69a   :  { %v3096_v27 = vpop.f32.mrb[47].mxu1  ;;  %4235 = vmatpush3.bf16.msra.mxu0 %v3223_v13  ;;  %v4863_v13 = vld [vmem:[%s7337_s5 + $0x38] ss:$12 sps:$4 sm:$0xff]  }
 0x69b   :  { %v3232_v59 = vpack.c.bf16 %v4562_v25, %v3096_v27  ;;  %v3270_v25 = vpop.permute.xlu0 %3269 }
 0x69d   :  { %v4565_v55 = vpop.f32.mrb[48].mxu1  ;;  %4236 = vmatprep.subr.bf16.mxu0 %v3232_v59 }
 0x69e   :  { %v3106_v52 = vpop.f32.mrb[49].mxu1  ;;  %4237 = vmatpush3.bf16.msra.mxu0 %v3224_v10  ;;  %v4866_v10 = vld [vmem:[%s7337_s5 + $0x94] ss:$12 sps:$4 sm:$0xff]  }
 0x69f   :  { %v3233_v48 = vpack.c.bf16 %v4565_v55, %v3106_v52  ;;  %v3275_v55 = vpop.permute.xlu1 %3274 }
 0x6a1   :  { %v4568_v30 = vpop.f32.mrb[50].mxu1  ;;  %3498 = vmatmul.mubr.bf16.vlgmr.msra.gmra.mrb[72].mxu0 %v4844_v20  ;;  %4587 = vmatprep.subr.bf16.mxu1 %v3233_v48 }
 0x6a2   :  { %v3116_v57 = vpop.f32.mrb[51].mxu1  ;;  %4588 = vmatpush3.bf16.msra.mxu1 %v3233_v48  ;;  %3505 = vmatprep.mubr.bf16.mxu0 %v4847_v54  ;;  %v3280_v54 = vpop.permute.xlu0 %3279 }
 0x6a3   :  { %v3234_v29 = vpack.c.bf16 %v4568_v30, %v3116_v57  ;;  %v3285_v57 = vpop.permute.xlu1 %3284 }
 0x6a5   :  { %v4571_v40 = vpop.f32.mrb[52].mxu1  ;;  %4589 = vmatprep.subr.bf16.mxu1 %v3234_v29 }
 0x6a6   :  { %v3126_v21 = vpop.f32.mrb[53].mxu1  ;;  %4590 = vmatpush3.bf16.msra.mxu1 %v3234_v29 }
 0x6a7   :  { %v3235_v46 = vpack.c.bf16 %v4571_v40, %v3126_v21  ;;  %v3290_v40 = vpop.permute.xlu0 %3289 }
 0x6a9   :  { %v4574_v1 = vpop.f32.mrb[54].mxu1  ;;  %3506 = vmatmul.mubr.bf16.gmra.mrb[76].mxu0 %v4849_v50  ;;  %4591 = vmatprep.subr.bf16.mxu1 %v3235_v46 }
 0x6aa   :  { %v3136_v53 = vpop.f32.mrb[55].mxu1  ;;  %4592 = vmatpush3.bf16.msra.mxu1 %v3235_v46  ;;  %3513 = vmatprep.mubr.bf16.mxu0 %v4850_v51 }
 0x6ab   :  { %v3236_v39 = vpack.c.bf16 %v4574_v1, %v3136_v53  ;;  %v3295_v53 = vpop.permute.xlu1 %3294 }
 0x6ad   :  { %v4577_v14 = vpop.f32.mrb[56].mxu1  ;;  %4593 = vmatprep.subr.bf16.mxu1 %v3236_v39 }
 0x6ae   :  { %v3146_v32 = vpop.f32.mrb[57].mxu1  ;;  %4594 = vmatpush3.bf16.msra.mxu1 %v3236_v39  ;;  %v3300_v39 = vpop.permute.xlu0 %3299 }
 0x6af   :  { %v3237_v26 = vpack.c.bf16 %v4577_v14, %v3146_v32 }
 0x6b1   :  { %v4580_v5 = vpop.f32.mrb[58].mxu1  ;;  %3514 = vmatmul.mubr.bf16.gmra.mrb[80].mxu0 %v4852_v11  ;;  %4595 = vmatprep.subr.bf16.mxu1 %v3237_v26 }
 0x6b2   :  { %v3156_v18 = vpop.f32.mrb[59].mxu1  ;;  %4596 = vmatpush3.bf16.msra.mxu1 %v3237_v26  ;;  %3521 = vmatprep.mubr.bf16.mxu0 %v4853_v28 }
 0x6b3   :  { %v3238_v61 = vpack.c.bf16 %v4580_v5, %v3156_v18 }
 0x6b5   :  { %v4583_v22 = vpop.f32.mrb[60].mxu1  ;;  %4597 = vmatprep.subr.bf16.mxu1 %v3238_v61 }
 0x6b6   :  { %v3166_v17 = vpop.f32.mrb[61].mxu1  ;;  %4598 = vmatpush3.bf16.msra.mxu1 %v3238_v61 }
 0x6b7   :  { %v3239_v9 = vpack.c.bf16 %v4583_v22, %v3166_v17 }
 0x6b9   :  { %v4586_v41 = vpop.f32.mrb[62].mxu1  ;;  %3522 = vmatmul.mubr.bf16.gmra.mrb[84].mxu0 %v4855_v23  ;;  %4599 = vmatprep.subr.bf16.mxu1 %v3239_v9 }
 0x6ba   :  { %v3176_v4 = vpop.f32.mrb[63].mxu1  ;;  %4600 = vmatpush3.bf16.msra.mxu1 %v3239_v9  ;;  %3529 = vmatprep.mubr.bf16.mxu0 %v4856_v3 }
 0x6bb   :  { %v3240_v63 = vpack.c.bf16 %v4586_v41, %v3176_v4 }
 0x6bd   :  { %4601 = vmatprep.subr.bf16.mxu1 %v3240_v63 }
 0x6be   :  { %4602 = vmatpush3.bf16.msra.mxu1 %v3240_v63 }
 0x6bf   :  { %4619 = vmatprep.subr.bf16.mxu1 %v7413_v24 }
 0x6c1   :  { %3530 = vmatmul.mubr.bf16.gmra.mrb[88].mxu0 %v4859_v33  ;;  %4604 = vmatmul.mubr.bf16.vlgmr.msra.gmra.mrb[64].mxu1 %v4860_v58 }
 0x6c2   :  { %3537 = vmatprep.mubr.bf16.mxu0 %v4861_v0  ;;  %4607 = vmatprep.mubr.bf16.mxu1 %v4863_v13 }
 0x6c9   :  { %3538 = vmatmul.mubr.bf16.gmra.mrb[92].mxu0 %v4864_v2  ;;  %4608 = vmatmul.mubr.bf16.gmra.mrb[68].mxu1 %v4865_v31 }
 0x6ca   :  { %3545 = vmatprep.mubr.bf16.mxu0 %v4866_v10  ;;  %4611 = vmatprep.mubr.bf16.mxu1 %v4868_v45  ;;  %v3305_v10 = vpop.permute.xlu1 %3304  ;;  %v3310_v45 = vpop.permute.xlu0 %3309 }
 0x6d1   :  { %3546 = vmatmul.mubr.bf16.gmra.mrb[96].mxu0 %v4869_v42  ;;  %4612 = vmatmul.mubr.bf16.gmra.mrb[72].mxu1 %v4870_v15 }
 0x6d2   :  { %3553 = vmatprep.mubr.bf16.mxu0 %v4871_v8  ;;  %4615 = vmatprep.mubr.bf16.mxu1 %v4873_v19 }
 0x6d9   :  { %3554 = vmatmul.mubr.bf16.gmra.mrb[100].mxu0 %v4874_v43  ;;  %4616 = vmatmul.mubr.bf16.gmra.mrb[76].mxu1 %v4875_v12 }
 0x6da   :  { %4635 = vmatprep.mubr.msk.bf16.mxu1 %vm4885_vm7, %v7413_v24 }
 0x774   :  { %v4238_v37 = vpop.f32.mrb[72].mxu0 }
 0x775   :  { %v4239_v36 = vpop.f32.mrb[73].mxu0 }
 0x776   :  { %v4240_v44 = vadd.f32 %v4239_v36, %v4238_v37  ;;  %v4241_v7 = vpop.f32.mrb[74].mxu0 }
 0x777   :  { %v4242_v38 = vpop.f32.mrb[75].mxu0 }
 0x778   :  { %v4243_v49 = vadd.f32 %v4242_v38, %v4241_v7  ;;  %v3500_v28 = vadd.f32 %v4240_v44, %v3260_v56 }
 0x77a   :  { %v3503_v9 = vadd.f32 %v4243_v49, %v3265_v47 }
 0x77c   :  { %v4244_v35 = vpop.f32.mrb[76].mxu0 }
 0x77d   :  { %v4245_v60 = vpop.f32.mrb[77].mxu0 }
 0x77e   :  { %v4246_v34 = vadd.f32 %v4245_v60, %v4244_v35  ;;  %v4247_v6 = vpop.f32.mrb[78].mxu0 }
 0x77f   :  { %v4248_v62 = vpop.f32.mrb[79].mxu0 }
 0x780   :  { %v4249_v16 = vadd.f32 %v4248_v62, %v4247_v6  ;;  %v3508_v14 = vadd.f32 %v4246_v34, %v3270_v25 }
 0x782   :  { %v3511_v61 = vadd.f32 %v4249_v16, %v3275_v55 }
 0x784   :  { %v4250_v27 = vpop.f32.mrb[80].mxu0 }
 0x785   :  { %v4251_v59 = vpop.f32.mrb[81].mxu0 }
 0x786   :  { %v4252_v20 = vadd.f32 %v4251_v59, %v4250_v27  ;;  %v4253_v52 = vpop.f32.mrb[82].mxu0 }
 0x787   :  { %v4254_v48 = vpop.f32.mrb[83].mxu0 }
 0x788   :  { %v4255_v30 = vadd.f32 %v4254_v48, %v4253_v52  ;;  %v3516_v12 = vadd.f32 %v4252_v20, %v3280_v54  ;;  %v3315_v20 = vpop.permute.xlu1 %3314  ;;  %v3320_v52 = vpop.permute.xlu0 %3319 }
 0x78a   :  { %v3519_v60 = vadd.f32 %v4255_v30, %v3285_v57 }
 0x78c   :  { %v4256_v29 = vpop.f32.mrb[84].mxu0 }
 0x78d   :  { %v4257_v50 = vpop.f32.mrb[85].mxu0 }
 0x78e   :  { %v4258_v21 = vadd.f32 %v4257_v50, %v4256_v29  ;;  %v4259_v51 = vpop.f32.mrb[86].mxu0 }
 0x78f   :  { %v4260_v46 = vpop.f32.mrb[87].mxu0 }
 0x790   :  { %v4261_v1 = vadd.f32 %v4260_v46, %v4259_v51  ;;  %v3524_v15 = vadd.f32 %v4258_v21, %v3290_v40 }
 0x792   :  { %v3527_v7 = vadd.f32 %v4261_v1, %v3295_v53 }
 0x794   :  { %v4262_v11 = vpop.f32.mrb[88].mxu0  ;;  %v4605_v32 = vpop.f32.mrb[64].mxu1 }
 0x795   :  { %v3605_v26 = vadd.f32 %v4605_v32, %v3508_v14  ;;  %v4263_v5 = vpop.f32.mrb[89].mxu0  ;;  %v3596_v18 = vpop.f32.mrb[65].mxu1 }
 0x796   :  { %v4264_v22 = vadd.f32 %v4263_v5, %v4262_v11  ;;  %v3597_v23 = vadd.f32 %v3596_v18, %v3500_v28  ;;  %v4265_v17 = vpop.f32.mrb[90].mxu0  ;;  %v4606_v3 = vpop.f32.mrb[66].mxu1 }
 0x797   :  { %v3608_v41 = vadd.f32 %v4606_v3, %v3511_v61  ;;  %v4266_v4 = vpop.f32.mrb[91].mxu0  ;;  %v3599_v63 = vpop.f32.mrb[67].mxu1  ;;  %v3661_v0 = vmax.f32 %v3605_v26, 0.0 }
 0x798   :  { %v4267_v33 = vadd.f32 %v4266_v4, %v4265_v17  ;;  %v3600_v58 = vadd.f32 %v3599_v63, %v3503_v9  ;;  %v3659_v2 = vmax.f32 %v3597_v23, 0.0  ;;  %v3532_v40 = vadd.f32 %v4264_v22, %v3300_v39  ;;  %v3325_v3 = vpop.permute.xlu1 %3324  ;;  %v3330_v9 = vpop.permute.xlu0 %3329 }
 0x799   :  { %v3662_v13 = vmax.f32 %v3608_v41, 0.0 }
 0x79a   :  { %v3660_v31 = vmax.f32 %v3600_v58, 0.0  ;;  %v3535_v32 = vadd.f32 %v4267_v33, %v3305_v10 }
 0x79b   :  { %v3677_v42 = vpack.c.bf16 %v3662_v13, %v3661_v0 }
 0x79c   :  { %v3676_v8 = vpack.c.bf16 %v3660_v31, %v3659_v2  ;;  %v4268_v19 = vpop.f32.mrb[92].mxu0  ;;  %v4609_v43 = vpop.f32.mrb[68].mxu1 }
 0x79d   :  { %v3621_v37 = vadd.f32 %v4609_v43, %v3524_v15  ;;  %v4269_v36 = vpop.f32.mrb[93].mxu0  ;;  %v3612_v44 = vpop.f32.mrb[69].mxu1 }
 0x79e   :  { %v4270_v38 = vadd.f32 %v4269_v36, %v4268_v19  ;;  %v3613_v49 = vadd.f32 %v3612_v44, %v3516_v12  ;;  %v4271_v56 = vpop.f32.mrb[94].mxu0  ;;  %v4610_v35 = vpop.f32.mrb[70].mxu1  ;;  %4620 = vmatpush3.bf16.msra.mxu1 %v3676_v8 }
 0x79f   :  { %v3624_v34 = vadd.f32 %v4610_v35, %v3527_v7  ;;  %v4272_v6 = vpop.f32.mrb[95].mxu0  ;;  %v3615_v62 = vpop.f32.mrb[71].mxu1  ;;  %4621 = vmatprep.subr.bf16.mxu1 %v7413_v24  ;;  %v3665_v25 = vmax.f32 %v3621_v37, 0.0 }
 0x7a0   :  { %v4273_v47 = vadd.f32 %v4272_v6, %v4271_v56  ;;  %v3616_v16 = vadd.f32 %v3615_v62, %v3519_v60  ;;  %v3663_v59 = vmax.f32 %v3613_v49, 0.0  ;;  %v3540_v48 = vadd.f32 %v4270_v38, %v3310_v45  ;;  %v3335_v37 = vpop.permute.xlu1 %3334  ;;  %v3675_v6 = vld [vmem:[%s7338_s7] sm:$0xf]  ;;  %v3688_v62 = vpop.permute.xlu0 %3687 }
 0x7a1   :  { %v3666_v27 = vmax.f32 %v3624_v34, 0.0 }
 0x7a2   :  { %v3664_v55 = vmax.f32 %v3616_v16, 0.0  ;;  %4622 = vmatpush3.bf16.msra.mxu1 %v3677_v42  ;;  %v3543_v46 = vadd.f32 %v4273_v47, %v3315_v20 }
 0x7a3   :  { %v3679_v54 = vpack.c.bf16 %v3666_v27, %v3665_v25  ;;  %4623 = vmatprep.subr.bf16.mxu1 %v7413_v24 }
 0x7a4   :  { %v3678_v29 = vpack.c.bf16 %v3664_v55, %v3663_v59  ;;  %v4274_v30 = vpop.f32.mrb[96].mxu0  ;;  %v4613_v57 = vpop.f32.mrb[72].mxu1 }
 0x7a5   :  { %v3637_v50 = vadd.f32 %v4613_v57, %v3540_v48  ;;  %v4275_v21 = vpop.f32.mrb[97].mxu0  ;;  %v3628_v51 = vpop.f32.mrb[73].mxu1 }
 0x7a6   :  { %v4276_v1 = vadd.f32 %v4275_v21, %v4274_v30  ;;  %v3629_v53 = vadd.f32 %v3628_v51, %v3532_v40  ;;  %v4277_v14 = vpop.f32.mrb[98].mxu0  ;;  %v4614_v11 = vpop.f32.mrb[74].mxu1  ;;  %4624 = vmatpush3.bf16.msra.mxu1 %v3678_v29 }
 0x7a7   :  { %v3640_v28 = vadd.f32 %v4614_v11, %v3543_v46  ;;  %v4278_v26 = vpop.f32.mrb[99].mxu0  ;;  %v3631_v5 = vpop.f32.mrb[75].mxu1  ;;  %4625 = vmatprep.subr.bf16.mxu1 %v7413_v24  ;;  %v3669_v23 = vmax.f32 %v3637_v50, 0.0 }
 0x7a8   :  { %v4279_v18 = vadd.f32 %v4278_v26, %v4277_v14  ;;  %v3632_v61 = vadd.f32 %v3631_v5, %v3535_v32  ;;  %v3667_v39 = vmax.f32 %v3629_v53, 0.0  ;;  %v3548_v58 = vadd.f32 %v4276_v1, %v3320_v52 }
 0x7a9   :  { %v3670_v17 = vmax.f32 %v3640_v28, 0.0 }
 0x7aa   :  { %v3668_v22 = vmax.f32 %v3632_v61, 0.0  ;;  %4626 = vmatpush3.bf16.msra.mxu1 %v3679_v54  ;;  %v3551_v42 = vadd.f32 %v4279_v18, %v3325_v3 }
 0x7ab   :  { %v3681_v41 = vpack.c.bf16 %v3670_v17, %v3669_v23  ;;  %4627 = vmatprep.subr.bf16.mxu1 %v7413_v24 }
 0x7ac   :  { %v3680_v4 = vpack.c.bf16 %v3668_v22, %v3667_v39  ;;  %v4280_v63 = vpop.f32.mrb[100].mxu0  ;;  %v4617_v33 = vpop.f32.mrb[76].mxu1 }
 0x7ad   :  { %v4281_v0 = vpop.f32.mrb[101].mxu0  ;;  %v3644_v13 = vpop.f32.mrb[77].mxu1 }
 0x7ae   :  { %v4282_v2 = vadd.f32 %v4281_v0, %v4280_v63  ;;  %v3645_v31 = vadd.f32 %v3644_v13, %v3548_v58  ;;  %v4283_v10 = vpop.f32.mrb[102].mxu0  ;;  %v4618_v45 = vpop.f32.mrb[78].mxu1  ;;  %4628 = vmatpush3.bf16.msra.mxu1 %v3680_v4 }
 0x7af   :  { %v4284_v15 = vpop.f32.mrb[103].mxu0  ;;  %v3647_v8 = vpop.f32.mrb[79].mxu1  ;;  %4629 = vmatprep.subr.bf16.mxu1 %v7413_v24 }
 0x7b0   :  { %v3556_v19 = vadd.f32 %v4282_v2, %v3330_v9  ;;  %v4285_v43 = vadd.f32 %v4284_v15, %v4283_v10  ;;  %v3648_v12 = vadd.f32 %v3647_v8, %v3551_v42  ;;  %v3671_v44 = vmax.f32 %v3645_v31, 0.0 }
 0x7b2   :  { %v3653_v36 = vadd.f32 %v4617_v33, %v3556_v19  ;;  %v3559_v7 = vadd.f32 %v4285_v43, %v3335_v37  ;;  %v3672_v38 = vmax.f32 %v3648_v12, 0.0  ;;  %4630 = vmatpush3.bf16.msra.mxu1 %v3681_v41 }
 0x7b3   :  { %4631 = vmatprep.subr.bf16.mxu1 %v7413_v24 }
 0x7b4   :  { %v3656_v49 = vadd.f32 %v4618_v45, %v3559_v7  ;;  %v3682_v56 = vpack.c.bf16 %v3672_v38, %v3671_v44  ;;  %v3673_v35 = vmax.f32 %v3653_v36, 0.0 }
 0x7b6   :  { %v3674_v60 = vmax.f32 %v3656_v49, 0.0  ;;  %4632 = vmatpush3.bf16.msra.mxu1 %v3682_v56 }
 0x7b7   :  { %4633 = vmatprep.subr.bf16.mxu1 %v7413_v24 }
 0x7b8   :  { %v3683_v34 = vpack.c.bf16 %v3674_v60, %v3673_v35 }
 0x7ba   :  { %4634 = vmatpush3.bf16.msra.mxu1 %v3683_v34 }
 0x7bd   :  { %4636 = vmatmul.mubr.bf16.vlgmr.msra.gmra.mrb[80].mxu1 %v3675_v6 }
 0x890   :  { %v3724_v47 = vpop.f32.mrb[80].mxu1 }
 0x891   :  { %v3725_v16 = vadd.f32 %v3724_v47, %v3688_v62  ;;  %v4637_v25 = vpop.f32.mrb[81].mxu1 }
 0x892   :  { %v3727_v27 = vpop.f32.mrb[82].mxu1 }
 0x893   :  { %3731 = vst.msk [vmem:[%s7339_s9] sm:$0xff] %vm3730_vm15, %v3725_v16  ;;  %v4638_v59 = vpop.f32.mrb[83].mxu1 }

</bundles_post_ra>
